<compile_context>
chip_gen: v7x
topology: tpu7x:2x2x1
jax: 0.10.0
libtpu: 0.0.40
codegen_flags: <defaults>
</compile_context>

<pallas_src>
import jax
import jax.numpy as jnp
from jax.experimental import pallas as pl
from jax.experimental.pallas import tpu as pltpu

# -------------------- small synthetic BERT config --------------------
B, S, H = 2, 8, 32            # batch, seq len, hidden
NUM_HEADS, HEAD_DIM = 4, 8    # H = NUM_HEADS * HEAD_DIM
FFN = 64                      # intermediate size
LAYERS = 2                    # encoder layers
VOCAB = 128                   # vocab size
NUM_CLASSES = 2               # final nn.Linear(768, 2) analogue
EPS = 1e-12                   # BERT layer-norm eps

# Packed width-H parameter vectors (one (NVEC, H) array, static row indices):
#   row 0: emb_ln_gamma, row 1: emb_ln_beta
#   per layer l, base = 2 + 6*l:
#     +0 attn-output bias, +1 ln1_gamma, +2 ln1_beta,
#     +3 ffn-output bias,  +4 ln2_gamma, +5 ln2_beta
NVEC = 2 + 6 * LAYERS


def _gelu(x):
    # tanh approximation of GELU (BERT-style); f32 VPU/EUP math.
    c = jnp.float32(0.7978845608028654)  # sqrt(2/pi)
    return 0.5 * x * (1.0 + jnp.tanh(c * (x + 0.044715 * x * x * x)))


def _layer_norm(x, g, b):
    mean = jnp.mean(x, axis=-1, keepdims=True)
    var = jnp.mean(jnp.square(x - mean), axis=-1, keepdims=True)
    return (x - mean) * jax.lax.rsqrt(var + EPS) * g + b


# -------------------- fused whole-forward Pallas kernel --------------------
def _bert_encoder_kernel(emb_ref, maskb_ref, vecs_ref, bqkv_ref, b1_ref,
                         wqkv_ref, wo_ref, w1_ref, w2_ref, cls_ref):
    scale = jnp.float32(1.0 / (HEAD_DIM ** 0.5))
    bf = jnp.bfloat16

    def vrow(i):                       # static row -> (1, H) f32 view
        return vecs_ref[i:i + 1, :]

    cls_rows = []
    for b in range(B):                 # batch unrolled inside one grid step
        # Activations stay f32 for all elementwise / LayerNorm / softmax
        # math (VPU/EUP path; v5e has no bf16 there).  Only MXU dot inputs
        # are cast to bf16 (f32 accumulation on all generations).
        x = emb_ref[b].astype(jnp.float32)                       # (S, H)
        x = _layer_norm(x, vrow(0), vrow(1))
        key_bias = maskb_ref[b]                                  # (1, S)

        for l in range(LAYERS):
            base = 2 + 6 * l
            xb = jnp.broadcast_to(x.astype(bf), (NUM_HEADS, S, H))

            # ---- head-blocked Q/K/V: batched over leading head axis ----
            q = jnp.einsum('nsh,nhd->nsd', xb, wqkv_ref[l, 0],
                           preferred_element_type=jnp.float32) + bqkv_ref[l, 0]
            k = jnp.einsum('nsh,nhd->nsd', xb, wqkv_ref[l, 1],
                           preferred_element_type=jnp.float32) + bqkv_ref[l, 1]
            v = jnp.einsum('nsh,nhd->nsd', xb, wqkv_ref[l, 2],
                           preferred_element_type=jnp.float32) + bqkv_ref[l, 2]

            # ---- all-head scores + single softmax per layer ----
            s = jnp.einsum('nsd,ntd->nst', q.astype(bf), k.astype(bf),
                           preferred_element_type=jnp.float32) * scale
            s = s + key_bias                                     # mask keys
            s = s - jnp.max(s, axis=-1, keepdims=True)
            p = jnp.exp(s)
            p = p * pl.reciprocal(jnp.sum(p, axis=-1, keepdims=True),
                                  approx=True)

            # ---- context + output projection (batched, then head-sum) ----
            ctx = jnp.einsum('nst,ntd->nsd', p.astype(bf), v.astype(bf),
                             preferred_element_type=jnp.float32)
            proj = jnp.einsum('nsd,ndh->nsh', ctx.astype(bf), wo_ref[l],
                              preferred_element_type=jnp.float32)
            attn = jnp.sum(proj, axis=0) + vrow(base + 0)        # (S, H)

            # ---- residual + LayerNorm 1 ----
            x = _layer_norm(attn + x, vrow(base + 1), vrow(base + 2))

            # ---- fused FFN: (S, FFN) intermediate never leaves VMEM ----
            hdn = jnp.dot(x.astype(bf), w1_ref[l],
                          preferred_element_type=jnp.float32) + b1_ref[l]
            hdn = _gelu(hdn)
            hdn = jnp.dot(hdn.astype(bf), w2_ref[l],
                          preferred_element_type=jnp.float32) + vrow(base + 3)

            # ---- residual + LayerNorm 2 ----
            x = _layer_norm(hdn + x, vrow(base + 4), vrow(base + 5))

        cls_rows.append(x[0:1, :])                               # [CLS] row

    # single dense store of both [CLS] hidden rows
    cls_ref[...] = jnp.concatenate(cls_rows, axis=0).astype(cls_ref.dtype)


# -------------------- parameters --------------------
def init_params(key):
    keys = iter(jax.random.split(key, 8))

    def w(shape):
        return jax.random.normal(next(keys), shape, jnp.float32) * 0.02

    params = {
        "word_emb": w((VOCAB, H)),
        "pos_emb": w((S, H)),
        "type_emb": w((2, H)),
        # head-blocked projection weights (equivalent parameterization of the
        # per-layer nn.Linear(H, H) for q / k / v and the output projection).
        "wqkv": w((LAYERS, 3, NUM_HEADS, H, HEAD_DIM)),
        "bqkv": jnp.zeros((LAYERS, 3, NUM_HEADS, 1, HEAD_DIM), jnp.float32),
        "wo": w((LAYERS, NUM_HEADS, HEAD_DIM, H)),
        "w1": w((LAYERS, H, FFN)),
        "b1": jnp.zeros((LAYERS, 1, FFN), jnp.float32),
        "w2": w((LAYERS, FFN, H)),
        "cls_w": w((H, NUM_CLASSES)),
        "cls_b": jnp.zeros((NUM_CLASSES,), jnp.float32),
    }
    # packed width-H vectors (see NVEC layout comment above)
    rows = [jnp.ones((H,), jnp.float32), jnp.zeros((H,), jnp.float32)]
    for _ in range(LAYERS):
        rows += [jnp.zeros((H,), jnp.float32),  # attn out bias
                 jnp.ones((H,), jnp.float32),   # ln1 gamma
                 jnp.zeros((H,), jnp.float32),  # ln1 beta
                 jnp.zeros((H,), jnp.float32),  # ffn out bias
                 jnp.ones((H,), jnp.float32),   # ln2 gamma
                 jnp.zeros((H,), jnp.float32)]  # ln2 beta
    params["vecs"] = jnp.stack(rows)            # (NVEC, H)
    return params


# -------------------- forward pass --------------------
def bert_classifier_forward(params, input_ids, attention_mask):
    # Embedding lookup (gather) is XLA glue; token_type_ids == 0 everywhere.
    we = jnp.take(params["word_emb"], input_ids, axis=0)          # (B, S, H)
    pe = params["pos_emb"][None, :, :]                            # (1, S, H)
    te = params["type_emb"][0][None, None, :]                     # (1, 1, H)
    emb = (we + pe + te).astype(jnp.float32)                      # (B, S, H)
    mask_bias = ((1.0 - attention_mask.astype(jnp.float32))
                 * jnp.float32(-1e4)).reshape(B, 1, S)            # (B, 1, S)

    bf = jnp.bfloat16
    vmem = pl.BlockSpec(memory_space=pltpu.MemorySpace.VMEM)      # whole array
    inputs = (
        emb, mask_bias, params["vecs"], params["bqkv"], params["b1"],
        params["wqkv"].astype(bf), params["wo"].astype(bf),
        params["w1"].astype(bf), params["w2"].astype(bf),
    )

    cls_hidden = pl.pallas_call(
        _bert_encoder_kernel,
        out_shape=jax.ShapeDtypeStruct((B, H), jnp.float32),
        in_specs=[vmem] * len(inputs),
        out_specs=vmem,
    )(*inputs)

    # 2-class head on the [CLS] hidden state stays in XLA (tiny, lane-dense),
    # matching `self.dense(bert_output[0][:, 0, :])`.
    return cls_hidden @ params["cls_w"] + params["cls_b"]


# -------------------- driver --------------------
if __name__ == "__main__":
    key = jax.random.PRNGKey(0)
    k_param, k_ids = jax.random.split(key)

    params = init_params(k_param)

    # Pre-tokenized synthetic batch (see TODO(synk) about the tokenizer).
    input_ids = jax.random.randint(k_ids, (B, S), 0, VOCAB, dtype=jnp.int32)
    attention_mask = jnp.array(
        [[1, 1, 1, 1, 1, 1, 1, 1],
         [1, 1, 1, 1, 1, 1, 0, 0]], dtype=jnp.int32)

    fwd = jax.jit(bert_classifier_forward)
    logits = jax.block_until_ready(fwd(params, input_ids, attention_mask))

    assert logits.shape == (B, NUM_CLASSES)
    assert bool(jnp.all(jnp.isfinite(logits)))
    print("KERNEL_OK")
</pallas_src>

<mosaic_0001>
module attributes {stable_mosaic.version = 11 : i64} {
  func.func @_bert_encoder_kernel(%arg0: memref<2x8x32xf32, #tpu.memory_space<vmem>>, %arg1: memref<2x1x8xf32, #tpu.memory_space<vmem>>, %arg2: memref<14x32xf32, #tpu.memory_space<vmem>>, %arg3: memref<2x3x4x1x8xf32, #tpu.memory_space<vmem>>, %arg4: memref<2x1x64xf32, #tpu.memory_space<vmem>>, %arg5: memref<2x3x4x32x8xbf16, #tpu.memory_space<vmem>>, %arg6: memref<2x4x8x32xbf16, #tpu.memory_space<vmem>>, %arg7: memref<2x32x64xbf16, #tpu.memory_space<vmem>>, %arg8: memref<2x64x32xbf16, #tpu.memory_space<vmem>>, %arg9: memref<2x32xf32, #tpu.memory_space<vmem>>) attributes {dimension_semantics = [], scalar_prefetch = 0 : i64, scratch_operands = 0 : i64, tpu.core_type = #tpu.core_type<tc>} {
    %c0 = arith.constant 0 : index
    %c0_0 = arith.constant 0 : index
    %c0_1 = arith.constant 0 : index
    %0 = vector.load %arg0[%c0, %c0_0, %c0_1] : memref<2x8x32xf32, #tpu.memory_space<vmem>>, vector<1x8x32xf32>
    %1 = vector.shape_cast %0 : vector<1x8x32xf32> to vector<8x32xf32>
    %c0_2 = arith.constant 0 : index
    %c0_3 = arith.constant 0 : index
    %2 = vector.load %arg2[%c0_2, %c0_3] : memref<14x32xf32, #tpu.memory_space<vmem>>, vector<1x32xf32>
    %c1 = arith.constant 1 : index
    %c0_4 = arith.constant 0 : index
    %3 = vector.load %arg2[%c1, %c0_4] : memref<14x32xf32, #tpu.memory_space<vmem>>, vector<1x32xf32>
    %cst = arith.constant dense<0.000000e+00> : vector<8xf32>
    %4 = vector.multi_reduction <add>, %1, %cst [1] : vector<8x32xf32> to vector<8xf32>
    %5 = vector.shape_cast %4 : vector<8xf32> to vector<8x1xf32>
    %cst_5 = arith.constant 3.200000e+01 : f32
    %6 = vector.broadcast %cst_5 : f32 to vector<8x1xf32>
    %7 = arith.divf %5, %6 : vector<8x1xf32>
    %8 = vector.broadcast %7 : vector<8x1xf32> to vector<8x32xf32>
    %9 = arith.subf %1, %8 : vector<8x32xf32>
    %10 = arith.mulf %9, %9 : vector<8x32xf32>
    %cst_6 = arith.constant dense<0.000000e+00> : vector<8xf32>
    %11 = vector.multi_reduction <add>, %10, %cst_6 [1] : vector<8x32xf32> to vector<8xf32>
    %12 = vector.shape_cast %11 : vector<8xf32> to vector<8x1xf32>
    %cst_7 = arith.constant 3.200000e+01 : f32
    %13 = vector.broadcast %cst_7 : f32 to vector<8x1xf32>
    %14 = arith.divf %12, %13 : vector<8x1xf32>
    %15 = vector.broadcast %7 : vector<8x1xf32> to vector<8x32xf32>
    %16 = arith.subf %1, %15 : vector<8x32xf32>
    %cst_8 = arith.constant 9.99999996E-13 : f32
    %17 = vector.broadcast %cst_8 : f32 to vector<8x1xf32>
    %18 = arith.addf %14, %17 : vector<8x1xf32>
    %19 = math.rsqrt %18 : vector<8x1xf32>
    %20 = vector.broadcast %19 : vector<8x1xf32> to vector<8x32xf32>
    %21 = arith.mulf %16, %20 : vector<8x32xf32>
    %22 = vector.broadcast %2 : vector<1x32xf32> to vector<8x32xf32>
    %23 = arith.mulf %21, %22 : vector<8x32xf32>
    %24 = vector.broadcast %3 : vector<1x32xf32> to vector<8x32xf32>
    %25 = arith.addf %23, %24 : vector<8x32xf32>
    %c0_9 = arith.constant 0 : index
    %c0_10 = arith.constant 0 : index
    %c0_11 = arith.constant 0 : index
    %26 = vector.load %arg1[%c0_9, %c0_10, %c0_11] : memref<2x1x8xf32, #tpu.memory_space<vmem>>, vector<1x1x8xf32>
    %27 = vector.shape_cast %26 : vector<1x1x8xf32> to vector<1x8xf32>
    %28 = arith.truncf %25 : vector<8x32xf32> to vector<8x32xbf16>
    %29 = vector.shape_cast %28 : vector<8x32xbf16> to vector<1x8x32xbf16>
    %30 = vector.broadcast %29 : vector<1x8x32xbf16> to vector<4x8x32xbf16>
    %c0_12 = arith.constant 0 : index
    %c0_13 = arith.constant 0 : index
    %c0_14 = arith.constant 0 : index
    %c0_15 = arith.constant 0 : index
    %c0_16 = arith.constant 0 : index
    %31 = vector.load %arg5[%c0_12, %c0_13, %c0_14, %c0_15, %c0_16] : memref<2x3x4x32x8xbf16, #tpu.memory_space<vmem>>, vector<1x1x4x32x8xbf16>
    %32 = vector.shape_cast %31 : vector<1x1x4x32x8xbf16> to vector<4x32x8xbf16>
    "tpu.trace_start"() <{level = 10 : i32, message = "nsh,nhd->nsd"}> : () -> ()
    %cst_17 = arith.constant dense<0.000000e+00> : vector<4x8x8xf32>
    %33 = tpu.matmul %30, %32, %cst_17 {dimension_numbers = #tpu.dot_dimension_numbers<[2], [1], [1], [2], [0, 0, 0, 1, 1, 2], [0], [0]>} : vector<4x8x32xbf16>, vector<4x32x8xbf16>, vector<4x8x8xf32> -> vector<4x8x8xf32>
    "tpu.trace_stop"() : () -> ()
    %c0_18 = arith.constant 0 : index
    %c0_19 = arith.constant 0 : index
    %c0_20 = arith.constant 0 : index
    %c0_21 = arith.constant 0 : index
    %c0_22 = arith.constant 0 : index
    %34 = vector.load %arg3[%c0_18, %c0_19, %c0_20, %c0_21, %c0_22] : memref<2x3x4x1x8xf32, #tpu.memory_space<vmem>>, vector<1x1x4x1x8xf32>
    %35 = vector.shape_cast %34 : vector<1x1x4x1x8xf32> to vector<4x1x8xf32>
    %36 = vector.broadcast %35 : vector<4x1x8xf32> to vector<4x8x8xf32>
    %37 = arith.addf %33, %36 : vector<4x8x8xf32>
    %c0_23 = arith.constant 0 : index
    %c1_24 = arith.constant 1 : index
    %c0_25 = arith.constant 0 : index
    %c0_26 = arith.constant 0 : index
    %c0_27 = arith.constant 0 : index
    %38 = vector.load %arg5[%c0_23, %c1_24, %c0_25, %c0_26, %c0_27] : memref<2x3x4x32x8xbf16, #tpu.memory_space<vmem>>, vector<1x1x4x32x8xbf16>
    %39 = vector.shape_cast %38 : vector<1x1x4x32x8xbf16> to vector<4x32x8xbf16>
    "tpu.trace_start"() <{level = 10 : i32, message = "nsh,nhd->nsd"}> : () -> ()
    %cst_28 = arith.constant dense<0.000000e+00> : vector<4x8x8xf32>
    %40 = tpu.matmul %30, %39, %cst_28 {dimension_numbers = #tpu.dot_dimension_numbers<[2], [1], [1], [2], [0, 0, 0, 1, 1, 2], [0], [0]>} : vector<4x8x32xbf16>, vector<4x32x8xbf16>, vector<4x8x8xf32> -> vector<4x8x8xf32>
    "tpu.trace_stop"() : () -> ()
    %c0_29 = arith.constant 0 : index
    %c1_30 = arith.constant 1 : index
    %c0_31 = arith.constant 0 : index
    %c0_32 = arith.constant 0 : index
    %c0_33 = arith.constant 0 : index
    %41 = vector.load %arg3[%c0_29, %c1_30, %c0_31, %c0_32, %c0_33] : memref<2x3x4x1x8xf32, #tpu.memory_space<vmem>>, vector<1x1x4x1x8xf32>
    %42 = vector.shape_cast %41 : vector<1x1x4x1x8xf32> to vector<4x1x8xf32>
    %43 = vector.broadcast %42 : vector<4x1x8xf32> to vector<4x8x8xf32>
    %44 = arith.addf %40, %43 : vector<4x8x8xf32>
    %c0_34 = arith.constant 0 : index
    %c2 = arith.constant 2 : index
    %c0_35 = arith.constant 0 : index
    %c0_36 = arith.constant 0 : index
    %c0_37 = arith.constant 0 : index
    %45 = vector.load %arg5[%c0_34, %c2, %c0_35, %c0_36, %c0_37] : memref<2x3x4x32x8xbf16, #tpu.memory_space<vmem>>, vector<1x1x4x32x8xbf16>
    %46 = vector.shape_cast %45 : vector<1x1x4x32x8xbf16> to vector<4x32x8xbf16>
    "tpu.trace_start"() <{level = 10 : i32, message = "nsh,nhd->nsd"}> : () -> ()
    %cst_38 = arith.constant dense<0.000000e+00> : vector<4x8x8xf32>
    %47 = tpu.matmul %30, %46, %cst_38 {dimension_numbers = #tpu.dot_dimension_numbers<[2], [1], [1], [2], [0, 0, 0, 1, 1, 2], [0], [0]>} : vector<4x8x32xbf16>, vector<4x32x8xbf16>, vector<4x8x8xf32> -> vector<4x8x8xf32>
    "tpu.trace_stop"() : () -> ()
    %c0_39 = arith.constant 0 : index
    %c2_40 = arith.constant 2 : index
    %c0_41 = arith.constant 0 : index
    %c0_42 = arith.constant 0 : index
    %c0_43 = arith.constant 0 : index
    %48 = vector.load %arg3[%c0_39, %c2_40, %c0_41, %c0_42, %c0_43] : memref<2x3x4x1x8xf32, #tpu.memory_space<vmem>>, vector<1x1x4x1x8xf32>
    %49 = vector.shape_cast %48 : vector<1x1x4x1x8xf32> to vector<4x1x8xf32>
    %50 = vector.broadcast %49 : vector<4x1x8xf32> to vector<4x8x8xf32>
    %51 = arith.addf %47, %50 : vector<4x8x8xf32>
    %52 = arith.truncf %37 : vector<4x8x8xf32> to vector<4x8x8xbf16>
    %53 = arith.truncf %44 : vector<4x8x8xf32> to vector<4x8x8xbf16>
    "tpu.trace_start"() <{level = 10 : i32, message = "nsd,ntd->nst"}> : () -> ()
    %cst_44 = arith.constant dense<0.000000e+00> : vector<4x8x8xf32>
    %54 = tpu.matmul %52, %53, %cst_44 {dimension_numbers = #tpu.dot_dimension_numbers<[2], [2], [1], [1], [0, 0, 0, 1, 1, 1], [0], [0]>} : vector<4x8x8xbf16>, vector<4x8x8xbf16>, vector<4x8x8xf32> -> vector<4x8x8xf32>
    "tpu.trace_stop"() : () -> ()
    %cst_45 = arith.constant 0.353553385 : f32
    %55 = vector.broadcast %cst_45 : f32 to vector<4x8x8xf32>
    %56 = arith.mulf %54, %55 : vector<4x8x8xf32>
    %57 = vector.shape_cast %27 : vector<1x8xf32> to vector<1x1x8xf32>
    %58 = vector.broadcast %57 : vector<1x1x8xf32> to vector<4x8x8xf32>
    %59 = arith.addf %56, %58 : vector<4x8x8xf32>
    %cst_46 = arith.constant dense<0xFF800000> : vector<4x8xf32>
    %60 = vector.multi_reduction <maximumf>, %59, %cst_46 [2] : vector<4x8x8xf32> to vector<4x8xf32>
    %61 = vector.shape_cast %60 : vector<4x8xf32> to vector<4x8x1xf32>
    %62 = vector.broadcast %61 : vector<4x8x1xf32> to vector<4x8x8xf32>
    %63 = arith.subf %59, %62 : vector<4x8x8xf32>
    %64 = math.exp %63 : vector<4x8x8xf32>
    %cst_47 = arith.constant dense<0.000000e+00> : vector<4x8xf32>
    %65 = vector.multi_reduction <add>, %64, %cst_47 [2] : vector<4x8x8xf32> to vector<4x8xf32>
    %66 = vector.shape_cast %65 : vector<4x8xf32> to vector<4x8x1xf32>
    %67 = tpu.reciprocal %66 {approx = true} : vector<4x8x1xf32> -> vector<4x8x1xf32>
    %68 = vector.broadcast %67 : vector<4x8x1xf32> to vector<4x8x8xf32>
    %69 = arith.mulf %64, %68 : vector<4x8x8xf32>
    %70 = arith.truncf %69 : vector<4x8x8xf32> to vector<4x8x8xbf16>
    %71 = arith.truncf %51 : vector<4x8x8xf32> to vector<4x8x8xbf16>
    "tpu.trace_start"() <{level = 10 : i32, message = "nst,ntd->nsd"}> : () -> ()
    %cst_48 = arith.constant dense<0.000000e+00> : vector<4x8x8xf32>
    %72 = tpu.matmul %70, %71, %cst_48 {dimension_numbers = #tpu.dot_dimension_numbers<[2], [1], [1], [2], [0, 0, 0, 1, 1, 2], [0], [0]>} : vector<4x8x8xbf16>, vector<4x8x8xbf16>, vector<4x8x8xf32> -> vector<4x8x8xf32>
    "tpu.trace_stop"() : () -> ()
    %73 = arith.truncf %72 : vector<4x8x8xf32> to vector<4x8x8xbf16>
    %c0_49 = arith.constant 0 : index
    %c0_50 = arith.constant 0 : index
    %c0_51 = arith.constant 0 : index
    %c0_52 = arith.constant 0 : index
    %74 = vector.load %arg6[%c0_49, %c0_50, %c0_51, %c0_52] : memref<2x4x8x32xbf16, #tpu.memory_space<vmem>>, vector<1x4x8x32xbf16>
    %75 = vector.shape_cast %74 : vector<1x4x8x32xbf16> to vector<4x8x32xbf16>
    "tpu.trace_start"() <{level = 10 : i32, message = "nsd,ndh->nsh"}> : () -> ()
    %cst_53 = arith.constant dense<0.000000e+00> : vector<4x8x32xf32>
    %76 = tpu.matmul %73, %75, %cst_53 {dimension_numbers = #tpu.dot_dimension_numbers<[2], [1], [1], [2], [0, 0, 0, 1, 1, 2], [0], [0]>} : vector<4x8x8xbf16>, vector<4x8x32xbf16>, vector<4x8x32xf32> -> vector<4x8x32xf32>
    "tpu.trace_stop"() : () -> ()
    %cst_54 = arith.constant dense<0.000000e+00> : vector<8x32xf32>
    %77 = vector.multi_reduction <add>, %76, %cst_54 [0] : vector<4x8x32xf32> to vector<8x32xf32>
    %c2_55 = arith.constant 2 : index
    %c0_56 = arith.constant 0 : index
    %78 = vector.load %arg2[%c2_55, %c0_56] : memref<14x32xf32, #tpu.memory_space<vmem>>, vector<1x32xf32>
    %79 = vector.broadcast %78 : vector<1x32xf32> to vector<8x32xf32>
    %80 = arith.addf %77, %79 : vector<8x32xf32>
    %81 = arith.addf %80, %25 : vector<8x32xf32>
    %c3 = arith.constant 3 : index
    %c0_57 = arith.constant 0 : index
    %82 = vector.load %arg2[%c3, %c0_57] : memref<14x32xf32, #tpu.memory_space<vmem>>, vector<1x32xf32>
    %c4 = arith.constant 4 : index
    %c0_58 = arith.constant 0 : index
    %83 = vector.load %arg2[%c4, %c0_58] : memref<14x32xf32, #tpu.memory_space<vmem>>, vector<1x32xf32>
    %cst_59 = arith.constant dense<0.000000e+00> : vector<8xf32>
    %84 = vector.multi_reduction <add>, %81, %cst_59 [1] : vector<8x32xf32> to vector<8xf32>
    %85 = vector.shape_cast %84 : vector<8xf32> to vector<8x1xf32>
    %cst_60 = arith.constant 3.200000e+01 : f32
    %86 = vector.broadcast %cst_60 : f32 to vector<8x1xf32>
    %87 = arith.divf %85, %86 : vector<8x1xf32>
    %88 = vector.broadcast %87 : vector<8x1xf32> to vector<8x32xf32>
    %89 = arith.subf %81, %88 : vector<8x32xf32>
    %90 = arith.mulf %89, %89 : vector<8x32xf32>
    %cst_61 = arith.constant dense<0.000000e+00> : vector<8xf32>
    %91 = vector.multi_reduction <add>, %90, %cst_61 [1] : vector<8x32xf32> to vector<8xf32>
    %92 = vector.shape_cast %91 : vector<8xf32> to vector<8x1xf32>
    %cst_62 = arith.constant 3.200000e+01 : f32
    %93 = vector.broadcast %cst_62 : f32 to vector<8x1xf32>
    %94 = arith.divf %92, %93 : vector<8x1xf32>
    %95 = vector.broadcast %87 : vector<8x1xf32> to vector<8x32xf32>
    %96 = arith.subf %81, %95 : vector<8x32xf32>
    %cst_63 = arith.constant 9.99999996E-13 : f32
    %97 = vector.broadcast %cst_63 : f32 to vector<8x1xf32>
    %98 = arith.addf %94, %97 : vector<8x1xf32>
    %99 = math.rsqrt %98 : vector<8x1xf32>
    %100 = vector.broadcast %99 : vector<8x1xf32> to vector<8x32xf32>
    %101 = arith.mulf %96, %100 : vector<8x32xf32>
    %102 = vector.broadcast %82 : vector<1x32xf32> to vector<8x32xf32>
    %103 = arith.mulf %101, %102 : vector<8x32xf32>
    %104 = vector.broadcast %83 : vector<1x32xf32> to vector<8x32xf32>
    %105 = arith.addf %103, %104 : vector<8x32xf32>
    %106 = arith.truncf %105 : vector<8x32xf32> to vector<8x32xbf16>
    %c0_64 = arith.constant 0 : index
    %c0_65 = arith.constant 0 : index
    %c0_66 = arith.constant 0 : index
    %107 = vector.load %arg7[%c0_64, %c0_65, %c0_66] : memref<2x32x64xbf16, #tpu.memory_space<vmem>>, vector<1x32x64xbf16>
    %108 = vector.shape_cast %107 : vector<1x32x64xbf16> to vector<32x64xbf16>
    %cst_67 = arith.constant dense<0.000000e+00> : vector<8x64xf32>
    %109 = tpu.matmul %106, %108, %cst_67 {dimension_numbers = #tpu.dot_dimension_numbers<[1], [0], [0], [1], [0, 0, 1, 1], [], []>} : vector<8x32xbf16>, vector<32x64xbf16>, vector<8x64xf32> -> vector<8x64xf32>
    %c0_68 = arith.constant 0 : index
    %c0_69 = arith.constant 0 : index
    %c0_70 = arith.constant 0 : index
    %110 = vector.load %arg4[%c0_68, %c0_69, %c0_70] : memref<2x1x64xf32, #tpu.memory_space<vmem>>, vector<1x1x64xf32>
    %111 = vector.shape_cast %110 : vector<1x1x64xf32> to vector<1x64xf32>
    %112 = vector.broadcast %111 : vector<1x64xf32> to vector<8x64xf32>
    %113 = arith.addf %109, %112 : vector<8x64xf32>
    %cst_71 = arith.constant 5.000000e-01 : f32
    %114 = vector.broadcast %cst_71 : f32 to vector<8x64xf32>
    %115 = arith.mulf %114, %113 : vector<8x64xf32>
    %cst_72 = arith.constant 4.471500e-02 : f32
    %116 = vector.broadcast %cst_72 : f32 to vector<8x64xf32>
    %117 = arith.mulf %116, %113 : vector<8x64xf32>
    %118 = arith.mulf %117, %113 : vector<8x64xf32>
    %119 = arith.mulf %118, %113 : vector<8x64xf32>
    %120 = arith.addf %113, %119 : vector<8x64xf32>
    %cst_73 = arith.constant 0.797884583 : f32
    %121 = vector.broadcast %cst_73 : f32 to vector<8x64xf32>
    %122 = arith.mulf %121, %120 : vector<8x64xf32>
    %123 = math.tanh %122 : vector<8x64xf32>
    %cst_74 = arith.constant 1.000000e+00 : f32
    %124 = vector.broadcast %cst_74 : f32 to vector<8x64xf32>
    %125 = arith.addf %124, %123 : vector<8x64xf32>
    %126 = arith.mulf %115, %125 : vector<8x64xf32>
    %127 = arith.truncf %126 : vector<8x64xf32> to vector<8x64xbf16>
    %c0_75 = arith.constant 0 : index
    %c0_76 = arith.constant 0 : index
    %c0_77 = arith.constant 0 : index
    %128 = vector.load %arg8[%c0_75, %c0_76, %c0_77] : memref<2x64x32xbf16, #tpu.memory_space<vmem>>, vector<1x64x32xbf16>
    %129 = vector.shape_cast %128 : vector<1x64x32xbf16> to vector<64x32xbf16>
    %cst_78 = arith.constant dense<0.000000e+00> : vector<8x32xf32>
    %130 = tpu.matmul %127, %129, %cst_78 {dimension_numbers = #tpu.dot_dimension_numbers<[1], [0], [0], [1], [0, 0, 1, 1], [], []>} : vector<8x64xbf16>, vector<64x32xbf16>, vector<8x32xf32> -> vector<8x32xf32>
    %c5 = arith.constant 5 : index
    %c0_79 = arith.constant 0 : index
    %131 = vector.load %arg2[%c5, %c0_79] : memref<14x32xf32, #tpu.memory_space<vmem>>, vector<1x32xf32>
    %132 = vector.broadcast %131 : vector<1x32xf32> to vector<8x32xf32>
    %133 = arith.addf %130, %132 : vector<8x32xf32>
    %134 = arith.addf %133, %105 : vector<8x32xf32>
    %c6 = arith.constant 6 : index
    %c0_80 = arith.constant 0 : index
    %135 = vector.load %arg2[%c6, %c0_80] : memref<14x32xf32, #tpu.memory_space<vmem>>, vector<1x32xf32>
    %c7 = arith.constant 7 : index
    %c0_81 = arith.constant 0 : index
    %136 = vector.load %arg2[%c7, %c0_81] : memref<14x32xf32, #tpu.memory_space<vmem>>, vector<1x32xf32>
    %cst_82 = arith.constant dense<0.000000e+00> : vector<8xf32>
    %137 = vector.multi_reduction <add>, %134, %cst_82 [1] : vector<8x32xf32> to vector<8xf32>
    %138 = vector.shape_cast %137 : vector<8xf32> to vector<8x1xf32>
    %cst_83 = arith.constant 3.200000e+01 : f32
    %139 = vector.broadcast %cst_83 : f32 to vector<8x1xf32>
    %140 = arith.divf %138, %139 : vector<8x1xf32>
    %141 = vector.broadcast %140 : vector<8x1xf32> to vector<8x32xf32>
    %142 = arith.subf %134, %141 : vector<8x32xf32>
    %143 = arith.mulf %142, %142 : vector<8x32xf32>
    %cst_84 = arith.constant dense<0.000000e+00> : vector<8xf32>
    %144 = vector.multi_reduction <add>, %143, %cst_84 [1] : vector<8x32xf32> to vector<8xf32>
    %145 = vector.shape_cast %144 : vector<8xf32> to vector<8x1xf32>
    %cst_85 = arith.constant 3.200000e+01 : f32
    %146 = vector.broadcast %cst_85 : f32 to vector<8x1xf32>
    %147 = arith.divf %145, %146 : vector<8x1xf32>
    %148 = vector.broadcast %140 : vector<8x1xf32> to vector<8x32xf32>
    %149 = arith.subf %134, %148 : vector<8x32xf32>
    %cst_86 = arith.constant 9.99999996E-13 : f32
    %150 = vector.broadcast %cst_86 : f32 to vector<8x1xf32>
    %151 = arith.addf %147, %150 : vector<8x1xf32>
    %152 = math.rsqrt %151 : vector<8x1xf32>
    %153 = vector.broadcast %152 : vector<8x1xf32> to vector<8x32xf32>
    %154 = arith.mulf %149, %153 : vector<8x32xf32>
    %155 = vector.broadcast %135 : vector<1x32xf32> to vector<8x32xf32>
    %156 = arith.mulf %154, %155 : vector<8x32xf32>
    %157 = vector.broadcast %136 : vector<1x32xf32> to vector<8x32xf32>
    %158 = arith.addf %156, %157 : vector<8x32xf32>
    %159 = arith.truncf %158 : vector<8x32xf32> to vector<8x32xbf16>
    %160 = vector.shape_cast %159 : vector<8x32xbf16> to vector<1x8x32xbf16>
    %161 = vector.broadcast %160 : vector<1x8x32xbf16> to vector<4x8x32xbf16>
    %c1_87 = arith.constant 1 : index
    %c0_88 = arith.constant 0 : index
    %c0_89 = arith.constant 0 : index
    %c0_90 = arith.constant 0 : index
    %c0_91 = arith.constant 0 : index
    %162 = vector.load %arg5[%c1_87, %c0_88, %c0_89, %c0_90, %c0_91] : memref<2x3x4x32x8xbf16, #tpu.memory_space<vmem>>, vector<1x1x4x32x8xbf16>
    %163 = vector.shape_cast %162 : vector<1x1x4x32x8xbf16> to vector<4x32x8xbf16>
    "tpu.trace_start"() <{level = 10 : i32, message = "nsh,nhd->nsd"}> : () -> ()
    %cst_92 = arith.constant dense<0.000000e+00> : vector<4x8x8xf32>
    %164 = tpu.matmul %161, %163, %cst_92 {dimension_numbers = #tpu.dot_dimension_numbers<[2], [1], [1], [2], [0, 0, 0, 1, 1, 2], [0], [0]>} : vector<4x8x32xbf16>, vector<4x32x8xbf16>, vector<4x8x8xf32> -> vector<4x8x8xf32>
    "tpu.trace_stop"() : () -> ()
    %c1_93 = arith.constant 1 : index
    %c0_94 = arith.constant 0 : index
    %c0_95 = arith.constant 0 : index
    %c0_96 = arith.constant 0 : index
    %c0_97 = arith.constant 0 : index
    %165 = vector.load %arg3[%c1_93, %c0_94, %c0_95, %c0_96, %c0_97] : memref<2x3x4x1x8xf32, #tpu.memory_space<vmem>>, vector<1x1x4x1x8xf32>
    %166 = vector.shape_cast %165 : vector<1x1x4x1x8xf32> to vector<4x1x8xf32>
    %167 = vector.broadcast %166 : vector<4x1x8xf32> to vector<4x8x8xf32>
    %168 = arith.addf %164, %167 : vector<4x8x8xf32>
    %c1_98 = arith.constant 1 : index
    %c1_99 = arith.constant 1 : index
    %c0_100 = arith.constant 0 : index
    %c0_101 = arith.constant 0 : index
    %c0_102 = arith.constant 0 : index
    %169 = vector.load %arg5[%c1_98, %c1_99, %c0_100, %c0_101, %c0_102] : memref<2x3x4x32x8xbf16, #tpu.memory_space<vmem>>, vector<1x1x4x32x8xbf16>
    %170 = vector.shape_cast %169 : vector<1x1x4x32x8xbf16> to vector<4x32x8xbf16>
    "tpu.trace_start"() <{level = 10 : i32, message = "nsh,nhd->nsd"}> : () -> ()
    %cst_103 = arith.constant dense<0.000000e+00> : vector<4x8x8xf32>
    %171 = tpu.matmul %161, %170, %cst_103 {dimension_numbers = #tpu.dot_dimension_numbers<[2], [1], [1], [2], [0, 0, 0, 1, 1, 2], [0], [0]>} : vector<4x8x32xbf16>, vector<4x32x8xbf16>, vector<4x8x8xf32> -> vector<4x8x8xf32>
    "tpu.trace_stop"() : () -> ()
    %c1_104 = arith.constant 1 : index
    %c1_105 = arith.constant 1 : index
    %c0_106 = arith.constant 0 : index
    %c0_107 = arith.constant 0 : index
    %c0_108 = arith.constant 0 : index
    %172 = vector.load %arg3[%c1_104, %c1_105, %c0_106, %c0_107, %c0_108] : memref<2x3x4x1x8xf32, #tpu.memory_space<vmem>>, vector<1x1x4x1x8xf32>
    %173 = vector.shape_cast %172 : vector<1x1x4x1x8xf32> to vector<4x1x8xf32>
    %174 = vector.broadcast %173 : vector<4x1x8xf32> to vector<4x8x8xf32>
    %175 = arith.addf %171, %174 : vector<4x8x8xf32>
    %c1_109 = arith.constant 1 : index
    %c2_110 = arith.constant 2 : index
    %c0_111 = arith.constant 0 : index
    %c0_112 = arith.constant 0 : index
    %c0_113 = arith.constant 0 : index
    %176 = vector.load %arg5[%c1_109, %c2_110, %c0_111, %c0_112, %c0_113] : memref<2x3x4x32x8xbf16, #tpu.memory_space<vmem>>, vector<1x1x4x32x8xbf16>
    %177 = vector.shape_cast %176 : vector<1x1x4x32x8xbf16> to vector<4x32x8xbf16>
    "tpu.trace_start"() <{level = 10 : i32, message = "nsh,nhd->nsd"}> : () -> ()
    %cst_114 = arith.constant dense<0.000000e+00> : vector<4x8x8xf32>
    %178 = tpu.matmul %161, %177, %cst_114 {dimension_numbers = #tpu.dot_dimension_numbers<[2], [1], [1], [2], [0, 0, 0, 1, 1, 2], [0], [0]>} : vector<4x8x32xbf16>, vector<4x32x8xbf16>, vector<4x8x8xf32> -> vector<4x8x8xf32>
    "tpu.trace_stop"() : () -> ()
    %c1_115 = arith.constant 1 : index
    %c2_116 = arith.constant 2 : index
    %c0_117 = arith.constant 0 : index
    %c0_118 = arith.constant 0 : index
    %c0_119 = arith.constant 0 : index
    %179 = vector.load %arg3[%c1_115, %c2_116, %c0_117, %c0_118, %c0_119] : memref<2x3x4x1x8xf32, #tpu.memory_space<vmem>>, vector<1x1x4x1x8xf32>
    %180 = vector.shape_cast %179 : vector<1x1x4x1x8xf32> to vector<4x1x8xf32>
    %181 = vector.broadcast %180 : vector<4x1x8xf32> to vector<4x8x8xf32>
    %182 = arith.addf %178, %181 : vector<4x8x8xf32>
    %183 = arith.truncf %168 : vector<4x8x8xf32> to vector<4x8x8xbf16>
    %184 = arith.truncf %175 : vector<4x8x8xf32> to vector<4x8x8xbf16>
    "tpu.trace_start"() <{level = 10 : i32, message = "nsd,ntd->nst"}> : () -> ()
    %cst_120 = arith.constant dense<0.000000e+00> : vector<4x8x8xf32>
    %185 = tpu.matmul %183, %184, %cst_120 {dimension_numbers = #tpu.dot_dimension_numbers<[2], [2], [1], [1], [0, 0, 0, 1, 1, 1], [0], [0]>} : vector<4x8x8xbf16>, vector<4x8x8xbf16>, vector<4x8x8xf32> -> vector<4x8x8xf32>
    "tpu.trace_stop"() : () -> ()
    %cst_121 = arith.constant 0.353553385 : f32
    %186 = vector.broadcast %cst_121 : f32 to vector<4x8x8xf32>
    %187 = arith.mulf %185, %186 : vector<4x8x8xf32>
    %188 = vector.shape_cast %27 : vector<1x8xf32> to vector<1x1x8xf32>
    %189 = vector.broadcast %188 : vector<1x1x8xf32> to vector<4x8x8xf32>
    %190 = arith.addf %187, %189 : vector<4x8x8xf32>
    %cst_122 = arith.constant dense<0xFF800000> : vector<4x8xf32>
    %191 = vector.multi_reduction <maximumf>, %190, %cst_122 [2] : vector<4x8x8xf32> to vector<4x8xf32>
    %192 = vector.shape_cast %191 : vector<4x8xf32> to vector<4x8x1xf32>
    %193 = vector.broadcast %192 : vector<4x8x1xf32> to vector<4x8x8xf32>
    %194 = arith.subf %190, %193 : vector<4x8x8xf32>
    %195 = math.exp %194 : vector<4x8x8xf32>
    %cst_123 = arith.constant dense<0.000000e+00> : vector<4x8xf32>
    %196 = vector.multi_reduction <add>, %195, %cst_123 [2] : vector<4x8x8xf32> to vector<4x8xf32>
    %197 = vector.shape_cast %196 : vector<4x8xf32> to vector<4x8x1xf32>
    %198 = tpu.reciprocal %197 {approx = true} : vector<4x8x1xf32> -> vector<4x8x1xf32>
    %199 = vector.broadcast %198 : vector<4x8x1xf32> to vector<4x8x8xf32>
    %200 = arith.mulf %195, %199 : vector<4x8x8xf32>
    %201 = arith.truncf %200 : vector<4x8x8xf32> to vector<4x8x8xbf16>
    %202 = arith.truncf %182 : vector<4x8x8xf32> to vector<4x8x8xbf16>
    "tpu.trace_start"() <{level = 10 : i32, message = "nst,ntd->nsd"}> : () -> ()
    %cst_124 = arith.constant dense<0.000000e+00> : vector<4x8x8xf32>
    %203 = tpu.matmul %201, %202, %cst_124 {dimension_numbers = #tpu.dot_dimension_numbers<[2], [1], [1], [2], [0, 0, 0, 1, 1, 2], [0], [0]>} : vector<4x8x8xbf16>, vector<4x8x8xbf16>, vector<4x8x8xf32> -> vector<4x8x8xf32>
    "tpu.trace_stop"() : () -> ()
    %204 = arith.truncf %203 : vector<4x8x8xf32> to vector<4x8x8xbf16>
    %c1_125 = arith.constant 1 : index
    %c0_126 = arith.constant 0 : index
    %c0_127 = arith.constant 0 : index
    %c0_128 = arith.constant 0 : index
    %205 = vector.load %arg6[%c1_125, %c0_126, %c0_127, %c0_128] : memref<2x4x8x32xbf16, #tpu.memory_space<vmem>>, vector<1x4x8x32xbf16>
    %206 = vector.shape_cast %205 : vector<1x4x8x32xbf16> to vector<4x8x32xbf16>
    "tpu.trace_start"() <{level = 10 : i32, message = "nsd,ndh->nsh"}> : () -> ()
    %cst_129 = arith.constant dense<0.000000e+00> : vector<4x8x32xf32>
    %207 = tpu.matmul %204, %206, %cst_129 {dimension_numbers = #tpu.dot_dimension_numbers<[2], [1], [1], [2], [0, 0, 0, 1, 1, 2], [0], [0]>} : vector<4x8x8xbf16>, vector<4x8x32xbf16>, vector<4x8x32xf32> -> vector<4x8x32xf32>
    "tpu.trace_stop"() : () -> ()
    %cst_130 = arith.constant dense<0.000000e+00> : vector<8x32xf32>
    %208 = vector.multi_reduction <add>, %207, %cst_130 [0] : vector<4x8x32xf32> to vector<8x32xf32>
    %c8 = arith.constant 8 : index
    %c0_131 = arith.constant 0 : index
    %209 = vector.load %arg2[%c8, %c0_131] : memref<14x32xf32, #tpu.memory_space<vmem>>, vector<1x32xf32>
    %210 = vector.broadcast %209 : vector<1x32xf32> to vector<8x32xf32>
    %211 = arith.addf %208, %210 : vector<8x32xf32>
    %212 = arith.addf %211, %158 : vector<8x32xf32>
    %c9 = arith.constant 9 : index
    %c0_132 = arith.constant 0 : index
    %213 = vector.load %arg2[%c9, %c0_132] : memref<14x32xf32, #tpu.memory_space<vmem>>, vector<1x32xf32>
    %c10 = arith.constant 10 : index
    %c0_133 = arith.constant 0 : index
    %214 = vector.load %arg2[%c10, %c0_133] : memref<14x32xf32, #tpu.memory_space<vmem>>, vector<1x32xf32>
    %cst_134 = arith.constant dense<0.000000e+00> : vector<8xf32>
    %215 = vector.multi_reduction <add>, %212, %cst_134 [1] : vector<8x32xf32> to vector<8xf32>
    %216 = vector.shape_cast %215 : vector<8xf32> to vector<8x1xf32>
    %cst_135 = arith.constant 3.200000e+01 : f32
    %217 = vector.broadcast %cst_135 : f32 to vector<8x1xf32>
    %218 = arith.divf %216, %217 : vector<8x1xf32>
    %219 = vector.broadcast %218 : vector<8x1xf32> to vector<8x32xf32>
    %220 = arith.subf %212, %219 : vector<8x32xf32>
    %221 = arith.mulf %220, %220 : vector<8x32xf32>
    %cst_136 = arith.constant dense<0.000000e+00> : vector<8xf32>
    %222 = vector.multi_reduction <add>, %221, %cst_136 [1] : vector<8x32xf32> to vector<8xf32>
    %223 = vector.shape_cast %222 : vector<8xf32> to vector<8x1xf32>
    %cst_137 = arith.constant 3.200000e+01 : f32
    %224 = vector.broadcast %cst_137 : f32 to vector<8x1xf32>
    %225 = arith.divf %223, %224 : vector<8x1xf32>
    %226 = vector.broadcast %218 : vector<8x1xf32> to vector<8x32xf32>
    %227 = arith.subf %212, %226 : vector<8x32xf32>
    %cst_138 = arith.constant 9.99999996E-13 : f32
    %228 = vector.broadcast %cst_138 : f32 to vector<8x1xf32>
    %229 = arith.addf %225, %228 : vector<8x1xf32>
    %230 = math.rsqrt %229 : vector<8x1xf32>
    %231 = vector.broadcast %230 : vector<8x1xf32> to vector<8x32xf32>
    %232 = arith.mulf %227, %231 : vector<8x32xf32>
    %233 = vector.broadcast %213 : vector<1x32xf32> to vector<8x32xf32>
    %234 = arith.mulf %232, %233 : vector<8x32xf32>
    %235 = vector.broadcast %214 : vector<1x32xf32> to vector<8x32xf32>
    %236 = arith.addf %234, %235 : vector<8x32xf32>
    %237 = arith.truncf %236 : vector<8x32xf32> to vector<8x32xbf16>
    %c1_139 = arith.constant 1 : index
    %c0_140 = arith.constant 0 : index
    %c0_141 = arith.constant 0 : index
    %238 = vector.load %arg7[%c1_139, %c0_140, %c0_141] : memref<2x32x64xbf16, #tpu.memory_space<vmem>>, vector<1x32x64xbf16>
    %239 = vector.shape_cast %238 : vector<1x32x64xbf16> to vector<32x64xbf16>
    %cst_142 = arith.constant dense<0.000000e+00> : vector<8x64xf32>
    %240 = tpu.matmul %237, %239, %cst_142 {dimension_numbers = #tpu.dot_dimension_numbers<[1], [0], [0], [1], [0, 0, 1, 1], [], []>} : vector<8x32xbf16>, vector<32x64xbf16>, vector<8x64xf32> -> vector<8x64xf32>
    %c1_143 = arith.constant 1 : index
    %c0_144 = arith.constant 0 : index
    %c0_145 = arith.constant 0 : index
    %241 = vector.load %arg4[%c1_143, %c0_144, %c0_145] : memref<2x1x64xf32, #tpu.memory_space<vmem>>, vector<1x1x64xf32>
    %242 = vector.shape_cast %241 : vector<1x1x64xf32> to vector<1x64xf32>
    %243 = vector.broadcast %242 : vector<1x64xf32> to vector<8x64xf32>
    %244 = arith.addf %240, %243 : vector<8x64xf32>
    %cst_146 = arith.constant 5.000000e-01 : f32
    %245 = vector.broadcast %cst_146 : f32 to vector<8x64xf32>
    %246 = arith.mulf %245, %244 : vector<8x64xf32>
    %cst_147 = arith.constant 4.471500e-02 : f32
    %247 = vector.broadcast %cst_147 : f32 to vector<8x64xf32>
    %248 = arith.mulf %247, %244 : vector<8x64xf32>
    %249 = arith.mulf %248, %244 : vector<8x64xf32>
    %250 = arith.mulf %249, %244 : vector<8x64xf32>
    %251 = arith.addf %244, %250 : vector<8x64xf32>
    %cst_148 = arith.constant 0.797884583 : f32
    %252 = vector.broadcast %cst_148 : f32 to vector<8x64xf32>
    %253 = arith.mulf %252, %251 : vector<8x64xf32>
    %254 = math.tanh %253 : vector<8x64xf32>
    %cst_149 = arith.constant 1.000000e+00 : f32
    %255 = vector.broadcast %cst_149 : f32 to vector<8x64xf32>
    %256 = arith.addf %255, %254 : vector<8x64xf32>
    %257 = arith.mulf %246, %256 : vector<8x64xf32>
    %258 = arith.truncf %257 : vector<8x64xf32> to vector<8x64xbf16>
    %c1_150 = arith.constant 1 : index
    %c0_151 = arith.constant 0 : index
    %c0_152 = arith.constant 0 : index
    %259 = vector.load %arg8[%c1_150, %c0_151, %c0_152] : memref<2x64x32xbf16, #tpu.memory_space<vmem>>, vector<1x64x32xbf16>
    %260 = vector.shape_cast %259 : vector<1x64x32xbf16> to vector<64x32xbf16>
    %cst_153 = arith.constant dense<0.000000e+00> : vector<8x32xf32>
    %261 = tpu.matmul %258, %260, %cst_153 {dimension_numbers = #tpu.dot_dimension_numbers<[1], [0], [0], [1], [0, 0, 1, 1], [], []>} : vector<8x64xbf16>, vector<64x32xbf16>, vector<8x32xf32> -> vector<8x32xf32>
    %c11 = arith.constant 11 : index
    %c0_154 = arith.constant 0 : index
    %262 = vector.load %arg2[%c11, %c0_154] : memref<14x32xf32, #tpu.memory_space<vmem>>, vector<1x32xf32>
    %263 = vector.broadcast %262 : vector<1x32xf32> to vector<8x32xf32>
    %264 = arith.addf %261, %263 : vector<8x32xf32>
    %265 = arith.addf %264, %236 : vector<8x32xf32>
    %c12 = arith.constant 12 : index
    %c0_155 = arith.constant 0 : index
    %266 = vector.load %arg2[%c12, %c0_155] : memref<14x32xf32, #tpu.memory_space<vmem>>, vector<1x32xf32>
    %c13 = arith.constant 13 : index
    %c0_156 = arith.constant 0 : index
    %267 = vector.load %arg2[%c13, %c0_156] : memref<14x32xf32, #tpu.memory_space<vmem>>, vector<1x32xf32>
    %cst_157 = arith.constant dense<0.000000e+00> : vector<8xf32>
    %268 = vector.multi_reduction <add>, %265, %cst_157 [1] : vector<8x32xf32> to vector<8xf32>
    %269 = vector.shape_cast %268 : vector<8xf32> to vector<8x1xf32>
    %cst_158 = arith.constant 3.200000e+01 : f32
    %270 = vector.broadcast %cst_158 : f32 to vector<8x1xf32>
    %271 = arith.divf %269, %270 : vector<8x1xf32>
    %272 = vector.broadcast %271 : vector<8x1xf32> to vector<8x32xf32>
    %273 = arith.subf %265, %272 : vector<8x32xf32>
    %274 = arith.mulf %273, %273 : vector<8x32xf32>
    %cst_159 = arith.constant dense<0.000000e+00> : vector<8xf32>
    %275 = vector.multi_reduction <add>, %274, %cst_159 [1] : vector<8x32xf32> to vector<8xf32>
    %276 = vector.shape_cast %275 : vector<8xf32> to vector<8x1xf32>
    %cst_160 = arith.constant 3.200000e+01 : f32
    %277 = vector.broadcast %cst_160 : f32 to vector<8x1xf32>
    %278 = arith.divf %276, %277 : vector<8x1xf32>
    %279 = vector.broadcast %271 : vector<8x1xf32> to vector<8x32xf32>
    %280 = arith.subf %265, %279 : vector<8x32xf32>
    %cst_161 = arith.constant 9.99999996E-13 : f32
    %281 = vector.broadcast %cst_161 : f32 to vector<8x1xf32>
    %282 = arith.addf %278, %281 : vector<8x1xf32>
    %283 = math.rsqrt %282 : vector<8x1xf32>
    %284 = vector.broadcast %283 : vector<8x1xf32> to vector<8x32xf32>
    %285 = arith.mulf %280, %284 : vector<8x32xf32>
    %286 = vector.broadcast %266 : vector<1x32xf32> to vector<8x32xf32>
    %287 = arith.mulf %285, %286 : vector<8x32xf32>
    %288 = vector.broadcast %267 : vector<1x32xf32> to vector<8x32xf32>
    %289 = arith.addf %287, %288 : vector<8x32xf32>
    %290 = vector.extract_strided_slice %289 {offsets = [0, 0], sizes = [1, 32], strides = [1, 1]} : vector<8x32xf32> to vector<1x32xf32>
    %c1_162 = arith.constant 1 : index
    %c0_163 = arith.constant 0 : index
    %c0_164 = arith.constant 0 : index
    %291 = vector.load %arg0[%c1_162, %c0_163, %c0_164] : memref<2x8x32xf32, #tpu.memory_space<vmem>>, vector<1x8x32xf32>
    %292 = vector.shape_cast %291 : vector<1x8x32xf32> to vector<8x32xf32>
    %c0_165 = arith.constant 0 : index
    %c0_166 = arith.constant 0 : index
    %293 = vector.load %arg2[%c0_165, %c0_166] : memref<14x32xf32, #tpu.memory_space<vmem>>, vector<1x32xf32>
    %c1_167 = arith.constant 1 : index
    %c0_168 = arith.constant 0 : index
    %294 = vector.load %arg2[%c1_167, %c0_168] : memref<14x32xf32, #tpu.memory_space<vmem>>, vector<1x32xf32>
    %cst_169 = arith.constant dense<0.000000e+00> : vector<8xf32>
    %295 = vector.multi_reduction <add>, %292, %cst_169 [1] : vector<8x32xf32> to vector<8xf32>
    %296 = vector.shape_cast %295 : vector<8xf32> to vector<8x1xf32>
    %cst_170 = arith.constant 3.200000e+01 : f32
    %297 = vector.broadcast %cst_170 : f32 to vector<8x1xf32>
    %298 = arith.divf %296, %297 : vector<8x1xf32>
    %299 = vector.broadcast %298 : vector<8x1xf32> to vector<8x32xf32>
    %300 = arith.subf %292, %299 : vector<8x32xf32>
    %301 = arith.mulf %300, %300 : vector<8x32xf32>
    %cst_171 = arith.constant dense<0.000000e+00> : vector<8xf32>
    %302 = vector.multi_reduction <add>, %301, %cst_171 [1] : vector<8x32xf32> to vector<8xf32>
    %303 = vector.shape_cast %302 : vector<8xf32> to vector<8x1xf32>
    %cst_172 = arith.constant 3.200000e+01 : f32
    %304 = vector.broadcast %cst_172 : f32 to vector<8x1xf32>
    %305 = arith.divf %303, %304 : vector<8x1xf32>
    %306 = vector.broadcast %298 : vector<8x1xf32> to vector<8x32xf32>
    %307 = arith.subf %292, %306 : vector<8x32xf32>
    %cst_173 = arith.constant 9.99999996E-13 : f32
    %308 = vector.broadcast %cst_173 : f32 to vector<8x1xf32>
    %309 = arith.addf %305, %308 : vector<8x1xf32>
    %310 = math.rsqrt %309 : vector<8x1xf32>
    %311 = vector.broadcast %310 : vector<8x1xf32> to vector<8x32xf32>
    %312 = arith.mulf %307, %311 : vector<8x32xf32>
    %313 = vector.broadcast %293 : vector<1x32xf32> to vector<8x32xf32>
    %314 = arith.mulf %312, %313 : vector<8x32xf32>
    %315 = vector.broadcast %294 : vector<1x32xf32> to vector<8x32xf32>
    %316 = arith.addf %314, %315 : vector<8x32xf32>
    %c1_174 = arith.constant 1 : index
    %c0_175 = arith.constant 0 : index
    %c0_176 = arith.constant 0 : index
    %317 = vector.load %arg1[%c1_174, %c0_175, %c0_176] : memref<2x1x8xf32, #tpu.memory_space<vmem>>, vector<1x1x8xf32>
    %318 = vector.shape_cast %317 : vector<1x1x8xf32> to vector<1x8xf32>
    %319 = arith.truncf %316 : vector<8x32xf32> to vector<8x32xbf16>
    %320 = vector.shape_cast %319 : vector<8x32xbf16> to vector<1x8x32xbf16>
    %321 = vector.broadcast %320 : vector<1x8x32xbf16> to vector<4x8x32xbf16>
    %c0_177 = arith.constant 0 : index
    %c0_178 = arith.constant 0 : index
    %c0_179 = arith.constant 0 : index
    %c0_180 = arith.constant 0 : index
    %c0_181 = arith.constant 0 : index
    %322 = vector.load %arg5[%c0_177, %c0_178, %c0_179, %c0_180, %c0_181] : memref<2x3x4x32x8xbf16, #tpu.memory_space<vmem>>, vector<1x1x4x32x8xbf16>
    %323 = vector.shape_cast %322 : vector<1x1x4x32x8xbf16> to vector<4x32x8xbf16>
    "tpu.trace_start"() <{level = 10 : i32, message = "nsh,nhd->nsd"}> : () -> ()
    %cst_182 = arith.constant dense<0.000000e+00> : vector<4x8x8xf32>
    %324 = tpu.matmul %321, %323, %cst_182 {dimension_numbers = #tpu.dot_dimension_numbers<[2], [1], [1], [2], [0, 0, 0, 1, 1, 2], [0], [0]>} : vector<4x8x32xbf16>, vector<4x32x8xbf16>, vector<4x8x8xf32> -> vector<4x8x8xf32>
    "tpu.trace_stop"() : () -> ()
    %c0_183 = arith.constant 0 : index
    %c0_184 = arith.constant 0 : index
    %c0_185 = arith.constant 0 : index
    %c0_186 = arith.constant 0 : index
    %c0_187 = arith.constant 0 : index
    %325 = vector.load %arg3[%c0_183, %c0_184, %c0_185, %c0_186, %c0_187] : memref<2x3x4x1x8xf32, #tpu.memory_space<vmem>>, vector<1x1x4x1x8xf32>
    %326 = vector.shape_cast %325 : vector<1x1x4x1x8xf32> to vector<4x1x8xf32>
    %327 = vector.broadcast %326 : vector<4x1x8xf32> to vector<4x8x8xf32>
    %328 = arith.addf %324, %327 : vector<4x8x8xf32>
    %c0_188 = arith.constant 0 : index
    %c1_189 = arith.constant 1 : index
    %c0_190 = arith.constant 0 : index
    %c0_191 = arith.constant 0 : index
    %c0_192 = arith.constant 0 : index
    %329 = vector.load %arg5[%c0_188, %c1_189, %c0_190, %c0_191, %c0_192] : memref<2x3x4x32x8xbf16, #tpu.memory_space<vmem>>, vector<1x1x4x32x8xbf16>
    %330 = vector.shape_cast %329 : vector<1x1x4x32x8xbf16> to vector<4x32x8xbf16>
    "tpu.trace_start"() <{level = 10 : i32, message = "nsh,nhd->nsd"}> : () -> ()
    %cst_193 = arith.constant dense<0.000000e+00> : vector<4x8x8xf32>
    %331 = tpu.matmul %321, %330, %cst_193 {dimension_numbers = #tpu.dot_dimension_numbers<[2], [1], [1], [2], [0, 0, 0, 1, 1, 2], [0], [0]>} : vector<4x8x32xbf16>, vector<4x32x8xbf16>, vector<4x8x8xf32> -> vector<4x8x8xf32>
    "tpu.trace_stop"() : () -> ()
    %c0_194 = arith.constant 0 : index
    %c1_195 = arith.constant 1 : index
    %c0_196 = arith.constant 0 : index
    %c0_197 = arith.constant 0 : index
    %c0_198 = arith.constant 0 : index
    %332 = vector.load %arg3[%c0_194, %c1_195, %c0_196, %c0_197, %c0_198] : memref<2x3x4x1x8xf32, #tpu.memory_space<vmem>>, vector<1x1x4x1x8xf32>
    %333 = vector.shape_cast %332 : vector<1x1x4x1x8xf32> to vector<4x1x8xf32>
    %334 = vector.broadcast %333 : vector<4x1x8xf32> to vector<4x8x8xf32>
    %335 = arith.addf %331, %334 : vector<4x8x8xf32>
    %c0_199 = arith.constant 0 : index
    %c2_200 = arith.constant 2 : index
    %c0_201 = arith.constant 0 : index
    %c0_202 = arith.constant 0 : index
    %c0_203 = arith.constant 0 : index
    %336 = vector.load %arg5[%c0_199, %c2_200, %c0_201, %c0_202, %c0_203] : memref<2x3x4x32x8xbf16, #tpu.memory_space<vmem>>, vector<1x1x4x32x8xbf16>
    %337 = vector.shape_cast %336 : vector<1x1x4x32x8xbf16> to vector<4x32x8xbf16>
    "tpu.trace_start"() <{level = 10 : i32, message = "nsh,nhd->nsd"}> : () -> ()
    %cst_204 = arith.constant dense<0.000000e+00> : vector<4x8x8xf32>
    %338 = tpu.matmul %321, %337, %cst_204 {dimension_numbers = #tpu.dot_dimension_numbers<[2], [1], [1], [2], [0, 0, 0, 1, 1, 2], [0], [0]>} : vector<4x8x32xbf16>, vector<4x32x8xbf16>, vector<4x8x8xf32> -> vector<4x8x8xf32>
    "tpu.trace_stop"() : () -> ()
    %c0_205 = arith.constant 0 : index
    %c2_206 = arith.constant 2 : index
    %c0_207 = arith.constant 0 : index
    %c0_208 = arith.constant 0 : index
    %c0_209 = arith.constant 0 : index
    %339 = vector.load %arg3[%c0_205, %c2_206, %c0_207, %c0_208, %c0_209] : memref<2x3x4x1x8xf32, #tpu.memory_space<vmem>>, vector<1x1x4x1x8xf32>
    %340 = vector.shape_cast %339 : vector<1x1x4x1x8xf32> to vector<4x1x8xf32>
    %341 = vector.broadcast %340 : vector<4x1x8xf32> to vector<4x8x8xf32>
    %342 = arith.addf %338, %341 : vector<4x8x8xf32>
    %343 = arith.truncf %328 : vector<4x8x8xf32> to vector<4x8x8xbf16>
    %344 = arith.truncf %335 : vector<4x8x8xf32> to vector<4x8x8xbf16>
    "tpu.trace_start"() <{level = 10 : i32, message = "nsd,ntd->nst"}> : () -> ()
    %cst_210 = arith.constant dense<0.000000e+00> : vector<4x8x8xf32>
    %345 = tpu.matmul %343, %344, %cst_210 {dimension_numbers = #tpu.dot_dimension_numbers<[2], [2], [1], [1], [0, 0, 0, 1, 1, 1], [0], [0]>} : vector<4x8x8xbf16>, vector<4x8x8xbf16>, vector<4x8x8xf32> -> vector<4x8x8xf32>
    "tpu.trace_stop"() : () -> ()
    %cst_211 = arith.constant 0.353553385 : f32
    %346 = vector.broadcast %cst_211 : f32 to vector<4x8x8xf32>
    %347 = arith.mulf %345, %346 : vector<4x8x8xf32>
    %348 = vector.shape_cast %318 : vector<1x8xf32> to vector<1x1x8xf32>
    %349 = vector.broadcast %348 : vector<1x1x8xf32> to vector<4x8x8xf32>
    %350 = arith.addf %347, %349 : vector<4x8x8xf32>
    %cst_212 = arith.constant dense<0xFF800000> : vector<4x8xf32>
    %351 = vector.multi_reduction <maximumf>, %350, %cst_212 [2] : vector<4x8x8xf32> to vector<4x8xf32>
    %352 = vector.shape_cast %351 : vector<4x8xf32> to vector<4x8x1xf32>
    %353 = vector.broadcast %352 : vector<4x8x1xf32> to vector<4x8x8xf32>
    %354 = arith.subf %350, %353 : vector<4x8x8xf32>
    %355 = math.exp %354 : vector<4x8x8xf32>
    %cst_213 = arith.constant dense<0.000000e+00> : vector<4x8xf32>
    %356 = vector.multi_reduction <add>, %355, %cst_213 [2] : vector<4x8x8xf32> to vector<4x8xf32>
    %357 = vector.shape_cast %356 : vector<4x8xf32> to vector<4x8x1xf32>
    %358 = tpu.reciprocal %357 {approx = true} : vector<4x8x1xf32> -> vector<4x8x1xf32>
    %359 = vector.broadcast %358 : vector<4x8x1xf32> to vector<4x8x8xf32>
    %360 = arith.mulf %355, %359 : vector<4x8x8xf32>
    %361 = arith.truncf %360 : vector<4x8x8xf32> to vector<4x8x8xbf16>
    %362 = arith.truncf %342 : vector<4x8x8xf32> to vector<4x8x8xbf16>
    "tpu.trace_start"() <{level = 10 : i32, message = "nst,ntd->nsd"}> : () -> ()
    %cst_214 = arith.constant dense<0.000000e+00> : vector<4x8x8xf32>
    %363 = tpu.matmul %361, %362, %cst_214 {dimension_numbers = #tpu.dot_dimension_numbers<[2], [1], [1], [2], [0, 0, 0, 1, 1, 2], [0], [0]>} : vector<4x8x8xbf16>, vector<4x8x8xbf16>, vector<4x8x8xf32> -> vector<4x8x8xf32>
    "tpu.trace_stop"() : () -> ()
    %364 = arith.truncf %363 : vector<4x8x8xf32> to vector<4x8x8xbf16>
    %c0_215 = arith.constant 0 : index
    %c0_216 = arith.constant 0 : index
    %c0_217 = arith.constant 0 : index
    %c0_218 = arith.constant 0 : index
    %365 = vector.load %arg6[%c0_215, %c0_216, %c0_217, %c0_218] : memref<2x4x8x32xbf16, #tpu.memory_space<vmem>>, vector<1x4x8x32xbf16>
    %366 = vector.shape_cast %365 : vector<1x4x8x32xbf16> to vector<4x8x32xbf16>
    "tpu.trace_start"() <{level = 10 : i32, message = "nsd,ndh->nsh"}> : () -> ()
    %cst_219 = arith.constant dense<0.000000e+00> : vector<4x8x32xf32>
    %367 = tpu.matmul %364, %366, %cst_219 {dimension_numbers = #tpu.dot_dimension_numbers<[2], [1], [1], [2], [0, 0, 0, 1, 1, 2], [0], [0]>} : vector<4x8x8xbf16>, vector<4x8x32xbf16>, vector<4x8x32xf32> -> vector<4x8x32xf32>
    "tpu.trace_stop"() : () -> ()
    %cst_220 = arith.constant dense<0.000000e+00> : vector<8x32xf32>
    %368 = vector.multi_reduction <add>, %367, %cst_220 [0] : vector<4x8x32xf32> to vector<8x32xf32>
    %c2_221 = arith.constant 2 : index
    %c0_222 = arith.constant 0 : index
    %369 = vector.load %arg2[%c2_221, %c0_222] : memref<14x32xf32, #tpu.memory_space<vmem>>, vector<1x32xf32>
    %370 = vector.broadcast %369 : vector<1x32xf32> to vector<8x32xf32>
    %371 = arith.addf %368, %370 : vector<8x32xf32>
    %372 = arith.addf %371, %316 : vector<8x32xf32>
    %c3_223 = arith.constant 3 : index
    %c0_224 = arith.constant 0 : index
    %373 = vector.load %arg2[%c3_223, %c0_224] : memref<14x32xf32, #tpu.memory_space<vmem>>, vector<1x32xf32>
    %c4_225 = arith.constant 4 : index
    %c0_226 = arith.constant 0 : index
    %374 = vector.load %arg2[%c4_225, %c0_226] : memref<14x32xf32, #tpu.memory_space<vmem>>, vector<1x32xf32>
    %cst_227 = arith.constant dense<0.000000e+00> : vector<8xf32>
    %375 = vector.multi_reduction <add>, %372, %cst_227 [1] : vector<8x32xf32> to vector<8xf32>
    %376 = vector.shape_cast %375 : vector<8xf32> to vector<8x1xf32>
    %cst_228 = arith.constant 3.200000e+01 : f32
    %377 = vector.broadcast %cst_228 : f32 to vector<8x1xf32>
    %378 = arith.divf %376, %377 : vector<8x1xf32>
    %379 = vector.broadcast %378 : vector<8x1xf32> to vector<8x32xf32>
    %380 = arith.subf %372, %379 : vector<8x32xf32>
    %381 = arith.mulf %380, %380 : vector<8x32xf32>
    %cst_229 = arith.constant dense<0.000000e+00> : vector<8xf32>
    %382 = vector.multi_reduction <add>, %381, %cst_229 [1] : vector<8x32xf32> to vector<8xf32>
    %383 = vector.shape_cast %382 : vector<8xf32> to vector<8x1xf32>
    %cst_230 = arith.constant 3.200000e+01 : f32
    %384 = vector.broadcast %cst_230 : f32 to vector<8x1xf32>
    %385 = arith.divf %383, %384 : vector<8x1xf32>
    %386 = vector.broadcast %378 : vector<8x1xf32> to vector<8x32xf32>
    %387 = arith.subf %372, %386 : vector<8x32xf32>
    %cst_231 = arith.constant 9.99999996E-13 : f32
    %388 = vector.broadcast %cst_231 : f32 to vector<8x1xf32>
    %389 = arith.addf %385, %388 : vector<8x1xf32>
    %390 = math.rsqrt %389 : vector<8x1xf32>
    %391 = vector.broadcast %390 : vector<8x1xf32> to vector<8x32xf32>
    %392 = arith.mulf %387, %391 : vector<8x32xf32>
    %393 = vector.broadcast %373 : vector<1x32xf32> to vector<8x32xf32>
    %394 = arith.mulf %392, %393 : vector<8x32xf32>
    %395 = vector.broadcast %374 : vector<1x32xf32> to vector<8x32xf32>
    %396 = arith.addf %394, %395 : vector<8x32xf32>
    %397 = arith.truncf %396 : vector<8x32xf32> to vector<8x32xbf16>
    %c0_232 = arith.constant 0 : index
    %c0_233 = arith.constant 0 : index
    %c0_234 = arith.constant 0 : index
    %398 = vector.load %arg7[%c0_232, %c0_233, %c0_234] : memref<2x32x64xbf16, #tpu.memory_space<vmem>>, vector<1x32x64xbf16>
    %399 = vector.shape_cast %398 : vector<1x32x64xbf16> to vector<32x64xbf16>
    %cst_235 = arith.constant dense<0.000000e+00> : vector<8x64xf32>
    %400 = tpu.matmul %397, %399, %cst_235 {dimension_numbers = #tpu.dot_dimension_numbers<[1], [0], [0], [1], [0, 0, 1, 1], [], []>} : vector<8x32xbf16>, vector<32x64xbf16>, vector<8x64xf32> -> vector<8x64xf32>
    %c0_236 = arith.constant 0 : index
    %c0_237 = arith.constant 0 : index
    %c0_238 = arith.constant 0 : index
    %401 = vector.load %arg4[%c0_236, %c0_237, %c0_238] : memref<2x1x64xf32, #tpu.memory_space<vmem>>, vector<1x1x64xf32>
    %402 = vector.shape_cast %401 : vector<1x1x64xf32> to vector<1x64xf32>
    %403 = vector.broadcast %402 : vector<1x64xf32> to vector<8x64xf32>
    %404 = arith.addf %400, %403 : vector<8x64xf32>
    %cst_239 = arith.constant 5.000000e-01 : f32
    %405 = vector.broadcast %cst_239 : f32 to vector<8x64xf32>
    %406 = arith.mulf %405, %404 : vector<8x64xf32>
    %cst_240 = arith.constant 4.471500e-02 : f32
    %407 = vector.broadcast %cst_240 : f32 to vector<8x64xf32>
    %408 = arith.mulf %407, %404 : vector<8x64xf32>
    %409 = arith.mulf %408, %404 : vector<8x64xf32>
    %410 = arith.mulf %409, %404 : vector<8x64xf32>
    %411 = arith.addf %404, %410 : vector<8x64xf32>
    %cst_241 = arith.constant 0.797884583 : f32
    %412 = vector.broadcast %cst_241 : f32 to vector<8x64xf32>
    %413 = arith.mulf %412, %411 : vector<8x64xf32>
    %414 = math.tanh %413 : vector<8x64xf32>
    %cst_242 = arith.constant 1.000000e+00 : f32
    %415 = vector.broadcast %cst_242 : f32 to vector<8x64xf32>
    %416 = arith.addf %415, %414 : vector<8x64xf32>
    %417 = arith.mulf %406, %416 : vector<8x64xf32>
    %418 = arith.truncf %417 : vector<8x64xf32> to vector<8x64xbf16>
    %c0_243 = arith.constant 0 : index
    %c0_244 = arith.constant 0 : index
    %c0_245 = arith.constant 0 : index
    %419 = vector.load %arg8[%c0_243, %c0_244, %c0_245] : memref<2x64x32xbf16, #tpu.memory_space<vmem>>, vector<1x64x32xbf16>
    %420 = vector.shape_cast %419 : vector<1x64x32xbf16> to vector<64x32xbf16>
    %cst_246 = arith.constant dense<0.000000e+00> : vector<8x32xf32>
    %421 = tpu.matmul %418, %420, %cst_246 {dimension_numbers = #tpu.dot_dimension_numbers<[1], [0], [0], [1], [0, 0, 1, 1], [], []>} : vector<8x64xbf16>, vector<64x32xbf16>, vector<8x32xf32> -> vector<8x32xf32>
    %c5_247 = arith.constant 5 : index
    %c0_248 = arith.constant 0 : index
    %422 = vector.load %arg2[%c5_247, %c0_248] : memref<14x32xf32, #tpu.memory_space<vmem>>, vector<1x32xf32>
    %423 = vector.broadcast %422 : vector<1x32xf32> to vector<8x32xf32>
    %424 = arith.addf %421, %423 : vector<8x32xf32>
    %425 = arith.addf %424, %396 : vector<8x32xf32>
    %c6_249 = arith.constant 6 : index
    %c0_250 = arith.constant 0 : index
    %426 = vector.load %arg2[%c6_249, %c0_250] : memref<14x32xf32, #tpu.memory_space<vmem>>, vector<1x32xf32>
    %c7_251 = arith.constant 7 : index
    %c0_252 = arith.constant 0 : index
    %427 = vector.load %arg2[%c7_251, %c0_252] : memref<14x32xf32, #tpu.memory_space<vmem>>, vector<1x32xf32>
    %cst_253 = arith.constant dense<0.000000e+00> : vector<8xf32>
    %428 = vector.multi_reduction <add>, %425, %cst_253 [1] : vector<8x32xf32> to vector<8xf32>
    %429 = vector.shape_cast %428 : vector<8xf32> to vector<8x1xf32>
    %cst_254 = arith.constant 3.200000e+01 : f32
    %430 = vector.broadcast %cst_254 : f32 to vector<8x1xf32>
    %431 = arith.divf %429, %430 : vector<8x1xf32>
    %432 = vector.broadcast %431 : vector<8x1xf32> to vector<8x32xf32>
    %433 = arith.subf %425, %432 : vector<8x32xf32>
    %434 = arith.mulf %433, %433 : vector<8x32xf32>
    %cst_255 = arith.constant dense<0.000000e+00> : vector<8xf32>
    %435 = vector.multi_reduction <add>, %434, %cst_255 [1] : vector<8x32xf32> to vector<8xf32>
    %436 = vector.shape_cast %435 : vector<8xf32> to vector<8x1xf32>
    %cst_256 = arith.constant 3.200000e+01 : f32
    %437 = vector.broadcast %cst_256 : f32 to vector<8x1xf32>
    %438 = arith.divf %436, %437 : vector<8x1xf32>
    %439 = vector.broadcast %431 : vector<8x1xf32> to vector<8x32xf32>
    %440 = arith.subf %425, %439 : vector<8x32xf32>
    %cst_257 = arith.constant 9.99999996E-13 : f32
    %441 = vector.broadcast %cst_257 : f32 to vector<8x1xf32>
    %442 = arith.addf %438, %441 : vector<8x1xf32>
    %443 = math.rsqrt %442 : vector<8x1xf32>
    %444 = vector.broadcast %443 : vector<8x1xf32> to vector<8x32xf32>
    %445 = arith.mulf %440, %444 : vector<8x32xf32>
    %446 = vector.broadcast %426 : vector<1x32xf32> to vector<8x32xf32>
    %447 = arith.mulf %445, %446 : vector<8x32xf32>
    %448 = vector.broadcast %427 : vector<1x32xf32> to vector<8x32xf32>
    %449 = arith.addf %447, %448 : vector<8x32xf32>
    %450 = arith.truncf %449 : vector<8x32xf32> to vector<8x32xbf16>
    %451 = vector.shape_cast %450 : vector<8x32xbf16> to vector<1x8x32xbf16>
    %452 = vector.broadcast %451 : vector<1x8x32xbf16> to vector<4x8x32xbf16>
    %c1_258 = arith.constant 1 : index
    %c0_259 = arith.constant 0 : index
    %c0_260 = arith.constant 0 : index
    %c0_261 = arith.constant 0 : index
    %c0_262 = arith.constant 0 : index
    %453 = vector.load %arg5[%c1_258, %c0_259, %c0_260, %c0_261, %c0_262] : memref<2x3x4x32x8xbf16, #tpu.memory_space<vmem>>, vector<1x1x4x32x8xbf16>
    %454 = vector.shape_cast %453 : vector<1x1x4x32x8xbf16> to vector<4x32x8xbf16>
    "tpu.trace_start"() <{level = 10 : i32, message = "nsh,nhd->nsd"}> : () -> ()
    %cst_263 = arith.constant dense<0.000000e+00> : vector<4x8x8xf32>
    %455 = tpu.matmul %452, %454, %cst_263 {dimension_numbers = #tpu.dot_dimension_numbers<[2], [1], [1], [2], [0, 0, 0, 1, 1, 2], [0], [0]>} : vector<4x8x32xbf16>, vector<4x32x8xbf16>, vector<4x8x8xf32> -> vector<4x8x8xf32>
    "tpu.trace_stop"() : () -> ()
    %c1_264 = arith.constant 1 : index
    %c0_265 = arith.constant 0 : index
    %c0_266 = arith.constant 0 : index
    %c0_267 = arith.constant 0 : index
    %c0_268 = arith.constant 0 : index
    %456 = vector.load %arg3[%c1_264, %c0_265, %c0_266, %c0_267, %c0_268] : memref<2x3x4x1x8xf32, #tpu.memory_space<vmem>>, vector<1x1x4x1x8xf32>
    %457 = vector.shape_cast %456 : vector<1x1x4x1x8xf32> to vector<4x1x8xf32>
    %458 = vector.broadcast %457 : vector<4x1x8xf32> to vector<4x8x8xf32>
    %459 = arith.addf %455, %458 : vector<4x8x8xf32>
    %c1_269 = arith.constant 1 : index
    %c1_270 = arith.constant 1 : index
    %c0_271 = arith.constant 0 : index
    %c0_272 = arith.constant 0 : index
    %c0_273 = arith.constant 0 : index
    %460 = vector.load %arg5[%c1_269, %c1_270, %c0_271, %c0_272, %c0_273] : memref<2x3x4x32x8xbf16, #tpu.memory_space<vmem>>, vector<1x1x4x32x8xbf16>
    %461 = vector.shape_cast %460 : vector<1x1x4x32x8xbf16> to vector<4x32x8xbf16>
    "tpu.trace_start"() <{level = 10 : i32, message = "nsh,nhd->nsd"}> : () -> ()
    %cst_274 = arith.constant dense<0.000000e+00> : vector<4x8x8xf32>
    %462 = tpu.matmul %452, %461, %cst_274 {dimension_numbers = #tpu.dot_dimension_numbers<[2], [1], [1], [2], [0, 0, 0, 1, 1, 2], [0], [0]>} : vector<4x8x32xbf16>, vector<4x32x8xbf16>, vector<4x8x8xf32> -> vector<4x8x8xf32>
    "tpu.trace_stop"() : () -> ()
    %c1_275 = arith.constant 1 : index
    %c1_276 = arith.constant 1 : index
    %c0_277 = arith.constant 0 : index
    %c0_278 = arith.constant 0 : index
    %c0_279 = arith.constant 0 : index
    %463 = vector.load %arg3[%c1_275, %c1_276, %c0_277, %c0_278, %c0_279] : memref<2x3x4x1x8xf32, #tpu.memory_space<vmem>>, vector<1x1x4x1x8xf32>
    %464 = vector.shape_cast %463 : vector<1x1x4x1x8xf32> to vector<4x1x8xf32>
    %465 = vector.broadcast %464 : vector<4x1x8xf32> to vector<4x8x8xf32>
    %466 = arith.addf %462, %465 : vector<4x8x8xf32>
    %c1_280 = arith.constant 1 : index
    %c2_281 = arith.constant 2 : index
    %c0_282 = arith.constant 0 : index
    %c0_283 = arith.constant 0 : index
    %c0_284 = arith.constant 0 : index
    %467 = vector.load %arg5[%c1_280, %c2_281, %c0_282, %c0_283, %c0_284] : memref<2x3x4x32x8xbf16, #tpu.memory_space<vmem>>, vector<1x1x4x32x8xbf16>
    %468 = vector.shape_cast %467 : vector<1x1x4x32x8xbf16> to vector<4x32x8xbf16>
    "tpu.trace_start"() <{level = 10 : i32, message = "nsh,nhd->nsd"}> : () -> ()
    %cst_285 = arith.constant dense<0.000000e+00> : vector<4x8x8xf32>
    %469 = tpu.matmul %452, %468, %cst_285 {dimension_numbers = #tpu.dot_dimension_numbers<[2], [1], [1], [2], [0, 0, 0, 1, 1, 2], [0], [0]>} : vector<4x8x32xbf16>, vector<4x32x8xbf16>, vector<4x8x8xf32> -> vector<4x8x8xf32>
    "tpu.trace_stop"() : () -> ()
    %c1_286 = arith.constant 1 : index
    %c2_287 = arith.constant 2 : index
    %c0_288 = arith.constant 0 : index
    %c0_289 = arith.constant 0 : index
    %c0_290 = arith.constant 0 : index
    %470 = vector.load %arg3[%c1_286, %c2_287, %c0_288, %c0_289, %c0_290] : memref<2x3x4x1x8xf32, #tpu.memory_space<vmem>>, vector<1x1x4x1x8xf32>
    %471 = vector.shape_cast %470 : vector<1x1x4x1x8xf32> to vector<4x1x8xf32>
    %472 = vector.broadcast %471 : vector<4x1x8xf32> to vector<4x8x8xf32>
    %473 = arith.addf %469, %472 : vector<4x8x8xf32>
    %474 = arith.truncf %459 : vector<4x8x8xf32> to vector<4x8x8xbf16>
    %475 = arith.truncf %466 : vector<4x8x8xf32> to vector<4x8x8xbf16>
    "tpu.trace_start"() <{level = 10 : i32, message = "nsd,ntd->nst"}> : () -> ()
    %cst_291 = arith.constant dense<0.000000e+00> : vector<4x8x8xf32>
    %476 = tpu.matmul %474, %475, %cst_291 {dimension_numbers = #tpu.dot_dimension_numbers<[2], [2], [1], [1], [0, 0, 0, 1, 1, 1], [0], [0]>} : vector<4x8x8xbf16>, vector<4x8x8xbf16>, vector<4x8x8xf32> -> vector<4x8x8xf32>
    "tpu.trace_stop"() : () -> ()
    %cst_292 = arith.constant 0.353553385 : f32
    %477 = vector.broadcast %cst_292 : f32 to vector<4x8x8xf32>
    %478 = arith.mulf %476, %477 : vector<4x8x8xf32>
    %479 = vector.shape_cast %318 : vector<1x8xf32> to vector<1x1x8xf32>
    %480 = vector.broadcast %479 : vector<1x1x8xf32> to vector<4x8x8xf32>
    %481 = arith.addf %478, %480 : vector<4x8x8xf32>
    %cst_293 = arith.constant dense<0xFF800000> : vector<4x8xf32>
    %482 = vector.multi_reduction <maximumf>, %481, %cst_293 [2] : vector<4x8x8xf32> to vector<4x8xf32>
    %483 = vector.shape_cast %482 : vector<4x8xf32> to vector<4x8x1xf32>
    %484 = vector.broadcast %483 : vector<4x8x1xf32> to vector<4x8x8xf32>
    %485 = arith.subf %481, %484 : vector<4x8x8xf32>
    %486 = math.exp %485 : vector<4x8x8xf32>
    %cst_294 = arith.constant dense<0.000000e+00> : vector<4x8xf32>
    %487 = vector.multi_reduction <add>, %486, %cst_294 [2] : vector<4x8x8xf32> to vector<4x8xf32>
    %488 = vector.shape_cast %487 : vector<4x8xf32> to vector<4x8x1xf32>
    %489 = tpu.reciprocal %488 {approx = true} : vector<4x8x1xf32> -> vector<4x8x1xf32>
    %490 = vector.broadcast %489 : vector<4x8x1xf32> to vector<4x8x8xf32>
    %491 = arith.mulf %486, %490 : vector<4x8x8xf32>
    %492 = arith.truncf %491 : vector<4x8x8xf32> to vector<4x8x8xbf16>
    %493 = arith.truncf %473 : vector<4x8x8xf32> to vector<4x8x8xbf16>
    "tpu.trace_start"() <{level = 10 : i32, message = "nst,ntd->nsd"}> : () -> ()
    %cst_295 = arith.constant dense<0.000000e+00> : vector<4x8x8xf32>
    %494 = tpu.matmul %492, %493, %cst_295 {dimension_numbers = #tpu.dot_dimension_numbers<[2], [1], [1], [2], [0, 0, 0, 1, 1, 2], [0], [0]>} : vector<4x8x8xbf16>, vector<4x8x8xbf16>, vector<4x8x8xf32> -> vector<4x8x8xf32>
    "tpu.trace_stop"() : () -> ()
    %495 = arith.truncf %494 : vector<4x8x8xf32> to vector<4x8x8xbf16>
    %c1_296 = arith.constant 1 : index
    %c0_297 = arith.constant 0 : index
    %c0_298 = arith.constant 0 : index
    %c0_299 = arith.constant 0 : index
    %496 = vector.load %arg6[%c1_296, %c0_297, %c0_298, %c0_299] : memref<2x4x8x32xbf16, #tpu.memory_space<vmem>>, vector<1x4x8x32xbf16>
    %497 = vector.shape_cast %496 : vector<1x4x8x32xbf16> to vector<4x8x32xbf16>
    "tpu.trace_start"() <{level = 10 : i32, message = "nsd,ndh->nsh"}> : () -> ()
    %cst_300 = arith.constant dense<0.000000e+00> : vector<4x8x32xf32>
    %498 = tpu.matmul %495, %497, %cst_300 {dimension_numbers = #tpu.dot_dimension_numbers<[2], [1], [1], [2], [0, 0, 0, 1, 1, 2], [0], [0]>} : vector<4x8x8xbf16>, vector<4x8x32xbf16>, vector<4x8x32xf32> -> vector<4x8x32xf32>
    "tpu.trace_stop"() : () -> ()
    %cst_301 = arith.constant dense<0.000000e+00> : vector<8x32xf32>
    %499 = vector.multi_reduction <add>, %498, %cst_301 [0] : vector<4x8x32xf32> to vector<8x32xf32>
    %c8_302 = arith.constant 8 : index
    %c0_303 = arith.constant 0 : index
    %500 = vector.load %arg2[%c8_302, %c0_303] : memref<14x32xf32, #tpu.memory_space<vmem>>, vector<1x32xf32>
    %501 = vector.broadcast %500 : vector<1x32xf32> to vector<8x32xf32>
    %502 = arith.addf %499, %501 : vector<8x32xf32>
    %503 = arith.addf %502, %449 : vector<8x32xf32>
    %c9_304 = arith.constant 9 : index
    %c0_305 = arith.constant 0 : index
    %504 = vector.load %arg2[%c9_304, %c0_305] : memref<14x32xf32, #tpu.memory_space<vmem>>, vector<1x32xf32>
    %c10_306 = arith.constant 10 : index
    %c0_307 = arith.constant 0 : index
    %505 = vector.load %arg2[%c10_306, %c0_307] : memref<14x32xf32, #tpu.memory_space<vmem>>, vector<1x32xf32>
    %cst_308 = arith.constant dense<0.000000e+00> : vector<8xf32>
    %506 = vector.multi_reduction <add>, %503, %cst_308 [1] : vector<8x32xf32> to vector<8xf32>
    %507 = vector.shape_cast %506 : vector<8xf32> to vector<8x1xf32>
    %cst_309 = arith.constant 3.200000e+01 : f32
    %508 = vector.broadcast %cst_309 : f32 to vector<8x1xf32>
    %509 = arith.divf %507, %508 : vector<8x1xf32>
    %510 = vector.broadcast %509 : vector<8x1xf32> to vector<8x32xf32>
    %511 = arith.subf %503, %510 : vector<8x32xf32>
    %512 = arith.mulf %511, %511 : vector<8x32xf32>
    %cst_310 = arith.constant dense<0.000000e+00> : vector<8xf32>
    %513 = vector.multi_reduction <add>, %512, %cst_310 [1] : vector<8x32xf32> to vector<8xf32>
    %514 = vector.shape_cast %513 : vector<8xf32> to vector<8x1xf32>
    %cst_311 = arith.constant 3.200000e+01 : f32
    %515 = vector.broadcast %cst_311 : f32 to vector<8x1xf32>
    %516 = arith.divf %514, %515 : vector<8x1xf32>
    %517 = vector.broadcast %509 : vector<8x1xf32> to vector<8x32xf32>
    %518 = arith.subf %503, %517 : vector<8x32xf32>
    %cst_312 = arith.constant 9.99999996E-13 : f32
    %519 = vector.broadcast %cst_312 : f32 to vector<8x1xf32>
    %520 = arith.addf %516, %519 : vector<8x1xf32>
    %521 = math.rsqrt %520 : vector<8x1xf32>
    %522 = vector.broadcast %521 : vector<8x1xf32> to vector<8x32xf32>
    %523 = arith.mulf %518, %522 : vector<8x32xf32>
    %524 = vector.broadcast %504 : vector<1x32xf32> to vector<8x32xf32>
    %525 = arith.mulf %523, %524 : vector<8x32xf32>
    %526 = vector.broadcast %505 : vector<1x32xf32> to vector<8x32xf32>
    %527 = arith.addf %525, %526 : vector<8x32xf32>
    %528 = arith.truncf %527 : vector<8x32xf32> to vector<8x32xbf16>
    %c1_313 = arith.constant 1 : index
    %c0_314 = arith.constant 0 : index
    %c0_315 = arith.constant 0 : index
    %529 = vector.load %arg7[%c1_313, %c0_314, %c0_315] : memref<2x32x64xbf16, #tpu.memory_space<vmem>>, vector<1x32x64xbf16>
    %530 = vector.shape_cast %529 : vector<1x32x64xbf16> to vector<32x64xbf16>
    %cst_316 = arith.constant dense<0.000000e+00> : vector<8x64xf32>
    %531 = tpu.matmul %528, %530, %cst_316 {dimension_numbers = #tpu.dot_dimension_numbers<[1], [0], [0], [1], [0, 0, 1, 1], [], []>} : vector<8x32xbf16>, vector<32x64xbf16>, vector<8x64xf32> -> vector<8x64xf32>
    %c1_317 = arith.constant 1 : index
    %c0_318 = arith.constant 0 : index
    %c0_319 = arith.constant 0 : index
    %532 = vector.load %arg4[%c1_317, %c0_318, %c0_319] : memref<2x1x64xf32, #tpu.memory_space<vmem>>, vector<1x1x64xf32>
    %533 = vector.shape_cast %532 : vector<1x1x64xf32> to vector<1x64xf32>
    %534 = vector.broadcast %533 : vector<1x64xf32> to vector<8x64xf32>
    %535 = arith.addf %531, %534 : vector<8x64xf32>
    %cst_320 = arith.constant 5.000000e-01 : f32
    %536 = vector.broadcast %cst_320 : f32 to vector<8x64xf32>
    %537 = arith.mulf %536, %535 : vector<8x64xf32>
    %cst_321 = arith.constant 4.471500e-02 : f32
    %538 = vector.broadcast %cst_321 : f32 to vector<8x64xf32>
    %539 = arith.mulf %538, %535 : vector<8x64xf32>
    %540 = arith.mulf %539, %535 : vector<8x64xf32>
    %541 = arith.mulf %540, %535 : vector<8x64xf32>
    %542 = arith.addf %535, %541 : vector<8x64xf32>
    %cst_322 = arith.constant 0.797884583 : f32
    %543 = vector.broadcast %cst_322 : f32 to vector<8x64xf32>
    %544 = arith.mulf %543, %542 : vector<8x64xf32>
    %545 = math.tanh %544 : vector<8x64xf32>
    %cst_323 = arith.constant 1.000000e+00 : f32
    %546 = vector.broadcast %cst_323 : f32 to vector<8x64xf32>
    %547 = arith.addf %546, %545 : vector<8x64xf32>
    %548 = arith.mulf %537, %547 : vector<8x64xf32>
    %549 = arith.truncf %548 : vector<8x64xf32> to vector<8x64xbf16>
    %c1_324 = arith.constant 1 : index
    %c0_325 = arith.constant 0 : index
    %c0_326 = arith.constant 0 : index
    %550 = vector.load %arg8[%c1_324, %c0_325, %c0_326] : memref<2x64x32xbf16, #tpu.memory_space<vmem>>, vector<1x64x32xbf16>
    %551 = vector.shape_cast %550 : vector<1x64x32xbf16> to vector<64x32xbf16>
    %cst_327 = arith.constant dense<0.000000e+00> : vector<8x32xf32>
    %552 = tpu.matmul %549, %551, %cst_327 {dimension_numbers = #tpu.dot_dimension_numbers<[1], [0], [0], [1], [0, 0, 1, 1], [], []>} : vector<8x64xbf16>, vector<64x32xbf16>, vector<8x32xf32> -> vector<8x32xf32>
    %c11_328 = arith.constant 11 : index
    %c0_329 = arith.constant 0 : index
    %553 = vector.load %arg2[%c11_328, %c0_329] : memref<14x32xf32, #tpu.memory_space<vmem>>, vector<1x32xf32>
    %554 = vector.broadcast %553 : vector<1x32xf32> to vector<8x32xf32>
    %555 = arith.addf %552, %554 : vector<8x32xf32>
    %556 = arith.addf %555, %527 : vector<8x32xf32>
    %c12_330 = arith.constant 12 : index
    %c0_331 = arith.constant 0 : index
    %557 = vector.load %arg2[%c12_330, %c0_331] : memref<14x32xf32, #tpu.memory_space<vmem>>, vector<1x32xf32>
    %c13_332 = arith.constant 13 : index
    %c0_333 = arith.constant 0 : index
    %558 = vector.load %arg2[%c13_332, %c0_333] : memref<14x32xf32, #tpu.memory_space<vmem>>, vector<1x32xf32>
    %cst_334 = arith.constant dense<0.000000e+00> : vector<8xf32>
    %559 = vector.multi_reduction <add>, %556, %cst_334 [1] : vector<8x32xf32> to vector<8xf32>
    %560 = vector.shape_cast %559 : vector<8xf32> to vector<8x1xf32>
    %cst_335 = arith.constant 3.200000e+01 : f32
    %561 = vector.broadcast %cst_335 : f32 to vector<8x1xf32>
    %562 = arith.divf %560, %561 : vector<8x1xf32>
    %563 = vector.broadcast %562 : vector<8x1xf32> to vector<8x32xf32>
    %564 = arith.subf %556, %563 : vector<8x32xf32>
    %565 = arith.mulf %564, %564 : vector<8x32xf32>
    %cst_336 = arith.constant dense<0.000000e+00> : vector<8xf32>
    %566 = vector.multi_reduction <add>, %565, %cst_336 [1] : vector<8x32xf32> to vector<8xf32>
    %567 = vector.shape_cast %566 : vector<8xf32> to vector<8x1xf32>
    %cst_337 = arith.constant 3.200000e+01 : f32
    %568 = vector.broadcast %cst_337 : f32 to vector<8x1xf32>
    %569 = arith.divf %567, %568 : vector<8x1xf32>
    %570 = vector.broadcast %562 : vector<8x1xf32> to vector<8x32xf32>
    %571 = arith.subf %556, %570 : vector<8x32xf32>
    %cst_338 = arith.constant 9.99999996E-13 : f32
    %572 = vector.broadcast %cst_338 : f32 to vector<8x1xf32>
    %573 = arith.addf %569, %572 : vector<8x1xf32>
    %574 = math.rsqrt %573 : vector<8x1xf32>
    %575 = vector.broadcast %574 : vector<8x1xf32> to vector<8x32xf32>
    %576 = arith.mulf %571, %575 : vector<8x32xf32>
    %577 = vector.broadcast %557 : vector<1x32xf32> to vector<8x32xf32>
    %578 = arith.mulf %576, %577 : vector<8x32xf32>
    %579 = vector.broadcast %558 : vector<1x32xf32> to vector<8x32xf32>
    %580 = arith.addf %578, %579 : vector<8x32xf32>
    %581 = vector.extract_strided_slice %580 {offsets = [0, 0], sizes = [1, 32], strides = [1, 1]} : vector<8x32xf32> to vector<1x32xf32>
    %582 = tpu.concatenate %290, %581 in 0 : vector<1x32xf32>, vector<1x32xf32> -> vector<2x32xf32>
    %c0_339 = arith.constant 0 : index
    %c0_340 = arith.constant 0 : index
    %583 = vector.load %arg9[%c0_339, %c0_340] : memref<2x32xf32, #tpu.memory_space<vmem>>, vector<2x32xf32>
    tpu.vector_store %arg9[%c0_339, %c0_340], %582 {strides = array<i32>} : memref<2x32xf32, #tpu.memory_space<vmem>>, vector<2x32xf32>,
    return
  }
}

</mosaic_0001>

<bundles_post_ra>
// kernel: bert_classifier_forward.1
= control target key start
LH: loop header
LB: loop body
LE: loop exit
PB: predicated region body
PF: predicated region fallthrough
CT: control target
= control target key end

     0   :  { %vm36_vm0 = vcmask 261120   ;;  %v8353_v8 = vmov 0.0   ;;  %vm8354_vm1 = vmmov 0   ;;  %vm834_vm2 = vcmask 64512   ;;  %s9788_s0 = inlined_call_operand.vmem [shape: f32[2,8,32], index: 0, kind: input, shape index: {}]   ;;  %s9789_s5 = inlined_call_operand.vmem [shape: bf16[2,3,4,32,8], index: 5, kind: input, shape index: {}]   ;;  %s9790_s2 = inlined_call_operand.vmem [shape: f32[14,32], index: 2, kind: input, shape index: {}]   ;;  %s9791_s3 = inlined_call_operand.vmem [shape: f32[2,3,4,1,8], index: 3, kind: input, shape index: {}]   ;;  %s9792_s1 = inlined_call_operand.vmem [shape: f32[2,1,8], index: 1, kind: input, shape index: {}]   ;;  %s9793_s6 = inlined_call_operand.vmem [shape: bf16[2,4,8,32], index: 6, kind: input, shape index: {}]   ;;  %s9794_s7 = inlined_call_operand.vmem [shape: bf16[2,32,64], index: 7, kind: input, shape index: {}]   ;;  %s9795_s8 = inlined_call_operand.vmem [shape: bf16[2,64,32], index: 8, kind: input, shape index: {}]   ;;  %s9796_s4 = inlined_call_operand.vmem [shape: f32[2,1,64], index: 4, kind: input, shape index: {}]   ;;  %s9797_s9 = inlined_call_operand.vmem [shape: f32[2,32], index: 9, kind: output, shape index: {}]  }
   0x1   :  { %v33_v0 = vld [vmem:[%s9788_s0] sm:$0xff]  ;;  %7385 = vmatprep.subr.bf16.mxu1 %v8353_v8  ;;  %7401 = vmatprep.subr.bf16.mxu0 %v8353_v8  ;;  %v8141_v10 = vld [vmem:[%s9789_s5 + $0x8] sm:$0xff]   ;;  %v8143_v21 = vld [vmem:[%s9789_s5 + $0x10] sm:$0xff]   ;;  %vm1088_vm3 = vcmask 1043456   ;;  %vm1615_vm4 = vcmask 523264   ;;  %vm6563_vm5 = vcmask 1040384  }
   0x2   :  { %v37_v1 = vsel %vm36_vm0, %v33_v0, 0.0  ;;  %v8139_v7 = vld [vmem:[%s9789_s5] sm:$0xff]   ;;  %v8142_v11 = vld [vmem:[%s9789_s5 + $0x28] sm:$0xff]   ;;  %7389 = vmatprep.mubr.msk.bf16.mxu1 %vm8354_vm1, %v8353_v8  ;;  %7405 = vmatprep.mubr.msk.bf16.mxu0 %vm8354_vm1, %v8353_v8  ;;  %v8145_v24 = vld [vmem:[%s9789_s5 + $0x18] sm:$0xff]   ;;  %vm6565_vm6 = vcmask 254976  }
   0x3   :  { %38 = vadd.xlane.f32.xlu0 %v37_v1  ;;  %v8140_v9 = vld [vmem:[%s9789_s5 + $0x20] sm:$0xff]   ;;  %7386 = vmatpush3.bf16.msra.mxu1 %v8139_v7  ;;  %v8146_v25 = vld [vmem:[%s9789_s5 + $0x48] sm:$0xff]   ;;  %v8147_v26 = vld [vmem:[%s9789_s5 + $0x30] sm:$0xff]  }
   0x4   :  { %7402 = vmatpush3.bf16.msra.mxu0 %v8140_v9  ;;  %7387 = vmatprep.subr.bf16.mxu1 %v8353_v8  ;;  %v6571_v16 = vld [vmem:[%s9790_s2] ss:$0 sm:$0xff]  ;;  %v6572_v18 = vld [vmem:[%s9790_s2 + $0x1] ss:$0 sm:$0xff]  ;;  %v8149_v28 = vld [vmem:[%s9789_s5 + $0x38] sm:$0xff]  }
   0x5   :  { %7403 = vmatprep.subr.bf16.mxu0 %v8353_v8  ;;  %v8144_v22 = vld [vmem:[%s9789_s5 + $0x40] sm:$0xff]   ;;  %v8150_v29 = vld [vmem:[%s9789_s5 + $0x68] sm:$0xff]   ;;  %v8151_v30 = vld [vmem:[%s9789_s5 + $0x50] sm:$0xff]  }
   0x6   :  { %v8148_v27 = vld [vmem:[%s9789_s5 + $0x60] sm:$0xff]   ;;  %v8153_v32 = vld [vmem:[%s9789_s5 + $0x58] sm:$0xff]   ;;  %v8154_v33 = vld [vmem:[%s9789_s5 + $0x88] sm:$0xff]  }
   0x7   :  { %7388 = vmatpush3.bf16.msra.mxu1 %v8141_v10  ;;  %v8152_v31 = vld [vmem:[%s9789_s5 + $0x80] sm:$0xff]   ;;  %v8155_v34 = vld [vmem:[%s9789_s5 + $0x70] sm:$0xff]   ;;  %v8157_v36 = vld [vmem:[%s9789_s5 + $0x78] sm:$0xff]  }
   0x8   :  { %7404 = vmatpush3.bf16.msra.mxu0 %v8142_v11  ;;  %7393 = vmatprep.subr.bf16.mxu1 %v8353_v8  ;;  %v8156_v35 = vld [vmem:[%s9789_s5 + $0xa0] sm:$0xff]   ;;  %v8158_v37 = vld [vmem:[%s9789_s5 + $0xa8] sm:$0xff]   ;;  %v8159_v38 = vld [vmem:[%s9789_s5 + $0x90] sm:$0xff]  }
   0x9   :  { %7417 = vmatprep.subr.bf16.mxu0 %v8353_v8  ;;  %v8160_v39 = vld [vmem:[%s9789_s5 + $0x98] sm:$0xff]   ;;  %v8161_v40 = vld [vmem:[%s9789_s5 + $0xb0] sm:$0xff]   ;;  %v6609_v50 = vld [vmem:[%s9791_s3 + $0x4] ss:$0 sm:$0xff] }
   0xa   :  { %v8162_v41 = vld [vmem:[%s9789_s5 + $0xb8] sm:$0xff]   ;;  %v6573_v61 = vld [vmem:[%s9791_s3] ss:$0 sm:$0xff]  ;;  %v6611_v63 = vld [vmem:[%s9791_s3 + $0x6] ss:$0 sm:$0xff] }
  0x90   :  { %v39_v2 = vpop.xlane.xlu0 %38 }
  0x91   :  { %v41_v3 = vmul.f32 0.03125, %v39_v2 }
  0x93   :  { %v42_v4 = vsub.f32 %v33_v0, %v41_v3 }
  0x95   :  { %v43_v5 = vmul.f32 %v42_v4, %v42_v4 }
  0x97   :  { %v44_v6 = vsel %vm36_vm0, %v43_v5, 0.0 }
  0x98   :  { %45 = vadd.xlane.f32.xlu0 %v44_v6 }
 0x125   :  { %v46_v12 = vpop.xlane.xlu0 %45 }
 0x126   :  { %v47_v13 = vmul.f32 0.03125, %v46_v12 }
 0x128   :  { %v48_v14 = vadd.f32 1e-12, %v47_v13  ;;  %v6575_v13 = vld [vmem:[%s9791_s3 + $0x2] ss:$0 sm:$0xff] }
 0x12a   :  { %8259 = vrsqrt.f32 %v48_v14 }
 0x134   :  { %v8260_v15 = vpop.eup %8259 }
 0x135   :  { %v50_v17 = vmul.f32 %v8260_v15, %v42_v4  ;;  %v6610_v15 = vld [vmem:[%s9791_s3 + $0x5] ss:$0 sm:$0xff] }
 0x137   :  { %v55_v19 = vmul.f32 %v6571_v16, %v50_v17  ;;  %v6645_v16 = vld [vmem:[%s9791_s3 + $0x8] ss:$0 sm:$0xff] }
 0x139   :  { %v8438_v20 = vadd.f32 %v6572_v18, %v55_v19 }
 0x13b   :  { %v8448_v23 = vpack.c.bf16 %v8438_v20, %v8438_v20 }
 0x13d   :  { %7390 = vmatmul.mubr.msk.bf16.vlgmr.msra.gmra.mrb[0].mxu1 %vm36_vm0, %v8448_v23  ;;  %7406 = vmatmul.mubr.msk.bf16.vlgmr.msra.gmra.mrb[0].mxu0 %vm36_vm0, %v8448_v23 }
 0x13e   :  { %7394 = vmatpush3.bf16.msra.mxu1 %v8143_v21  ;;  %7418 = vmatpush3.bf16.msra.mxu0 %v8144_v22 }
 0x13f   :  { %7395 = vmatprep.subr.bf16.mxu1 %v8353_v8  ;;  %7419 = vmatprep.subr.bf16.mxu0 %v8353_v8 }
 0x140   :  { %7397 = vmatprep.mubr.msk.bf16.mxu1 %vm8354_vm1, %v8353_v8  ;;  %7421 = vmatprep.mubr.msk.bf16.mxu0 %vm8354_vm1, %v8353_v8 }
 0x142   :  { %7396 = vmatpush3.bf16.msra.mxu1 %v8145_v24  ;;  %7420 = vmatpush3.bf16.msra.mxu0 %v8146_v25 }
 0x143   :  { %7409 = vmatprep.subr.bf16.mxu1 %v8353_v8  ;;  %7433 = vmatprep.subr.bf16.mxu0 %v8353_v8 }
 0x145   :  { %7398 = vmatmul.mubr.msk.bf16.vlgmr.msra.gmra.mrb[4].mxu1 %vm36_vm0, %v8448_v23  ;;  %7422 = vmatmul.mubr.msk.bf16.vlgmr.msra.gmra.mrb[4].mxu0 %vm36_vm0, %v8448_v23 }
 0x146   :  { %7410 = vmatpush3.bf16.msra.mxu1 %v8147_v26  ;;  %7434 = vmatpush3.bf16.msra.mxu0 %v8148_v27 }
 0x147   :  { %7411 = vmatprep.subr.bf16.mxu1 %v8353_v8  ;;  %7435 = vmatprep.subr.bf16.mxu0 %v8353_v8 }
 0x148   :  { %7413 = vmatprep.mubr.msk.bf16.mxu1 %vm8354_vm1, %v8353_v8  ;;  %7437 = vmatprep.mubr.msk.bf16.mxu0 %vm8354_vm1, %v8353_v8 }
 0x14a   :  { %7412 = vmatpush3.bf16.msra.mxu1 %v8149_v28  ;;  %7436 = vmatpush3.bf16.msra.mxu0 %v8150_v29 }
 0x14b   :  { %7425 = vmatprep.subr.bf16.mxu1 %v8353_v8  ;;  %7449 = vmatprep.subr.bf16.mxu0 %v8353_v8 }
 0x14d   :  { %7414 = vmatmul.mubr.msk.bf16.vlgmr.msra.gmra.mrb[8].mxu1 %vm36_vm0, %v8448_v23  ;;  %7438 = vmatmul.mubr.msk.bf16.vlgmr.msra.gmra.mrb[8].mxu0 %vm36_vm0, %v8448_v23 }
 0x14e   :  { %7426 = vmatpush3.bf16.msra.mxu1 %v8151_v30  ;;  %7450 = vmatpush3.bf16.msra.mxu0 %v8152_v31 }
 0x14f   :  { %7427 = vmatprep.subr.bf16.mxu1 %v8353_v8  ;;  %7451 = vmatprep.subr.bf16.mxu0 %v8353_v8 }
 0x150   :  { %7429 = vmatprep.mubr.msk.bf16.mxu1 %vm8354_vm1, %v8353_v8  ;;  %7453 = vmatprep.mubr.msk.bf16.mxu0 %vm8354_vm1, %v8353_v8 }
 0x152   :  { %7428 = vmatpush3.bf16.msra.mxu1 %v8153_v32  ;;  %7452 = vmatpush3.bf16.msra.mxu0 %v8154_v33  ;;  %v6574_v32 = vld [vmem:[%s9791_s3 + $0x1] ss:$0 sm:$0xff] }
 0x153   :  { %7441 = vmatprep.subr.bf16.mxu1 %v8353_v8  ;;  %7465 = vmatprep.subr.bf16.mxu0 %v8353_v8 }
 0x155   :  { %7430 = vmatmul.mubr.msk.bf16.vlgmr.msra.gmra.mrb[12].mxu1 %vm36_vm0, %v8448_v23  ;;  %7454 = vmatmul.mubr.msk.bf16.vlgmr.msra.gmra.mrb[12].mxu0 %vm36_vm0, %v8448_v23 }
 0x156   :  { %7442 = vmatpush3.bf16.msra.mxu1 %v8155_v34  ;;  %7466 = vmatpush3.bf16.msra.mxu0 %v8156_v35  ;;  %v6612_v35 = vld [vmem:[%s9791_s3 + $0x7] ss:$0 sm:$0xff] }
 0x157   :  { %7443 = vmatprep.subr.bf16.mxu1 %v8353_v8  ;;  %7467 = vmatprep.subr.bf16.mxu0 %v8353_v8 }
 0x158   :  { %7445 = vmatprep.mubr.msk.bf16.mxu1 %vm8354_vm1, %v8353_v8  ;;  %7469 = vmatprep.mubr.msk.bf16.mxu0 %vm8354_vm1, %v8353_v8 }
 0x15a   :  { %7444 = vmatpush3.bf16.msra.mxu1 %v8157_v36  ;;  %7468 = vmatpush3.bf16.msra.mxu0 %v8158_v37 }
 0x15b   :  { %7457 = vmatprep.subr.bf16.mxu1 %v8353_v8  ;;  %7481 = vmatprep.subr.bf16.mxu0 %v8353_v8 }
 0x15d   :  { %7446 = vmatmul.mubr.msk.bf16.vlgmr.msra.gmra.mrb[16].mxu1 %vm36_vm0, %v8448_v23  ;;  %7470 = vmatmul.mubr.msk.bf16.vlgmr.msra.gmra.mrb[16].mxu0 %vm36_vm0, %v8448_v23 }
 0x15e   :  { %7458 = vmatpush3.bf16.msra.mxu1 %v8159_v38  ;;  %7461 = vmatprep.mubr.msk.bf16.mxu1 %vm8354_vm1, %v8353_v8 }
 0x15f   :  { %7459 = vmatprep.subr.bf16.mxu1 %v8353_v8  ;;  %7483 = vmatprep.mubr.msk.bf16.mxu0 %vm8354_vm1, %v8353_v8 }
 0x162   :  { %7460 = vmatpush3.bf16.msra.mxu1 %v8160_v39 }
 0x163   :  { %7473 = vmatprep.subr.bf16.mxu1 %v8353_v8 }
 0x165   :  { %7462 = vmatmul.mubr.msk.bf16.vlgmr.msra.gmra.mrb[20].mxu1 %vm36_vm0, %v8448_v23 }
 0x166   :  { %7474 = vmatpush3.bf16.msra.mxu1 %v8161_v40  ;;  %7477 = vmatprep.mubr.msk.bf16.mxu1 %vm8354_vm1, %v8353_v8 }
 0x167   :  { %7475 = vmatprep.subr.bf16.mxu1 %v8353_v8 }
 0x16a   :  { %7476 = vmatpush3.bf16.msra.mxu1 %v8162_v41 }
 0x16b   :  { %7487 = vmatprep.subr.bf16.mxu1 %v8353_v8 }
 0x16d   :  { %7478 = vmatmul.mubr.msk.bf16.vlgmr.msra.gmra.mrb[24].mxu1 %vm36_vm0, %v8448_v23 }
 0x16e   :  { %7489 = vmatprep.mubr.msk.bf16.mxu1 %vm8354_vm1, %v8353_v8 }
 0x210   :  { %v156_v42 = vpop.f32.mrb[0].mxu1  ;;  %v260_v43 = vpop.f32.mrb[0].mxu0 }
 0x211   :  { %v7391_v44 = vpop.f32.mrb[1].mxu1  ;;  %v7407_v45 = vpop.f32.mrb[1].mxu0  ;;  %v157_v0 = vadd.f32 %v6573_v61, %v156_v42  ;;  %v261_v17 = vadd.f32 %v6575_v13, %v260_v43 }
 0x212   :  { %v159_v46 = vpop.f32.mrb[2].mxu1  ;;  %v263_v47 = vpop.f32.mrb[2].mxu0 }
 0x213   :  { %v7392_v48 = vpop.f32.mrb[3].mxu1  ;;  %v7408_v49 = vpop.f32.mrb[3].mxu0  ;;  %v826_v9 = vpack.c.bf16 %v157_v0, %v157_v0  ;;  %v828_v27 = vpack.c.bf16 %v261_v17, %v261_v17 }
 0x214   :  { %v6576_v48 = vld [vmem:[%s9791_s3 + $0x3] ss:$0 sm:$0xff] }
 0x218   :  { %v208_v51 = vpop.f32.mrb[4].mxu1  ;;  %v410_v52 = vpop.f32.mrb[4].mxu0 }
 0x219   :  { %v411_v53 = vadd.f32 %v6609_v50, %v410_v52  ;;  %v7399_v54 = vpop.f32.mrb[5].mxu1  ;;  %v7423_v55 = vpop.f32.mrb[5].mxu0  ;;  %v209_v36 = vadd.f32 %v6574_v32, %v208_v51  ;;  %v6646_v50 = vld [vmem:[%s9791_s3 + $0x9] ss:$0 sm:$0xff] }
 0x21a   :  { %v211_v56 = vpop.f32.mrb[6].mxu1  ;;  %v413_v57 = vpop.f32.mrb[6].mxu0 }
 0x21b   :  { %v830_v58 = vpack.c.bf16 %v411_v53, %v411_v53  ;;  %v7400_v59 = vpop.f32.mrb[7].mxu1  ;;  %v7424_v60 = vpop.f32.mrb[7].mxu0  ;;  %v827_v44 = vpack.c.bf16 %v209_v36, %v209_v36 }
 0x21d   :  { %v839_v62 = vsel %vm834_vm2, %v830_v58, 0 }
 0x21e   :  { %7482 = vmatpush3.bf16.xpose.msra.mxu0 %v839_v62 }
 0x21f   :  { %7493 = vmatprep.subr.bf16.mxu0 %v8353_v8 }
 0x220   :  { %v312_v1 = vpop.f32.mrb[8].mxu1  ;;  %v514_v2 = vpop.f32.mrb[8].mxu0 }
 0x221   :  { %v515_v3 = vadd.f32 %v6611_v63, %v514_v2  ;;  %v7415_v4 = vpop.f32.mrb[9].mxu1  ;;  %v7439_v5 = vpop.f32.mrb[9].mxu0  ;;  %v313_v51 = vadd.f32 %v6576_v48, %v312_v1  ;;  %v6665_v1 = vld [vmem:[%s9792_s1] ss:$0 sm:$0xff] }
 0x222   :  { %v315_v6 = vpop.f32.mrb[10].mxu1  ;;  %v517_v7 = vpop.f32.mrb[10].mxu0 }
 0x223   :  { %v832_v10 = vpack.c.bf16 %v515_v3, %v515_v3  ;;  %v7416_v11 = vpop.f32.mrb[11].mxu1  ;;  %v7440_v12 = vpop.f32.mrb[11].mxu0  ;;  %v829_v56 = vpack.c.bf16 %v313_v51, %v313_v51 }
 0x225   :  { %v931_v14 = vsel %vm834_vm2, %v832_v10, 0  ;;  %7484 = vmatmul.mubr.msk.bf16.vlgmr.msra.gmra.mrb[20].mxu0 %vm834_vm2, %v826_v9 }
 0x226   :  { %7494 = vmatpush3.bf16.xpose.msra.mxu0 %v931_v14  ;;  %7495 = vmatprep.mubr.msk.bf16.mxu0 %vm8354_vm1, %v8353_v8 }
 0x227   :  { %7505 = vmatprep.subr.bf16.mxu0 %v8353_v8 }
 0x228   :  { %v462_v18 = vpop.f32.mrb[12].mxu1  ;;  %v664_v19 = vpop.f32.mrb[12].mxu0 }
 0x229   :  { %v463_v21 = vadd.f32 %v6610_v15, %v462_v18  ;;  %v665_v22 = vadd.f32 %v6645_v16, %v664_v19  ;;  %v7431_v23 = vpop.f32.mrb[13].mxu1  ;;  %v7455_v24 = vpop.f32.mrb[13].mxu0 }
 0x22a   :  { %v465_v25 = vpop.f32.mrb[14].mxu1  ;;  %v667_v26 = vpop.f32.mrb[14].mxu0 }
 0x22b   :  { %v831_v28 = vpack.c.bf16 %v463_v21, %v463_v21  ;;  %v1081_v29 = vpack.c.bf16 %v665_v22, %v665_v22  ;;  %v7432_v30 = vpop.f32.mrb[15].mxu1  ;;  %v7456_v31 = vpop.f32.mrb[15].mxu0 }
 0x22d   :  { %v885_v33 = vsel %vm834_vm2, %v831_v28, 0  ;;  %v1090_v34 = vsel %vm1088_vm3, %v1081_v29, 0  ;;  %7496 = vmatmul.mubr.msk.bf16.vlgmr.msra.gmra.mrb[24].mxu0 %vm834_vm2, %v828_v27 }
 0x22e   :  { %7488 = vmatpush3.bf16.xpose.msra.mxu1 %v885_v33  ;;  %7506 = vmatpush3.bf16.msra.mxu0 %v1090_v34 }
 0x22f   :  { %7499 = vmatprep.subr.bf16.mxu1 %v8353_v8  ;;  %7507 = vmatprep.mubr.msk.bf16.mxu0 %vm8354_vm1, %v8353_v8 }
 0x230   :  { %v566_v37 = vpop.f32.mrb[16].mxu1  ;;  %v8609_v38 = vpop.f32.mrb[16].mxu0  ;;  %7517 = vmatprep.subr.bf16.mxu0 %v8353_v8 }
 0x231   :  { %v567_v39 = vadd.f32 %v6612_v35, %v566_v37  ;;  %v7447_v40 = vpop.f32.mrb[17].mxu1  ;;  %v7471_v41 = vpop.f32.mrb[17].mxu0 }
 0x232   :  { %v569_v42 = vpop.f32.mrb[18].mxu1  ;;  %v771_v43 = vpop.f32.mrb[18].mxu0 }
 0x233   :  { %v833_v45 = vpack.c.bf16 %v567_v39, %v567_v39  ;;  %v7448_v46 = vpop.f32.mrb[19].mxu1  ;;  %v7472_v47 = vpop.f32.mrb[19].mxu0 }
 0x235   :  { %v977_v49 = vsel %vm834_vm2, %v833_v45, 0  ;;  %7490 = vmatmul.mubr.msk.bf16.vlgmr.msra.gmra.mrb[28].mxu1 %vm834_vm2, %v827_v44 }
 0x236   :  { %7500 = vmatpush3.bf16.xpose.msra.mxu1 %v977_v49  ;;  %7501 = vmatprep.mubr.msk.bf16.mxu1 %vm8354_vm1, %v8353_v8 }
 0x237   :  { %7511 = vmatprep.subr.bf16.mxu1 %v8353_v8 }
 0x238   :  { %v716_v52 = vpop.f32.mrb[20].mxu1 }
 0x239   :  { %v717_v53 = vadd.f32 %v6646_v50, %v716_v52  ;;  %v7463_v54 = vpop.f32.mrb[21].mxu1 }
 0x23a   :  { %v719_v55 = vpop.f32.mrb[22].mxu1 }
 0x23b   :  { %v1082_v57 = vpack.c.bf16 %v717_v53, %v717_v53  ;;  %v7464_v58 = vpop.f32.mrb[23].mxu1  ;;  %v6647_v53 = vld [vmem:[%s9791_s3 + $0xa] ss:$0 sm:$0xff] }
 0x23c   :  { %v769_v54 = vadd.f32 %v6647_v53, %v8609_v38 }
 0x23d   :  { %v1136_v59 = vsel %vm1088_vm3, %v1082_v57, 0  ;;  %7502 = vmatmul.mubr.msk.bf16.vlgmr.msra.gmra.mrb[32].mxu1 %vm834_vm2, %v829_v56 }
 0x23e   :  { %7512 = vmatpush3.bf16.msra.mxu1 %v1136_v59  ;;  %7513 = vmatprep.mubr.msk.bf16.mxu1 %vm8354_vm1, %v8353_v8  ;;  %v1083_v57 = vpack.c.bf16 %v769_v54, %v769_v54 }
 0x23f   :  { %7523 = vmatprep.subr.bf16.mxu1 %v8353_v8 }
 0x240   :  { %v8628_v60 = vpop.f32.mrb[24].mxu1 }
 0x241   :  { %v7479_v61 = vpop.f32.mrb[25].mxu1 }
 0x242   :  { %v823_v62 = vpop.f32.mrb[26].mxu1  ;;  %v1182_v61 = vsel %vm1088_vm3, %v1083_v57, 0 }
 0x243   :  { %v7480_v63 = vpop.f32.mrb[27].mxu1 }
 0x2f8   :  { %v875_v0 = vpop.f32.mrb[20].mxu0 }
 0x2f9   :  { %v1019_v2 = vmul.f32 0.35355338, %v875_v0  ;;  %v7485_v3 = vpop.f32.mrb[21].mxu0  ;;  %v6648_v0 = vld [vmem:[%s9791_s3 + $0xb] ss:$0 sm:$0xff] }
 0x2fa   :  { %v878_v4 = vpop.f32.mrb[22].mxu0 }
 0x2fb   :  { %v7486_v5 = vpop.f32.mrb[23].mxu0  ;;  %v1029_v6 = vadd.f32 %v6665_v1, %v1019_v2  ;;  %v821_v2 = vadd.f32 %v6648_v0, %v8628_v60 }
 0x2fd   :  { %v1033_v7 = vsel %vm834_vm2, %v1029_v6, -inf  ;;  %v1084_v5 = vpack.c.bf16 %v821_v2, %v821_v2 }
 0x2fe   :  { %1034 = vmax.xlane.f32.xlu1 %v1033_v7 }
 0x300   :  { %v967_v9 = vpop.f32.mrb[24].mxu0 }
 0x301   :  { %v1021_v10 = vmul.f32 0.35355338, %v967_v9  ;;  %v7497_v11 = vpop.f32.mrb[25].mxu0  ;;  %v1228_v9 = vsel %vm1088_vm3, %v1084_v5, 0 }
 0x302   :  { %v970_v12 = vpop.f32.mrb[26].mxu0 }
 0x303   :  { %v7498_v13 = vpop.f32.mrb[27].mxu0  ;;  %v1031_v14 = vadd.f32 %v6665_v1, %v1021_v10  ;;  %v1274_v12 = vld [vmem:[%s9793_s6] sm:$0xf] }
 0x304   :  { %v1282_v13 = vsel %vm1088_vm3, %v1274_v12, 0 }
 0x305   :  { %v1039_v15 = vsel %vm834_vm2, %v1031_v14, -inf }
 0x306   :  { %1040 = vmax.xlane.f32.xlu0 %v1039_v15 }
 0x308   :  { %v921_v16 = vpop.f32.mrb[28].mxu1 }
 0x309   :  { %v1020_v17 = vmul.f32 0.35355338, %v921_v16  ;;  %v7491_v18 = vpop.f32.mrb[29].mxu1  ;;  %v1276_v16 = vld [vmem:[%s9793_s6 + $0x8] sm:$0xf] }
 0x30a   :  { %v924_v19 = vpop.f32.mrb[30].mxu1 }
 0x30b   :  { %v7492_v21 = vpop.f32.mrb[31].mxu1  ;;  %v1030_v22 = vadd.f32 %v6665_v1, %v1020_v17 }
 0x30c   :  { %v1374_v21 = vsel %vm1088_vm3, %v1276_v16, 0 }
 0x30d   :  { %v1036_v23 = vsel %vm834_vm2, %v1030_v22, -inf }
 0x30e   :  { %1037 = vmax.xlane.f32.xlu1 %v1036_v23 }
 0x310   :  { %v1013_v24 = vpop.f32.mrb[32].mxu1 }
 0x311   :  { %v1022_v25 = vmul.f32 0.35355338, %v1013_v24  ;;  %v7503_v26 = vpop.f32.mrb[33].mxu1 }
 0x312   :  { %v1016_v27 = vpop.f32.mrb[34].mxu1 }
 0x313   :  { %v7504_v28 = vpop.f32.mrb[35].mxu1  ;;  %v1032_v29 = vadd.f32 %v6665_v1, %v1022_v25 }
 0x315   :  { %v1042_v30 = vsel %vm834_vm2, %v1032_v29, -inf }
 0x316   :  { %1043 = vmax.xlane.f32.xlu1 %v1042_v30 }
 0x38b   :  { %v1035_v31 = vpop.xlane.xlu1 %1034 }
 0x38c   :  { %v1045_v32 = vsub.f32 %v1029_v6, %v1035_v31 }
 0x38e   :  { %v1049_v33 = vmul.f32 1.442695, %v1045_v32 }
 0x390   :  { %8261 = vpow2.f32 %v1049_v33 }
 0x393   :  { %v1041_v34 = vpop.xlane.xlu0 %1040 }
 0x394   :  { %v1047_v35 = vsub.f32 %v1031_v14, %v1041_v34  ;;  %v1275_v14 = vld [vmem:[%s9793_s6 + $0x4] sm:$0xf] }
 0x395   :  { %v1328_v15 = vsel %vm1088_vm3, %v1275_v14, 0 }
 0x396   :  { %v1053_v36 = vmul.f32 1.442695, %v1047_v35 }
 0x398   :  { %8263 = vpow2.f32 %v1053_v36 }
 0x39a   :  { %v8262_v37 = vpop.eup %8261 }
 0x39b   :  { %v1038_v39 = vpop.xlane.xlu1 %1037  ;;  %v1057_v40 = vsel %vm834_vm2, %v8262_v37, 0.0 }
 0x39c   :  { %v1046_v41 = vsub.f32 %v1030_v22, %v1038_v39  ;;  %1058 = vadd.xlane.f32.xlu0 %v1057_v40 }
 0x39e   :  { %v1051_v42 = vmul.f32 1.442695, %v1046_v41 }
 0x3a0   :  { %8265 = vpow2.f32 %v1051_v42 }
 0x3a2   :  { %v8264_v43 = vpop.eup %8263 }
 0x3a3   :  { %v1044_v44 = vpop.xlane.xlu1 %1043  ;;  %v1063_v45 = vsel %vm834_vm2, %v8264_v43, 0.0 }
 0x3a4   :  { %v1048_v46 = vsub.f32 %v1032_v29, %v1044_v44  ;;  %1064 = vadd.xlane.f32.xlu0 %v1063_v45  ;;  %v1277_v29 = vld [vmem:[%s9793_s6 + $0xc] sm:$0xf] }
 0x3a5   :  { %v1420_v33 = vsel %vm1088_vm3, %v1277_v29, 0 }
 0x3a6   :  { %v1055_v47 = vmul.f32 1.442695, %v1048_v46 }
 0x3a8   :  { %8267 = vpow2.f32 %v1055_v47 }
 0x3aa   :  { %v8266_v48 = vpop.eup %8265 }
 0x3ab   :  { %v1060_v49 = vsel %vm834_vm2, %v8266_v48, 0.0 }
 0x3ac   :  { %1061 = vadd.xlane.f32.xlu1 %v1060_v49 }
 0x3b2   :  { %v8268_v50 = vpop.eup %8267 }
 0x3b3   :  { %v1066_v51 = vsel %vm834_vm2, %v8268_v50, 0.0 }
 0x3b4   :  { %1067 = vadd.xlane.f32.xlu1 %v1066_v51 }
 0x429   :  { %v1059_v52 = vpop.xlane.xlu0 %1058 }
 0x42a   :  { %8269 = vrcp.f32 %v1059_v52 }
 0x431   :  { %v1065_v55 = vpop.xlane.xlu0 %1064 }
 0x432   :  { %8271 = vrcp.f32 %v1065_v55 }
 0x434   :  { %v8270_v56 = vpop.eup %8269 }
 0x435   :  { %v1073_v58 = vmul.f32 %v8270_v56, %v8262_v37 }
 0x437   :  { %v1077_v59 = vpack.c.bf16 %v1073_v58, %v1073_v58 }
 0x439   :  { %7508 = vmatmul.mubr.msk.bf16.vlgmr.msra.gmra.mrb[28].mxu0 %vm834_vm2, %v1077_v59  ;;  %v1062_v62 = vpop.xlane.xlu1 %1061 }
 0x43a   :  { %7518 = vmatpush3.bf16.msra.mxu0 %v1182_v61  ;;  %8273 = vrcp.f32 %v1062_v62  ;;  %7519 = vmatprep.mubr.msk.bf16.mxu0 %vm8354_vm1, %v8353_v8  ;;  %v6674_v62 = vld [vmem:[%s9790_s2 + $0x2] ss:$0 sm:$0xff] }
 0x43b   :  { %7529 = vmatprep.subr.bf16.mxu0 %v8353_v8 }
 0x43c   :  { %v8272_v63 = vpop.eup %8271 }
 0x43d   :  { %v1075_v38 = vmul.f32 %v8272_v63, %v8264_v43 }
 0x43f   :  { %v1079_v1 = vpack.c.bf16 %v1075_v38, %v1075_v38 }
 0x441   :  { %7520 = vmatmul.mubr.msk.bf16.vlgmr.msra.gmra.mrb[32].mxu0 %vm834_vm2, %v1079_v1  ;;  %v1068_v3 = vpop.xlane.xlu1 %1067 }
 0x442   :  { %8275 = vrcp.f32 %v1068_v3  ;;  %7531 = vmatprep.mubr.msk.bf16.mxu0 %vm8354_vm1, %v8353_v8  ;;  %7530 = vmatpush3.bf16.msra.mxu0 %v1282_v13 }
 0x443   :  { %7541 = vmatprep.subr.bf16.mxu0 %v8353_v8 }
 0x444   :  { %v8274_v4 = vpop.eup %8273 }
 0x445   :  { %v1074_v6 = vmul.f32 %v8274_v4, %v8266_v48 }
 0x447   :  { %v1078_v7 = vpack.c.bf16 %v1074_v6, %v1074_v6 }
 0x449   :  { %7514 = vmatmul.mubr.msk.bf16.vlgmr.msra.gmra.mrb[36].mxu1 %vm834_vm2, %v1078_v7 }
 0x44a   :  { %7524 = vmatpush3.bf16.msra.mxu1 %v1228_v9  ;;  %7525 = vmatprep.mubr.msk.bf16.mxu1 %vm8354_vm1, %v8353_v8 }
 0x44b   :  { %7535 = vmatprep.subr.bf16.mxu1 %v8353_v8 }
 0x44c   :  { %v8276_v60 = vpop.eup %8275 }
 0x44d   :  { %v1076_v10 = vmul.f32 %v8276_v60, %v8268_v50 }
 0x44f   :  { %v1080_v11 = vpack.c.bf16 %v1076_v10, %v1076_v10  ;;  %v8163_v10 = vld [vmem:[%s9794_s7] sm:$0xff]  }
 0x451   :  { %7526 = vmatmul.mubr.msk.bf16.vlgmr.msra.gmra.mrb[40].mxu1 %vm834_vm2, %v1080_v11  ;;  %v8164_v11 = vld [vmem:[%s9794_s7 + $0x8] sm:$0xff]  }
 0x452   :  { %7537 = vmatprep.mubr.msk.bf16.mxu1 %vm8354_vm1, %v8353_v8  ;;  %7536 = vmatpush3.bf16.msra.mxu1 %v1328_v15  ;;  %v6675_v15 = vld [vmem:[%s9790_s2 + $0x3] ss:$0 sm:$0xff] }
 0x453   :  { %7547 = vmatprep.subr.bf16.mxu1 %v8353_v8 }
 0x50c   :  { %v1126_v17 = vpop.f32.mrb[28].mxu0 }
 0x50d   :  { %v1270_v18 = vpack.c.bf16 %v1126_v17, %v1126_v17  ;;  %v7509_v19 = vpop.f32.mrb[29].mxu0  ;;  %v6676_v17 = vld [vmem:[%s9790_s2 + $0x4] ss:$0 sm:$0xff] }
 0x50e   :  { %v1129_v22 = vpop.f32.mrb[30].mxu0 }
 0x50f   :  { %v7510_v23 = vpop.f32.mrb[31].mxu0  ;;  %7532 = vmatmul.mubr.msk.bf16.vlgmr.msra.gmra.mrb[36].mxu0 %vm834_vm2, %v1270_v18  ;;  %v8165_v22 = vld [vmem:[%s9795_s8] sm:$0xff]  }
 0x510   :  { %7542 = vmatpush3.bf16.msra.mxu0 %v1374_v21  ;;  %7543 = vmatprep.mubr.msk.bf16.mxu0 %vm8354_vm1, %v8353_v8  ;;  %v8166_v23 = vld [vmem:[%s9795_s8 + $0x8] sm:$0xff]  }
 0x511   :  { %7553 = vmatprep.subr.bf16.mxu0 %v8353_v8 }
 0x514   :  { %v1218_v24 = vpop.f32.mrb[32].mxu0 }
 0x515   :  { %v1272_v25 = vpack.c.bf16 %v1218_v24, %v1218_v24  ;;  %v7521_v26 = vpop.f32.mrb[33].mxu0  ;;  %v8167_v24 = vld [vmem:[%s9795_s8 + $0x10] sm:$0xff]  }
 0x516   :  { %v1221_v27 = vpop.f32.mrb[34].mxu0  ;;  %v6677_v26 = vld [vmem:[%s9796_s4] ss:$0 sm:$0xff] }
 0x517   :  { %v7522_v28 = vpop.f32.mrb[35].mxu0  ;;  %7544 = vmatmul.mubr.msk.bf16.vlgmr.msra.gmra.mrb[40].mxu0 %vm834_vm2, %v1272_v25  ;;  %v8168_v25 = vld [vmem:[%s9795_s8 + $0x18] sm:$0xff]  }
 0x518   :  { %7557 = vmatprep.mubr.msk.bf16.mxu0 %vm8354_vm1, %v8353_v8  ;;  %7554 = vmatpush3.bf16.msra.mxu0 %v8163_v10  ;;  %v8177_v10 = vld [vmem:[%s9789_s5 + $0xf0] sm:$0xff]  }
 0x519   :  { %7555 = vmatprep.subr.bf16.mxu0 %v8353_v8 }
 0x51c   :  { %v1172_v30 = vpop.f32.mrb[36].mxu1  ;;  %7556 = vmatpush3.bf16.msra.mxu0 %v8164_v11  ;;  %v8178_v11 = vld [vmem:[%s9789_s5 + $0x120] sm:$0xff]  }
 0x51d   :  { %v1271_v31 = vpack.c.bf16 %v1172_v30, %v1172_v30  ;;  %v7515_v32 = vpop.f32.mrb[37].mxu1  ;;  %7573 = vmatprep.subr.bf16.mxu0 %v8353_v8 }
 0x51e   :  { %v1175_v34 = vpop.f32.mrb[38].mxu1 }
 0x51f   :  { %v7516_v35 = vpop.f32.mrb[39].mxu1  ;;  %7538 = vmatmul.mubr.msk.bf16.vlgmr.msra.gmra.mrb[44].mxu1 %vm834_vm2, %v1271_v31 }
 0x520   :  { %7548 = vmatpush3.bf16.msra.mxu1 %v1420_v33  ;;  %7549 = vmatprep.mubr.msk.bf16.mxu1 %vm8354_vm1, %v8353_v8 }
 0x521   :  { %7561 = vmatprep.subr.bf16.mxu1 %v8353_v8 }
 0x524   :  { %v1264_v36 = vpop.f32.mrb[40].mxu1 }
 0x525   :  { %v1273_v37 = vpack.c.bf16 %v1264_v36, %v1264_v36  ;;  %v7527_v39 = vpop.f32.mrb[41].mxu1 }
 0x526   :  { %v1267_v40 = vpop.f32.mrb[42].mxu1 }
 0x527   :  { %v7528_v41 = vpop.f32.mrb[43].mxu1  ;;  %7550 = vmatmul.mubr.msk.bf16.vlgmr.msra.gmra.mrb[48].mxu1 %vm834_vm2, %v1273_v37 }
 0x528   :  { %7569 = vmatprep.mubr.msk.bf16.mxu1 %vm8354_vm1, %v8353_v8  ;;  %7562 = vmatpush3.bf16.msra.mxu1 %v8165_v22  ;;  %v8189_v22 = vld [vmem:[%s9789_s5 + $0x150] sm:$0xff]  }
 0x529   :  { %7563 = vmatprep.subr.bf16.mxu1 %v8353_v8 }
 0x52c   :  { %7564 = vmatpush3.bf16.msra.mxu1 %v8166_v23  ;;  %v8190_v23 = vld [vmem:[%s9789_s5 + $0x158] sm:$0xff]  }
 0x52d   :  { %7565 = vmatprep.subr.bf16.mxu1 %v8353_v8 }
 0x530   :  { %7566 = vmatpush3.bf16.msra.mxu1 %v8167_v24  ;;  %v8191_v24 = vld [vmem:[%s9789_s5 + $0x170] sm:$0xff]  }
 0x531   :  { %7567 = vmatprep.subr.bf16.mxu1 %v8353_v8 }
 0x534   :  { %7568 = vmatpush3.bf16.msra.mxu1 %v8168_v25  ;;  %v8192_v25 = vld [vmem:[%s9789_s5 + $0x178] sm:$0xff]  }
 0x535   :  { %7589 = vmatprep.subr.bf16.mxu1 %v8353_v8 }
 0x5e2   :  { %v1318_v42 = vpop.f32.mrb[36].mxu0 }
 0x5e3   :  { %v7533_v43 = vpop.f32.mrb[37].mxu0  ;;  %v1462_v51 = vsel %vm36_vm0, %v1318_v42, 0.0 }
 0x5e4   :  { %v1321_v44 = vpop.f32.mrb[38].mxu0  ;;  %v6681_v43 = vld [vmem:[%s9790_s2 + $0x5] ss:$0 sm:$0xff] }
 0x5e5   :  { %v7534_v45 = vpop.f32.mrb[39].mxu0 }
 0x5ea   :  { %v1410_v46 = vpop.f32.mrb[40].mxu0 }
 0x5eb   :  { %v7545_v47 = vpop.f32.mrb[41].mxu0  ;;  %v1465_v56 = vsel %vm36_vm0, %v1410_v46, 0.0 }
 0x5ec   :  { %v1413_v48 = vpop.f32.mrb[42].mxu0 }
 0x5ed   :  { %v7546_v49 = vpop.f32.mrb[43].mxu0 }
 0x5f2   :  { %v1364_v50 = vpop.f32.mrb[44].mxu1 }
 0x5f3   :  { %v1463_v52 = vsel %vm36_vm0, %v1364_v50, 0.0  ;;  %v7539_v53 = vpop.f32.mrb[45].mxu1 }
 0x5f4   :  { %v1464_v54 = vadd.f32 %v1463_v52, %v1462_v51  ;;  %v1367_v55 = vpop.f32.mrb[46].mxu1 }
 0x5f5   :  { %v7540_v57 = vpop.f32.mrb[47].mxu1 }
 0x5f6   :  { %v1466_v58 = vadd.f32 %v1465_v56, %v1464_v54  ;;  %v8169_v56 = vld [vmem:[%s9789_s5 + $0xc0] sm:$0xff]  }
 0x5f7   :  { %v8170_v57 = vld [vmem:[%s9789_s5 + $0xe0] sm:$0xff]  }
 0x5fa   :  { %v1456_v59 = vpop.f32.mrb[48].mxu1 }
 0x5fb   :  { %v1467_v61 = vsel %vm36_vm0, %v1456_v59, 0.0  ;;  %v7551_v63 = vpop.f32.mrb[49].mxu1  ;;  %v8172_v59 = vld [vmem:[%s9789_s5 + $0xe8] sm:$0xff]  }
 0x5fc   :  { %v1468_v38 = vadd.f32 %v1467_v61, %v1466_v58  ;;  %v1459_v0 = vpop.f32.mrb[50].mxu1  ;;  %v8171_v58 = vld [vmem:[%s9789_s5 + $0xc8] sm:$0xff]  }
 0x5fd   :  { %v7552_v1 = vpop.f32.mrb[51].mxu1  ;;  %v6687_v0 = vld [vmem:[%s9790_s2 + $0x6] ss:$0 sm:$0xff] }
 0x5fe   :  { %v1474_v2 = vadd.f32 %v6674_v62, %v1468_v38 }
 0x600   :  { %v1475_v3 = vadd.f32 %v1474_v2, %v8438_v20  ;;  %v6688_v2 = vld [vmem:[%s9790_s2 + $0x7] ss:$0 sm:$0xff] }
 0x602   :  { %v1478_v4 = vsel %vm36_vm0, %v1475_v3, 0.0 }
 0x603   :  { %1479 = vadd.xlane.f32.xlu0 %v1478_v4 }
 0x690   :  { %v1480_v5 = vpop.xlane.xlu0 %1479 }
 0x691   :  { %v1481_v6 = vmul.f32 0.03125, %v1480_v5  ;;  %v8173_v5 = vld [vmem:[%s9789_s5 + $0xd0] sm:$0xff]  }
 0x693   :  { %v1482_v7 = vsub.f32 %v1475_v3, %v1481_v6  ;;  %v8174_v6 = vld [vmem:[%s9789_s5 + $0x100] sm:$0xff]  }
 0x695   :  { %v1483_v9 = vmul.f32 %v1482_v7, %v1482_v7 }
 0x697   :  { %v1484_v60 = vsel %vm36_vm0, %v1483_v9, 0.0  ;;  %v8175_v9 = vld [vmem:[%s9789_s5 + $0xd8] sm:$0xff]  }
 0x698   :  { %1485 = vadd.xlane.f32.xlu1 %v1484_v60  ;;  %v8176_v60 = vld [vmem:[%s9789_s5 + $0x108] sm:$0xff]  }
 0x725   :  { %v1486_v20 = vpop.xlane.xlu1 %1485 }
 0x726   :  { %v1487_v12 = vmul.f32 0.03125, %v1486_v20  ;;  %v8179_v20 = vld [vmem:[%s9789_s5 + $0xf8] sm:$0xff]  }
 0x728   :  { %v1488_v13 = vadd.f32 1e-12, %v1487_v12  ;;  %v8180_v12 = vld [vmem:[%s9789_s5 + $0x128] sm:$0xff]  }
 0x72a   :  { %8277 = vrsqrt.f32 %v1488_v13  ;;  %v8181_v13 = vld [vmem:[%s9789_s5 + $0x110] sm:$0xff]  }
 0x734   :  { %v8278_v14 = vpop.eup %8277 }
 0x735   :  { %v1490_v16 = vmul.f32 %v8278_v14, %v1482_v7  ;;  %v8182_v14 = vld [vmem:[%s9789_s5 + $0x140] sm:$0xff]  }
 0x737   :  { %v1495_v18 = vmul.f32 %v6675_v15, %v1490_v16  ;;  %v8183_v15 = vld [vmem:[%s9789_s5 + $0x118] sm:$0xff]   ;;  %v8184_v16 = vld [vmem:[%s9789_s5 + $0x148] sm:$0xff]  }
 0x739   :  { %v1500_v19 = vadd.f32 %v6676_v17, %v1495_v18  ;;  %v8185_v17 = vld [vmem:[%s9789_s5 + $0x130] sm:$0xff]   ;;  %v8186_v18 = vld [vmem:[%s9789_s5 + $0x160] sm:$0xff]  }
 0x73b   :  { %v1501_v21 = vpack.c.bf16 %v1500_v19, %v1500_v19 }
 0x73d   :  { %7558 = vmatmul.mubr.msk.bf16.vlgmr.msra.gmra.mrb[44].mxu0 %vm36_vm0, %v1501_v21  ;;  %v8188_v21 = vld [vmem:[%s9789_s5 + $0x168] sm:$0xff]  }
 0x73e   :  { %7577 = vmatprep.mubr.msk.bf16.mxu0 %vm8354_vm1, %v8353_v8  ;;  %7574 = vmatpush3.bf16.msra.mxu0 %v8169_v56 }
 0x73f   :  { %7575 = vmatprep.subr.bf16.mxu0 %v8353_v8 }
 0x742   :  { %7576 = vmatpush3.bf16.msra.mxu0 %v8171_v58 }
 0x743   :  { %7581 = vmatprep.subr.bf16.mxu0 %v8353_v8 }
 0x810   :  { %v1562_v27 = vpop.f32.mrb[44].mxu0 }
 0x811   :  { %v1563_v28 = vadd.f32 %v6677_v26, %v1562_v27  ;;  %v7559_v29 = vpop.f32.mrb[45].mxu0 }
 0x812   :  { %v1565_v30 = vpop.f32.mrb[46].mxu0 }
 0x813   :  { %v1569_v31 = vmul.f32 0.044715, %v1563_v28  ;;  %v7560_v32 = vpop.f32.mrb[47].mxu0  ;;  %v1568_v39 = vmul.f32 0.5, %v1563_v28 }
 0x815   :  { %v1570_v33 = vmul.f32 %v1569_v31, %v1563_v28 }
 0x817   :  { %v1571_v34 = vmul.f32 %v1570_v33, %v1563_v28 }
 0x819   :  { %v1572_v35 = vadd.f32 %v1571_v34, %v1563_v28  ;;  %v6745_v34 = vld [vmem:[%s9791_s3 + $0x10] ss:$0 sm:$0xff] }
 0x81b   :  { %v1573_v36 = vmul.f32 0.7978846, %v1572_v35 }
 0x81d   :  { %8279 = vtanh.f32 %v1573_v36 }
 0x827   :  { %v8280_v37 = vpop.eup %8279 }
 0x828   :  { %v1575_v40 = vadd.f32 1.0, %v8280_v37 }
 0x82a   :  { %v1576_v41 = vmul.f32 %v1575_v40, %v1568_v39 }
 0x82c   :  { %v1577_v42 = vpack.c.bf16 %v1576_v41, %v1576_v41 }
 0x82e   :  { %7570 = vmatmul.mubr.msk.bf16.vlgmr.msra.gmra.mrb[52].mxu1 %vm1615_vm4, %v1577_v42 }
 0x82f   :  { %7593 = vmatprep.mubr.msk.bf16.mxu1 %vm8354_vm1, %v8353_v8  ;;  %7590 = vmatpush3.bf16.msra.mxu1 %v8170_v57 }
 0x830   :  { %7591 = vmatprep.subr.bf16.mxu1 %v8353_v8 }
 0x833   :  { %7592 = vmatpush3.bf16.msra.mxu1 %v8172_v59 }
 0x834   :  { %7605 = vmatprep.subr.bf16.mxu1 %v8353_v8 }
 0x901   :  { %v1653_v44 = vpop.f32.mrb[52].mxu1 }
 0x902   :  { %v1654_v45 = vadd.f32 %v6681_v43, %v1653_v44  ;;  %v7571_v46 = vpop.f32.mrb[53].mxu1 }
 0x903   :  { %v1656_v47 = vpop.f32.mrb[54].mxu1  ;;  %v6709_v46 = vld [vmem:[%s9791_s3 + $0xc] ss:$0 sm:$0xff] }
 0x904   :  { %v7572_v48 = vpop.f32.mrb[55].mxu1  ;;  %v1659_v49 = vadd.f32 %v1654_v45, %v1500_v19  ;;  %v8187_v19 = vld [vmem:[%s9789_s5 + $0x138] sm:$0xff]  }
 0x905   :  { %v6747_v48 = vld [vmem:[%s9791_s3 + $0x12] ss:$0 sm:$0xff] }
 0x906   :  { %v1662_v50 = vsel %vm36_vm0, %v1659_v49, 0.0 }
 0x907   :  { %1663 = vadd.xlane.f32.xlu0 %v1662_v50 }
 0x994   :  { %v1664_v51 = vpop.xlane.xlu0 %1663 }
 0x995   :  { %v1665_v52 = vmul.f32 0.03125, %v1664_v51 }
 0x997   :  { %v1666_v53 = vsub.f32 %v1659_v49, %v1665_v52 }
 0x999   :  { %v1667_v54 = vmul.f32 %v1666_v53, %v1666_v53 }
 0x99b   :  { %v1668_v55 = vsel %vm36_vm0, %v1667_v54, 0.0 }
 0x99c   :  { %1669 = vadd.xlane.f32.xlu1 %v1668_v55 }
 0xa29   :  { %v1670_v61 = vpop.xlane.xlu1 %1669 }
 0xa2a   :  { %v1671_v62 = vmul.f32 0.03125, %v1670_v61 }
 0xa2c   :  { %v1672_v63 = vadd.f32 1e-12, %v1671_v62  ;;  %v6711_v62 = vld [vmem:[%s9791_s3 + $0xe] ss:$0 sm:$0xff] }
 0xa2e   :  { %8281 = vrsqrt.f32 %v1672_v63 }
 0xa38   :  { %v8282_v38 = vpop.eup %8281 }
 0xa39   :  { %v1674_v1 = vmul.f32 %v8282_v38, %v1666_v53  ;;  %v6746_v38 = vld [vmem:[%s9791_s3 + $0x11] ss:$0 sm:$0xff] }
 0xa3b   :  { %v1679_v3 = vmul.f32 %v6687_v0, %v1674_v1  ;;  %v6781_v0 = vld [vmem:[%s9791_s3 + $0x14] ss:$0 sm:$0xff] }
 0xa3d   :  { %v8773_v4 = vadd.f32 %v6688_v2, %v1679_v3 }
 0xa3f   :  { %v8783_v7 = vpack.c.bf16 %v8773_v4, %v8773_v4 }
 0xa41   :  { %7578 = vmatmul.mubr.msk.bf16.vlgmr.msra.gmra.mrb[48].mxu0 %vm36_vm0, %v8783_v7  ;;  %7594 = vmatmul.mubr.msk.bf16.vlgmr.msra.gmra.mrb[56].mxu1 %vm36_vm0, %v8783_v7 }
 0xa42   :  { %7582 = vmatpush3.bf16.msra.mxu0 %v8173_v5  ;;  %7606 = vmatpush3.bf16.msra.mxu1 %v8174_v6 }
 0xa43   :  { %7583 = vmatprep.subr.bf16.mxu0 %v8353_v8  ;;  %7607 = vmatprep.subr.bf16.mxu1 %v8353_v8 }
 0xa44   :  { %7585 = vmatprep.mubr.msk.bf16.mxu0 %vm8354_vm1, %v8353_v8  ;;  %7609 = vmatprep.mubr.msk.bf16.mxu1 %vm8354_vm1, %v8353_v8 }
 0xa46   :  { %7584 = vmatpush3.bf16.msra.mxu0 %v8175_v9  ;;  %7608 = vmatpush3.bf16.msra.mxu1 %v8176_v60 }
 0xa47   :  { %7597 = vmatprep.subr.bf16.mxu0 %v8353_v8  ;;  %7621 = vmatprep.subr.bf16.mxu1 %v8353_v8 }
 0xa49   :  { %7586 = vmatmul.mubr.msk.bf16.vlgmr.msra.gmra.mrb[52].mxu0 %vm36_vm0, %v8783_v7  ;;  %7610 = vmatmul.mubr.msk.bf16.vlgmr.msra.gmra.mrb[60].mxu1 %vm36_vm0, %v8783_v7 }
 0xa4a   :  { %7598 = vmatpush3.bf16.msra.mxu0 %v8177_v10  ;;  %7622 = vmatpush3.bf16.msra.mxu1 %v8178_v11 }
 0xa4b   :  { %7599 = vmatprep.subr.bf16.mxu0 %v8353_v8  ;;  %7623 = vmatprep.subr.bf16.mxu1 %v8353_v8 }
 0xa4c   :  { %7601 = vmatprep.mubr.msk.bf16.mxu0 %vm8354_vm1, %v8353_v8  ;;  %7625 = vmatprep.mubr.msk.bf16.mxu1 %vm8354_vm1, %v8353_v8 }
 0xa4e   :  { %7600 = vmatpush3.bf16.msra.mxu0 %v8179_v20  ;;  %7624 = vmatpush3.bf16.msra.mxu1 %v8180_v12 }
 0xa4f   :  { %7613 = vmatprep.subr.bf16.mxu0 %v8353_v8  ;;  %7637 = vmatprep.subr.bf16.mxu1 %v8353_v8 }
 0xa51   :  { %7602 = vmatmul.mubr.msk.bf16.vlgmr.msra.gmra.mrb[56].mxu0 %vm36_vm0, %v8783_v7  ;;  %7626 = vmatmul.mubr.msk.bf16.vlgmr.msra.gmra.mrb[64].mxu1 %vm36_vm0, %v8783_v7 }
 0xa52   :  { %7614 = vmatpush3.bf16.msra.mxu0 %v8181_v13  ;;  %7638 = vmatpush3.bf16.msra.mxu1 %v8182_v14 }
 0xa53   :  { %7615 = vmatprep.subr.bf16.mxu0 %v8353_v8  ;;  %7639 = vmatprep.subr.bf16.mxu1 %v8353_v8 }
 0xa54   :  { %7617 = vmatprep.mubr.msk.bf16.mxu0 %vm8354_vm1, %v8353_v8  ;;  %7641 = vmatprep.mubr.msk.bf16.mxu1 %vm8354_vm1, %v8353_v8 }
 0xa56   :  { %7616 = vmatpush3.bf16.msra.mxu0 %v8183_v15  ;;  %7640 = vmatpush3.bf16.msra.mxu1 %v8184_v16  ;;  %v6710_v15 = vld [vmem:[%s9791_s3 + $0xd] ss:$0 sm:$0xff] }
 0xa57   :  { %7629 = vmatprep.subr.bf16.mxu0 %v8353_v8  ;;  %7653 = vmatprep.subr.bf16.mxu1 %v8353_v8 }
 0xa59   :  { %7618 = vmatmul.mubr.msk.bf16.vlgmr.msra.gmra.mrb[60].mxu0 %vm36_vm0, %v8783_v7  ;;  %7642 = vmatmul.mubr.msk.bf16.vlgmr.msra.gmra.mrb[68].mxu1 %vm36_vm0, %v8783_v7 }
 0xa5a   :  { %7630 = vmatpush3.bf16.msra.mxu0 %v8185_v17  ;;  %7654 = vmatpush3.bf16.msra.mxu1 %v8186_v18  ;;  %v6748_v18 = vld [vmem:[%s9791_s3 + $0x13] ss:$0 sm:$0xff] }
 0xa5b   :  { %7631 = vmatprep.subr.bf16.mxu0 %v8353_v8  ;;  %7655 = vmatprep.subr.bf16.mxu1 %v8353_v8 }
 0xa5c   :  { %7633 = vmatprep.mubr.msk.bf16.mxu0 %vm8354_vm1, %v8353_v8  ;;  %7657 = vmatprep.mubr.msk.bf16.mxu1 %vm8354_vm1, %v8353_v8 }
 0xa5e   :  { %7632 = vmatpush3.bf16.msra.mxu0 %v8187_v19  ;;  %7656 = vmatpush3.bf16.msra.mxu1 %v8188_v21 }
 0xa5f   :  { %7645 = vmatprep.subr.bf16.mxu0 %v8353_v8  ;;  %7669 = vmatprep.subr.bf16.mxu1 %v8353_v8 }
 0xa61   :  { %7634 = vmatmul.mubr.msk.bf16.vlgmr.msra.gmra.mrb[64].mxu0 %vm36_vm0, %v8783_v7  ;;  %7658 = vmatmul.mubr.msk.bf16.vlgmr.msra.gmra.mrb[72].mxu1 %vm36_vm0, %v8783_v7 }
 0xa62   :  { %7646 = vmatpush3.bf16.msra.mxu0 %v8189_v22  ;;  %7649 = vmatprep.mubr.msk.bf16.mxu0 %vm8354_vm1, %v8353_v8 }
 0xa63   :  { %7647 = vmatprep.subr.bf16.mxu0 %v8353_v8  ;;  %7671 = vmatprep.mubr.msk.bf16.mxu1 %vm8354_vm1, %v8353_v8 }
 0xa66   :  { %7648 = vmatpush3.bf16.msra.mxu0 %v8190_v23 }
 0xa67   :  { %7661 = vmatprep.subr.bf16.mxu0 %v8353_v8 }
 0xa69   :  { %7650 = vmatmul.mubr.msk.bf16.vlgmr.msra.gmra.mrb[68].mxu0 %vm36_vm0, %v8783_v7 }
 0xa6a   :  { %7662 = vmatpush3.bf16.msra.mxu0 %v8191_v24  ;;  %7665 = vmatprep.mubr.msk.bf16.mxu0 %vm8354_vm1, %v8353_v8 }
 0xa6b   :  { %7663 = vmatprep.subr.bf16.mxu0 %v8353_v8 }
 0xa6e   :  { %7664 = vmatpush3.bf16.msra.mxu0 %v8192_v25 }
 0xa6f   :  { %7675 = vmatprep.subr.bf16.mxu0 %v8353_v8 }
 0xa71   :  { %7666 = vmatmul.mubr.msk.bf16.vlgmr.msra.gmra.mrb[72].mxu0 %vm36_vm0, %v8783_v7 }
 0xa72   :  { %7677 = vmatprep.mubr.msk.bf16.mxu0 %vm8354_vm1, %v8353_v8 }
 0xb14   :  { %v1781_v26 = vpop.f32.mrb[48].mxu0  ;;  %v1885_v27 = vpop.f32.mrb[56].mxu1 }
 0xb15   :  { %v7579_v28 = vpop.f32.mrb[49].mxu0  ;;  %v7595_v29 = vpop.f32.mrb[57].mxu1  ;;  %v1782_v49 = vadd.f32 %v6709_v46, %v1781_v26  ;;  %v1886_v1 = vadd.f32 %v6711_v62, %v1885_v27 }
 0xb16   :  { %v1784_v30 = vpop.f32.mrb[50].mxu0  ;;  %v1888_v31 = vpop.f32.mrb[58].mxu1 }
 0xb17   :  { %v7580_v32 = vpop.f32.mrb[51].mxu0  ;;  %v7596_v33 = vpop.f32.mrb[59].mxu1  ;;  %v2451_v57 = vpack.c.bf16 %v1782_v49, %v1782_v49  ;;  %v2453_v11 = vpack.c.bf16 %v1886_v1, %v1886_v1 }
 0xb18   :  { %v6712_v32 = vld [vmem:[%s9791_s3 + $0xf] ss:$0 sm:$0xff] }
 0xb1c   :  { %v1833_v35 = vpop.f32.mrb[52].mxu0  ;;  %v2035_v36 = vpop.f32.mrb[60].mxu1 }
 0xb1d   :  { %v2036_v37 = vadd.f32 %v6745_v34, %v2035_v36  ;;  %v7587_v39 = vpop.f32.mrb[53].mxu0  ;;  %v7611_v40 = vpop.f32.mrb[61].mxu1  ;;  %v1834_v19 = vadd.f32 %v6710_v15, %v1833_v35  ;;  %v6782_v34 = vld [vmem:[%s9791_s3 + $0x15] ss:$0 sm:$0xff] }
 0xb1e   :  { %v1836_v41 = vpop.f32.mrb[54].mxu0  ;;  %v2038_v42 = vpop.f32.mrb[62].mxu1 }
 0xb1f   :  { %v2455_v43 = vpack.c.bf16 %v2036_v37, %v2036_v37  ;;  %v7588_v44 = vpop.f32.mrb[55].mxu0  ;;  %v7612_v45 = vpop.f32.mrb[63].mxu1  ;;  %v2452_v28 = vpack.c.bf16 %v1834_v19, %v1834_v19 }
 0xb21   :  { %v2463_v47 = vsel %vm834_vm2, %v2455_v43, 0 }
 0xb22   :  { %7670 = vmatpush3.bf16.xpose.msra.mxu1 %v2463_v47 }
 0xb23   :  { %7681 = vmatprep.subr.bf16.mxu1 %v8353_v8 }
 0xb24   :  { %v1937_v50 = vpop.f32.mrb[56].mxu0  ;;  %v2139_v51 = vpop.f32.mrb[64].mxu1 }
 0xb25   :  { %v2140_v52 = vadd.f32 %v6747_v48, %v2139_v51  ;;  %v7603_v53 = vpop.f32.mrb[57].mxu0  ;;  %v7627_v54 = vpop.f32.mrb[65].mxu1  ;;  %v1938_v35 = vadd.f32 %v6712_v32, %v1937_v50 }
 0xb26   :  { %v1940_v55 = vpop.f32.mrb[58].mxu0  ;;  %v2142_v56 = vpop.f32.mrb[66].mxu1  ;;  %v8351_v54 = vld [vmem:[%s9792_s1] ss:$0 sm:$0xff] }
 0xb27   :  { %v2457_v58 = vpack.c.bf16 %v2140_v52, %v2140_v52  ;;  %v7604_v59 = vpop.f32.mrb[59].mxu0  ;;  %v7628_v61 = vpop.f32.mrb[67].mxu1  ;;  %v2454_v41 = vpack.c.bf16 %v1938_v35, %v1938_v35 }
 0xb29   :  { %v2555_v63 = vsel %vm834_vm2, %v2457_v58, 0  ;;  %7672 = vmatmul.mubr.msk.bf16.vlgmr.msra.gmra.mrb[76].mxu1 %vm834_vm2, %v2451_v57 }
 0xb2a   :  { %7682 = vmatpush3.bf16.xpose.msra.mxu1 %v2555_v63  ;;  %7683 = vmatprep.mubr.msk.bf16.mxu1 %vm8354_vm1, %v8353_v8 }
 0xb2b   :  { %7693 = vmatprep.subr.bf16.mxu1 %v8353_v8 }
 0xb2c   :  { %v2087_v2 = vpop.f32.mrb[60].mxu0  ;;  %v2289_v3 = vpop.f32.mrb[68].mxu1 }
 0xb2d   :  { %v2088_v5 = vadd.f32 %v6746_v38, %v2087_v2  ;;  %v2290_v6 = vadd.f32 %v6781_v0, %v2289_v3  ;;  %v7619_v7 = vpop.f32.mrb[61].mxu0  ;;  %v7643_v9 = vpop.f32.mrb[69].mxu1 }
 0xb2e   :  { %v2090_v60 = vpop.f32.mrb[62].mxu0  ;;  %v2292_v10 = vpop.f32.mrb[70].mxu1 }
 0xb2f   :  { %v2456_v20 = vpack.c.bf16 %v2088_v5, %v2088_v5  ;;  %v2699_v12 = vpack.c.bf16 %v2290_v6, %v2290_v6  ;;  %v7620_v13 = vpop.f32.mrb[63].mxu0  ;;  %v7644_v14 = vpop.f32.mrb[71].mxu1 }
 0xb31   :  { %v2509_v16 = vsel %vm834_vm2, %v2456_v20, 0  ;;  %v2707_v17 = vsel %vm1088_vm3, %v2699_v12, 0  ;;  %7684 = vmatmul.mubr.msk.bf16.vlgmr.msra.gmra.mrb[80].mxu1 %vm834_vm2, %v2453_v11 }
 0xb32   :  { %7676 = vmatpush3.bf16.xpose.msra.mxu0 %v2509_v16  ;;  %7694 = vmatpush3.bf16.msra.mxu1 %v2707_v17 }
 0xb33   :  { %7687 = vmatprep.subr.bf16.mxu0 %v8353_v8  ;;  %7695 = vmatprep.mubr.msk.bf16.mxu1 %vm8354_vm1, %v8353_v8 }
 0xb34   :  { %v2191_v21 = vpop.f32.mrb[64].mxu0  ;;  %v8944_v22 = vpop.f32.mrb[72].mxu1  ;;  %7705 = vmatprep.subr.bf16.mxu1 %v8353_v8 }
 0xb35   :  { %v2192_v23 = vadd.f32 %v6748_v18, %v2191_v21  ;;  %v7635_v24 = vpop.f32.mrb[65].mxu0  ;;  %v7659_v25 = vpop.f32.mrb[73].mxu1 }
 0xb36   :  { %v2194_v26 = vpop.f32.mrb[66].mxu0  ;;  %v2396_v27 = vpop.f32.mrb[74].mxu1 }
 0xb37   :  { %v2458_v29 = vpack.c.bf16 %v2192_v23, %v2192_v23  ;;  %v7636_v30 = vpop.f32.mrb[67].mxu0  ;;  %v7660_v31 = vpop.f32.mrb[75].mxu1 }
 0xb39   :  { %v2601_v33 = vsel %vm834_vm2, %v2458_v29, 0  ;;  %7678 = vmatmul.mubr.msk.bf16.vlgmr.msra.gmra.mrb[76].mxu0 %vm834_vm2, %v2452_v28 }
 0xb3a   :  { %7688 = vmatpush3.bf16.xpose.msra.mxu0 %v2601_v33  ;;  %7689 = vmatprep.mubr.msk.bf16.mxu0 %vm8354_vm1, %v8353_v8 }
 0xb3b   :  { %7699 = vmatprep.subr.bf16.mxu0 %v8353_v8 }
 0xb3c   :  { %v2341_v36 = vpop.f32.mrb[68].mxu0 }
 0xb3d   :  { %v2342_v37 = vadd.f32 %v6782_v34, %v2341_v36  ;;  %v7651_v39 = vpop.f32.mrb[69].mxu0 }
 0xb3e   :  { %v2344_v40 = vpop.f32.mrb[70].mxu0 }
 0xb3f   :  { %v2700_v42 = vpack.c.bf16 %v2342_v37, %v2342_v37  ;;  %v7652_v43 = vpop.f32.mrb[71].mxu0  ;;  %v6783_v37 = vld [vmem:[%s9791_s3 + $0x16] ss:$0 sm:$0xff] }
 0xb40   :  { %v2394_v39 = vadd.f32 %v6783_v37, %v8944_v22 }
 0xb41   :  { %v2753_v44 = vsel %vm1088_vm3, %v2700_v42, 0  ;;  %7690 = vmatmul.mubr.msk.bf16.vlgmr.msra.gmra.mrb[80].mxu0 %vm834_vm2, %v2454_v41 }
 0xb42   :  { %7700 = vmatpush3.bf16.msra.mxu0 %v2753_v44  ;;  %7701 = vmatprep.mubr.msk.bf16.mxu0 %vm8354_vm1, %v8353_v8  ;;  %v2701_v42 = vpack.c.bf16 %v2394_v39, %v2394_v39 }
 0xb43   :  { %7711 = vmatprep.subr.bf16.mxu0 %v8353_v8 }
 0xb44   :  { %v8963_v45 = vpop.f32.mrb[72].mxu0 }
 0xb45   :  { %v7667_v46 = vpop.f32.mrb[73].mxu0 }
 0xb46   :  { %v2448_v47 = vpop.f32.mrb[74].mxu0  ;;  %v2799_v46 = vsel %vm1088_vm3, %v2701_v42, 0 }
 0xb47   :  { %v7668_v48 = vpop.f32.mrb[75].mxu0 }
 0xbfc   :  { %v2499_v49 = vpop.f32.mrb[76].mxu1 }
 0xbfd   :  { %v2643_v50 = vmul.f32 0.35355338, %v2499_v49  ;;  %v7673_v51 = vpop.f32.mrb[77].mxu1  ;;  %v6784_v49 = vld [vmem:[%s9791_s3 + $0x17] ss:$0 sm:$0xff] }
 0xbfe   :  { %v2502_v52 = vpop.f32.mrb[78].mxu1  ;;  %v2446_v51 = vadd.f32 %v6784_v49, %v8963_v45 }
 0xbff   :  { %v7674_v53 = vpop.f32.mrb[79].mxu1  ;;  %v2647_v55 = vadd.f32 %v8351_v54, %v2643_v50 }
 0xc01   :  { %v2651_v56 = vsel %vm834_vm2, %v2647_v55, -inf }
 0xc02   :  { %2652 = vmax.xlane.f32.xlu0 %v2651_v56 }
 0xc04   :  { %v2591_v57 = vpop.f32.mrb[80].mxu1 }
 0xc05   :  { %v2645_v58 = vmul.f32 0.35355338, %v2591_v57  ;;  %v7685_v59 = vpop.f32.mrb[81].mxu1 }
 0xc06   :  { %v2594_v61 = vpop.f32.mrb[82].mxu1 }
 0xc07   :  { %v7686_v62 = vpop.f32.mrb[83].mxu1  ;;  %v2649_v63 = vadd.f32 %v8351_v54, %v2645_v58  ;;  %v6805_v61 = vld [vmem:[%s9793_s6 + $0x10] sm:$0xf] }
 0xc08   :  { %v2900_v62 = vsel %vm1088_vm3, %v6805_v61, 0 }
 0xc09   :  { %v2657_v38 = vsel %vm834_vm2, %v2649_v63, -inf }
 0xc0a   :  { %2658 = vmax.xlane.f32.xlu0 %v2657_v38 }
 0xc0c   :  { %v2545_v0 = vpop.f32.mrb[76].mxu0 }
 0xc0d   :  { %v2644_v1 = vmul.f32 0.35355338, %v2545_v0  ;;  %v7679_v2 = vpop.f32.mrb[77].mxu0  ;;  %v6807_v0 = vld [vmem:[%s9793_s6 + $0x18] sm:$0xf] }
 0xc0e   :  { %v2548_v3 = vpop.f32.mrb[78].mxu0 }
 0xc0f   :  { %v7680_v5 = vpop.f32.mrb[79].mxu0  ;;  %v2648_v6 = vadd.f32 %v8351_v54, %v2644_v1 }
 0xc10   :  { %v2992_v5 = vsel %vm1088_vm3, %v6807_v0, 0  ;;  %v8193_v0 = vld [vmem:[%s9794_s7 + $0x10] sm:$0xff]  }
 0xc11   :  { %v2654_v7 = vsel %vm834_vm2, %v2648_v6, -inf }
 0xc12   :  { %2655 = vmax.xlane.f32.xlu1 %v2654_v7 }
 0xc14   :  { %v2637_v9 = vpop.f32.mrb[80].mxu0 }
 0xc15   :  { %v2646_v60 = vmul.f32 0.35355338, %v2637_v9  ;;  %v7691_v10 = vpop.f32.mrb[81].mxu0 }
 0xc16   :  { %v2640_v11 = vpop.f32.mrb[82].mxu0 }
 0xc17   :  { %v7692_v20 = vpop.f32.mrb[83].mxu0  ;;  %v2650_v12 = vadd.f32 %v8351_v54, %v2646_v60  ;;  %v2702_v54 = vpack.c.bf16 %v2446_v51, %v2446_v51 }
 0xc19   :  { %v2660_v13 = vsel %vm834_vm2, %v2650_v12, -inf  ;;  %v2845_v57 = vsel %vm1088_vm3, %v2702_v54, 0 }
 0xc1a   :  { %2661 = vmax.xlane.f32.xlu1 %v2660_v13 }
 0xc8f   :  { %v2653_v14 = vpop.xlane.xlu0 %2652 }
 0xc90   :  { %v2663_v15 = vsub.f32 %v2647_v55, %v2653_v14 }
 0xc92   :  { %v2667_v16 = vmul.f32 1.442695, %v2663_v15 }
 0xc94   :  { %8283 = vpow2.f32 %v2667_v16 }
 0xc97   :  { %v2659_v17 = vpop.xlane.xlu0 %2658 }
 0xc98   :  { %v2665_v18 = vsub.f32 %v2649_v63, %v2659_v17  ;;  %v6806_v63 = vld [vmem:[%s9793_s6 + $0x14] sm:$0xf] }
 0xc99   :  { %v2946_v38 = vsel %vm1088_vm3, %v6806_v63, 0 }
 0xc9a   :  { %v2671_v19 = vmul.f32 1.442695, %v2665_v18 }
 0xc9c   :  { %8285 = vpow2.f32 %v2671_v19 }
 0xc9e   :  { %v8284_v21 = vpop.eup %8283 }
 0xc9f   :  { %v2656_v23 = vpop.xlane.xlu1 %2655  ;;  %v2675_v24 = vsel %vm834_vm2, %v8284_v21, 0.0 }
 0xca0   :  { %v2664_v25 = vsub.f32 %v2648_v6, %v2656_v23  ;;  %2676 = vadd.xlane.f32.xlu0 %v2675_v24 }
 0xca2   :  { %v2669_v26 = vmul.f32 1.442695, %v2664_v25 }
 0xca4   :  { %8287 = vpow2.f32 %v2669_v26 }
 0xca6   :  { %v8286_v27 = vpop.eup %8285 }
 0xca7   :  { %v2662_v28 = vpop.xlane.xlu1 %2661  ;;  %v2681_v29 = vsel %vm834_vm2, %v8286_v27, 0.0 }
 0xca8   :  { %v2666_v30 = vsub.f32 %v2650_v12, %v2662_v28  ;;  %2682 = vadd.xlane.f32.xlu0 %v2681_v29  ;;  %v6808_v12 = vld [vmem:[%s9793_s6 + $0x1c] sm:$0xf] }
 0xca9   :  { %v3038_v16 = vsel %vm1088_vm3, %v6808_v12, 0 }
 0xcaa   :  { %v2673_v31 = vmul.f32 1.442695, %v2666_v30 }
 0xcac   :  { %8289 = vpow2.f32 %v2673_v31 }
 0xcae   :  { %v8288_v32 = vpop.eup %8287 }
 0xcaf   :  { %v2678_v33 = vsel %vm834_vm2, %v8288_v32, 0.0 }
 0xcb0   :  { %2679 = vadd.xlane.f32.xlu1 %v2678_v33 }
 0xcb6   :  { %v8290_v34 = vpop.eup %8289 }
 0xcb7   :  { %v2684_v35 = vsel %vm834_vm2, %v8290_v34, 0.0 }
 0xcb8   :  { %2685 = vadd.xlane.f32.xlu1 %v2684_v35 }
 0xd2d   :  { %v2677_v36 = vpop.xlane.xlu0 %2676 }
 0xd2e   :  { %8291 = vrcp.f32 %v2677_v36 }
 0xd35   :  { %v2683_v40 = vpop.xlane.xlu0 %2682 }
 0xd36   :  { %8293 = vrcp.f32 %v2683_v40 }
 0xd38   :  { %v8292_v41 = vpop.eup %8291 }
 0xd39   :  { %v2691_v43 = vmul.f32 %v8292_v41, %v8284_v21 }
 0xd3b   :  { %v2695_v44 = vpack.c.bf16 %v2691_v43, %v2691_v43 }
 0xd3d   :  { %v2680_v47 = vpop.xlane.xlu1 %2679  ;;  %7696 = vmatmul.mubr.msk.bf16.vlgmr.msra.gmra.mrb[84].mxu1 %vm834_vm2, %v2695_v44 }
 0xd3e   :  { %8295 = vrcp.f32 %v2680_v47  ;;  %7706 = vmatpush3.bf16.msra.mxu1 %v2799_v46  ;;  %7707 = vmatprep.mubr.msk.bf16.mxu1 %vm8354_vm1, %v8353_v8  ;;  %v6813_v47 = vld [vmem:[%s9790_s2 + $0x8] ss:$0 sm:$0xff] }
 0xd3f   :  { %7717 = vmatprep.subr.bf16.mxu1 %v8353_v8 }
 0xd40   :  { %v8294_v48 = vpop.eup %8293 }
 0xd41   :  { %v2693_v22 = vmul.f32 %v8294_v48, %v8286_v27 }
 0xd43   :  { %v2697_v50 = vpack.c.bf16 %v2693_v22, %v2693_v22 }
 0xd45   :  { %v2686_v52 = vpop.xlane.xlu1 %2685  ;;  %7708 = vmatmul.mubr.msk.bf16.vlgmr.msra.gmra.mrb[88].mxu1 %vm834_vm2, %v2697_v50 }
 0xd46   :  { %8297 = vrcp.f32 %v2686_v52  ;;  %7719 = vmatprep.mubr.msk.bf16.mxu1 %vm8354_vm1, %v8353_v8  ;;  %7718 = vmatpush3.bf16.msra.mxu1 %v2900_v62 }
 0xd47   :  { %7729 = vmatprep.subr.bf16.mxu1 %v8353_v8 }
 0xd48   :  { %v8296_v53 = vpop.eup %8295 }
 0xd49   :  { %v2692_v55 = vmul.f32 %v8296_v53, %v8288_v32  ;;  %v6841_v53 = vld [vmem:[%s9788_s0 + $0x8] sm:$0xff] }
 0xd4b   :  { %v2696_v56 = vpack.c.bf16 %v2692_v55, %v2692_v55  ;;  %v3309_v55 = vsel %vm36_vm0, %v6841_v53, 0.0 }
 0xd4d   :  { %7702 = vmatmul.mubr.msk.bf16.vlgmr.msra.gmra.mrb[84].mxu0 %vm834_vm2, %v2696_v56 }
 0xd4e   :  { %7712 = vmatpush3.bf16.msra.mxu0 %v2845_v57  ;;  %7713 = vmatprep.mubr.msk.bf16.mxu0 %vm8354_vm1, %v8353_v8 }
 0xd4f   :  { %7723 = vmatprep.subr.bf16.mxu0 %v8353_v8 }
 0xd50   :  { %v8298_v45 = vpop.eup %8297 }
 0xd51   :  { %v2694_v58 = vmul.f32 %v8298_v45, %v8290_v34 }
 0xd53   :  { %v2698_v59 = vpack.c.bf16 %v2694_v58, %v2694_v58 }
 0xd55   :  { %7714 = vmatmul.mubr.msk.bf16.vlgmr.msra.gmra.mrb[88].mxu0 %vm834_vm2, %v2698_v59 }
 0xd56   :  { %7725 = vmatprep.mubr.msk.bf16.mxu0 %vm8354_vm1, %v8353_v8  ;;  %7724 = vmatpush3.bf16.msra.mxu0 %v2946_v38 }
 0xd57   :  { %7735 = vmatprep.subr.bf16.mxu0 %v8353_v8 }
 0xe10   :  { %v2743_v1 = vpop.f32.mrb[84].mxu1 }
 0xe11   :  { %v2887_v2 = vpack.c.bf16 %v2743_v1, %v2743_v1  ;;  %v7697_v3 = vpop.f32.mrb[85].mxu1  ;;  %v8194_v1 = vld [vmem:[%s9794_s7 + $0x18] sm:$0xff]  }
 0xe12   :  { %v2746_v6 = vpop.f32.mrb[86].mxu1 }
 0xe13   :  { %v7698_v7 = vpop.f32.mrb[87].mxu1  ;;  %7720 = vmatmul.mubr.msk.bf16.vlgmr.msra.gmra.mrb[92].mxu1 %vm834_vm2, %v2887_v2 }
 0xe14   :  { %7730 = vmatpush3.bf16.msra.mxu1 %v2992_v5  ;;  %7731 = vmatprep.mubr.msk.bf16.mxu1 %vm8354_vm1, %v8353_v8 }
 0xe15   :  { %7741 = vmatprep.subr.bf16.mxu1 %v8353_v8 }
 0xe18   :  { %v2835_v9 = vpop.f32.mrb[88].mxu1 }
 0xe19   :  { %v2889_v60 = vpack.c.bf16 %v2835_v9, %v2835_v9  ;;  %v7709_v10 = vpop.f32.mrb[89].mxu1 }
 0xe1a   :  { %v2838_v11 = vpop.f32.mrb[90].mxu1  ;;  %v6814_v10 = vld [vmem:[%s9790_s2 + $0x9] ss:$0 sm:$0xff] }
 0xe1b   :  { %v7710_v20 = vpop.f32.mrb[91].mxu1  ;;  %7732 = vmatmul.mubr.msk.bf16.vlgmr.msra.gmra.mrb[96].mxu1 %vm834_vm2, %v2889_v60 }
 0xe1c   :  { %7745 = vmatprep.mubr.msk.bf16.mxu1 %vm8354_vm1, %v8353_v8  ;;  %7742 = vmatpush3.bf16.msra.mxu1 %v8193_v0  ;;  %v6815_v20 = vld [vmem:[%s9790_s2 + $0xa] ss:$0 sm:$0xff] }
 0xe1d   :  { %7743 = vmatprep.subr.bf16.mxu1 %v8353_v8 }
 0xe20   :  { %v2789_v13 = vpop.f32.mrb[84].mxu0  ;;  %7744 = vmatpush3.bf16.msra.mxu1 %v8194_v1 }
 0xe21   :  { %v2888_v14 = vpack.c.bf16 %v2789_v13, %v2789_v13  ;;  %v7703_v15 = vpop.f32.mrb[85].mxu0  ;;  %7761 = vmatprep.subr.bf16.mxu1 %v8353_v8 }
 0xe22   :  { %v2792_v17 = vpop.f32.mrb[86].mxu0 }
 0xe23   :  { %v7704_v18 = vpop.f32.mrb[87].mxu0  ;;  %7726 = vmatmul.mubr.msk.bf16.vlgmr.msra.gmra.mrb[92].mxu0 %vm834_vm2, %v2888_v14  ;;  %v6842_v14 = vld [vmem:[%s9790_s2] ss:$0 sm:$0xff]  ;;  %v6843_v17 = vld [vmem:[%s9790_s2 + $0x1] ss:$0 sm:$0xff] }
 0xe24   :  { %7736 = vmatpush3.bf16.msra.mxu0 %v3038_v16  ;;  %7737 = vmatprep.mubr.msk.bf16.mxu0 %vm8354_vm1, %v8353_v8  ;;  %v8195_v18 = vld [vmem:[%s9789_s5] sm:$0xff]  }
 0xe25   :  { %7749 = vmatprep.subr.bf16.mxu0 %v8353_v8 }
 0xe28   :  { %v2881_v19 = vpop.f32.mrb[88].mxu0 }
 0xe29   :  { %v2890_v21 = vpack.c.bf16 %v2881_v19, %v2881_v19  ;;  %v7715_v23 = vpop.f32.mrb[89].mxu0 }
 0xe2a   :  { %v2884_v24 = vpop.f32.mrb[90].mxu0 }
 0xe2b   :  { %v7716_v25 = vpop.f32.mrb[91].mxu0  ;;  %7738 = vmatmul.mubr.msk.bf16.vlgmr.msra.gmra.mrb[96].mxu0 %vm834_vm2, %v2890_v21  ;;  %v8196_v24 = vld [vmem:[%s9789_s5 + $0x8] sm:$0xff]  }
 0xe2c   :  { %7757 = vmatprep.mubr.msk.bf16.mxu0 %vm8354_vm1, %v8353_v8 }
 0xee6   :  { %v2936_v26 = vpop.f32.mrb[92].mxu1 }
 0xee7   :  { %v7721_v27 = vpop.f32.mrb[93].mxu1  ;;  %v3080_v35 = vsel %vm36_vm0, %v2936_v26, 0.0  ;;  %v8197_v26 = vld [vmem:[%s9789_s5 + $0x10] sm:$0xff]  }
 0xee8   :  { %v2939_v28 = vpop.f32.mrb[94].mxu1  ;;  %v8198_v27 = vld [vmem:[%s9789_s5 + $0x18] sm:$0xff]  }
 0xee9   :  { %v7722_v29 = vpop.f32.mrb[95].mxu1  ;;  %v8199_v28 = vld [vmem:[%s9789_s5 + $0x30] sm:$0xff]  }
 0xeea   :  { %v8200_v29 = vld [vmem:[%s9789_s5 + $0x38] sm:$0xff]  }
 0xeee   :  { %v3028_v30 = vpop.f32.mrb[96].mxu1 }
 0xeef   :  { %v7733_v31 = vpop.f32.mrb[97].mxu1  ;;  %v3083_v41 = vsel %vm36_vm0, %v3028_v30, 0.0  ;;  %v8201_v30 = vld [vmem:[%s9789_s5 + $0x50] sm:$0xff]  }
 0xef0   :  { %v3031_v32 = vpop.f32.mrb[98].mxu1  ;;  %v8202_v31 = vld [vmem:[%s9789_s5 + $0x58] sm:$0xff]  }
 0xef1   :  { %v7734_v33 = vpop.f32.mrb[99].mxu1  ;;  %v8203_v32 = vld [vmem:[%s9789_s5 + $0x70] sm:$0xff]  }
 0xef2   :  { %v8204_v33 = vld [vmem:[%s9789_s5 + $0x78] sm:$0xff]  }
 0xef6   :  { %v2982_v34 = vpop.f32.mrb[92].mxu0 }
 0xef7   :  { %v3081_v36 = vsel %vm36_vm0, %v2982_v34, 0.0  ;;  %v7727_v37 = vpop.f32.mrb[93].mxu0  ;;  %v8205_v34 = vld [vmem:[%s9789_s5 + $0x90] sm:$0xff]  }
 0xef8   :  { %v3082_v39 = vadd.f32 %v3081_v36, %v3080_v35  ;;  %v2985_v40 = vpop.f32.mrb[94].mxu0  ;;  %v8206_v35 = vld [vmem:[%s9789_s5 + $0x98] sm:$0xff]   ;;  %v8207_v36 = vld [vmem:[%s9789_s5 + $0xb0] sm:$0xff]  }
 0xef9   :  { %v7728_v42 = vpop.f32.mrb[95].mxu0  ;;  %v8208_v37 = vld [vmem:[%s9789_s5 + $0xb8] sm:$0xff]   ;;  %v8210_v40 = vld [vmem:[%s9795_s8 + $0x28] sm:$0xff]  }
 0xefa   :  { %v3084_v43 = vadd.f32 %v3083_v41, %v3082_v39  ;;  %v8209_v39 = vld [vmem:[%s9795_s8 + $0x20] sm:$0xff]   ;;  %v8211_v41 = vld [vmem:[%s9795_s8 + $0x30] sm:$0xff]   ;;  %v8212_v42 = vld [vmem:[%s9795_s8 + $0x38] sm:$0xff]  }
 0xefb   :  { %7750 = vmatpush3.bf16.msra.mxu0 %v8209_v39 }
 0xefc   :  { %7751 = vmatprep.subr.bf16.mxu0 %v8353_v8 }
 0xefe   :  { %v3074_v44 = vpop.f32.mrb[96].mxu0 }
 0xeff   :  { %v3085_v46 = vsel %vm36_vm0, %v3074_v44, 0.0  ;;  %v7739_v48 = vpop.f32.mrb[97].mxu0  ;;  %7752 = vmatpush3.bf16.msra.mxu0 %v8210_v40 }
 0xf00   :  { %v3086_v22 = vadd.f32 %v3085_v46, %v3084_v43  ;;  %v3077_v49 = vpop.f32.mrb[98].mxu0  ;;  %7753 = vmatprep.subr.bf16.mxu0 %v8353_v8  ;;  %v6821_v43 = vld [vmem:[%s9796_s4 + $0x1] ss:$0 sm:$0xff] }
 0xf01   :  { %v7740_v50 = vpop.f32.mrb[99].mxu0 }
 0xf02   :  { %v3092_v51 = vadd.f32 %v6813_v47, %v3086_v22 }
 0xf03   :  { %7754 = vmatpush3.bf16.msra.mxu0 %v8211_v41 }
 0xf04   :  { %v3093_v52 = vadd.f32 %v3092_v51, %v8773_v4  ;;  %7755 = vmatprep.subr.bf16.mxu0 %v8353_v8 }
 0xf06   :  { %v3096_v54 = vsel %vm36_vm0, %v3093_v52, 0.0 }
 0xf07   :  { %3097 = vadd.xlane.f32.xlu0 %v3096_v54  ;;  %7756 = vmatpush3.bf16.msra.mxu0 %v8212_v42 }
 0xf08   :  { %7777 = vmatprep.subr.bf16.mxu0 %v8353_v8 }
 0xf0b   :  { %3310 = vadd.xlane.f32.xlu0 %v3309_v55 }
 0xf94   :  { %v3098_v56 = vpop.xlane.xlu0 %3097 }
 0xf95   :  { %v3099_v57 = vmul.f32 0.03125, %v3098_v56 }
 0xf97   :  { %v3100_v45 = vsub.f32 %v3093_v52, %v3099_v57 }
 0xf98   :  { %v3311_v58 = vpop.xlane.xlu0 %3310 }
 0xf99   :  { %v3101_v59 = vmul.f32 %v3100_v45, %v3100_v45  ;;  %v3312_v61 = vmul.f32 0.03125, %v3311_v58 }
 0xf9b   :  { %v3102_v62 = vsel %vm36_vm0, %v3101_v59, 0.0  ;;  %v3313_v63 = vsub.f32 %v6841_v53, %v3312_v61 }
 0xf9c   :  { %3103 = vadd.xlane.f32.xlu1 %v3102_v62 }
 0xf9d   :  { %v3314_v4 = vmul.f32 %v3313_v63, %v3313_v63 }
 0xf9f   :  { %v3315_v38 = vsel %vm36_vm0, %v3314_v4, 0.0 }
 0xfa0   :  { %3316 = vadd.xlane.f32.xlu1 %v3315_v38 }
0x1029   :  { %v3104_v2 = vpop.xlane.xlu1 %3103 }
0x102a   :  { %v3105_v3 = vmul.f32 0.03125, %v3104_v2 }
0x102c   :  { %v3106_v5 = vadd.f32 1e-12, %v3105_v3  ;;  %v8213_v3 = vld [vmem:[%s9789_s5 + $0x20] sm:$0xff]  }
0x102d   :  { %v3317_v6 = vpop.xlane.xlu1 %3316 }
0x102e   :  { %8299 = vrsqrt.f32 %v3106_v5  ;;  %v3318_v7 = vmul.f32 0.03125, %v3317_v6 }
0x1030   :  { %v3319_v9 = vadd.f32 1e-12, %v3318_v7  ;;  %v6882_v7 = vld [vmem:[%s9791_s3 + $0x5] ss:$0 sm:$0xff] }
0x1032   :  { %8301 = vrsqrt.f32 %v3319_v9  ;;  %v8214_v9 = vld [vmem:[%s9789_s5 + $0x28] sm:$0xff]  }
0x1038   :  { %v8300_v60 = vpop.eup %8299 }
0x1039   :  { %v3108_v11 = vmul.f32 %v8300_v60, %v3100_v45 }
0x103b   :  { %v3113_v12 = vmul.f32 %v6814_v10, %v3108_v11 }
0x103c   :  { %v8302_v13 = vpop.eup %8301 }
0x103d   :  { %v3321_v15 = vmul.f32 %v8302_v13, %v3313_v63  ;;  %v9064_v16 = vadd.f32 %v6815_v20, %v3113_v12  ;;  %v6846_v20 = vld [vmem:[%s9791_s3 + $0x1] ss:$0 sm:$0xff] }
0x103f   :  { %v3326_v19 = vmul.f32 %v6842_v14, %v3321_v15  ;;  %v3119_v21 = vpack.c.bf16 %v9064_v16, %v9064_v16  ;;  %v8215_v14 = vld [vmem:[%s9789_s5 + $0x40] sm:$0xff]  }
0x1041   :  { %v9074_v23 = vadd.f32 %v6843_v17, %v3326_v19  ;;  %7746 = vmatmul.mubr.msk.bf16.vlgmr.msra.gmra.mrb[100].mxu1 %vm36_vm0, %v3119_v21  ;;  %v6884_v19 = vld [vmem:[%s9791_s3 + $0x7] ss:$0 sm:$0xff]  ;;  %v8216_v21 = vld [vmem:[%s9789_s5 + $0x48] sm:$0xff]  }
0x1042   :  { %7762 = vmatpush3.bf16.msra.mxu1 %v8195_v18  ;;  %7765 = vmatprep.mubr.msk.bf16.mxu1 %vm8354_vm1, %v8353_v8 }
0x1043   :  { %7763 = vmatprep.subr.bf16.mxu1 %v8353_v8  ;;  %v9085_v25 = vpack.c.bf16 %v9074_v23, %v9074_v23 }
0x1046   :  { %7764 = vmatpush3.bf16.msra.mxu1 %v8196_v24 }
0x1047   :  { %7769 = vmatprep.subr.bf16.mxu1 %v8353_v8 }
0x1049   :  { %7766 = vmatmul.mubr.msk.bf16.vlgmr.msra.gmra.mrb[104].mxu1 %vm36_vm0, %v9085_v25 }
0x104a   :  { %7770 = vmatpush3.bf16.msra.mxu1 %v8197_v26  ;;  %7773 = vmatprep.mubr.msk.bf16.mxu1 %vm8354_vm1, %v8353_v8 }
0x104b   :  { %7771 = vmatprep.subr.bf16.mxu1 %v8353_v8 }
0x104e   :  { %7772 = vmatpush3.bf16.msra.mxu1 %v8198_v27 }
0x104f   :  { %7785 = vmatprep.subr.bf16.mxu1 %v8353_v8 }
0x1051   :  { %7774 = vmatmul.mubr.msk.bf16.vlgmr.msra.gmra.mrb[108].mxu1 %vm36_vm0, %v9085_v25 }
0x1052   :  { %7786 = vmatpush3.bf16.msra.mxu1 %v8199_v28  ;;  %7789 = vmatprep.mubr.msk.bf16.mxu1 %vm8354_vm1, %v8353_v8 }
0x1053   :  { %7787 = vmatprep.subr.bf16.mxu1 %v8353_v8 }
0x1056   :  { %7788 = vmatpush3.bf16.msra.mxu1 %v8200_v29  ;;  %v6848_v29 = vld [vmem:[%s9791_s3 + $0x3] ss:$0 sm:$0xff] }
0x1057   :  { %7801 = vmatprep.subr.bf16.mxu1 %v8353_v8 }
0x1059   :  { %7790 = vmatmul.mubr.msk.bf16.vlgmr.msra.gmra.mrb[112].mxu1 %vm36_vm0, %v9085_v25 }
0x105a   :  { %7802 = vmatpush3.bf16.msra.mxu1 %v8201_v30  ;;  %7805 = vmatprep.mubr.msk.bf16.mxu1 %vm8354_vm1, %v8353_v8 }
0x105b   :  { %7803 = vmatprep.subr.bf16.mxu1 %v8353_v8 }
0x105e   :  { %7804 = vmatpush3.bf16.msra.mxu1 %v8202_v31 }
0x105f   :  { %7817 = vmatprep.subr.bf16.mxu1 %v8353_v8 }
0x1061   :  { %7806 = vmatmul.mubr.msk.bf16.vlgmr.msra.gmra.mrb[116].mxu1 %vm36_vm0, %v9085_v25 }
0x1062   :  { %7818 = vmatpush3.bf16.msra.mxu1 %v8203_v32  ;;  %7821 = vmatprep.mubr.msk.bf16.mxu1 %vm8354_vm1, %v8353_v8  ;;  %v8217_v32 = vld [vmem:[%s9789_s5 + $0x60] sm:$0xff]  }
0x1063   :  { %7819 = vmatprep.subr.bf16.mxu1 %v8353_v8 }
0x1066   :  { %7820 = vmatpush3.bf16.msra.mxu1 %v8204_v33 }
0x1067   :  { %7833 = vmatprep.subr.bf16.mxu1 %v8353_v8 }
0x1069   :  { %7822 = vmatmul.mubr.msk.bf16.vlgmr.msra.gmra.mrb[120].mxu1 %vm36_vm0, %v9085_v25 }
0x106a   :  { %7834 = vmatpush3.bf16.msra.mxu1 %v8205_v34  ;;  %7837 = vmatprep.mubr.msk.bf16.mxu1 %vm8354_vm1, %v8353_v8 }
0x106b   :  { %7835 = vmatprep.subr.bf16.mxu1 %v8353_v8 }
0x106e   :  { %7836 = vmatpush3.bf16.msra.mxu1 %v8206_v35 }
0x106f   :  { %7849 = vmatprep.subr.bf16.mxu1 %v8353_v8 }
0x1071   :  { %7838 = vmatmul.mubr.msk.bf16.vlgmr.msra.gmra.mrb[124].mxu1 %vm36_vm0, %v9085_v25 }
0x1072   :  { %7850 = vmatpush3.bf16.msra.mxu1 %v8207_v36  ;;  %7853 = vmatprep.mubr.msk.bf16.mxu1 %vm8354_vm1, %v8353_v8  ;;  %v6918_v36 = vld [vmem:[%s9791_s3 + $0x9] ss:$0 sm:$0xff] }
0x1073   :  { %7851 = vmatprep.subr.bf16.mxu1 %v8353_v8 }
0x1076   :  { %7852 = vmatpush3.bf16.msra.mxu1 %v8208_v37  ;;  %v8218_v37 = vld [vmem:[%s9789_s5 + $0x68] sm:$0xff]  }
0x1077   :  { %7863 = vmatprep.subr.bf16.mxu1 %v8353_v8 }
0x1079   :  { %7854 = vmatmul.mubr.msk.bf16.vlgmr.msra.gmra.mrb[128].mxu1 %vm36_vm0, %v9085_v25 }
0x107a   :  { %7865 = vmatprep.mubr.msk.bf16.mxu1 %vm8354_vm1, %v8353_v8 }
0x1114   :  { %v3182_v44 = vpop.f32.mrb[100].mxu1 }
0x1115   :  { %v3183_v46 = vadd.f32 %v6821_v43, %v3182_v44  ;;  %v7747_v47 = vpop.f32.mrb[101].mxu1  ;;  %v8219_v44 = vld [vmem:[%s9789_s5 + $0x80] sm:$0xff]  }
0x1116   :  { %v3185_v48 = vpop.f32.mrb[102].mxu1 }
0x1117   :  { %v3189_v22 = vmul.f32 0.044715, %v3183_v46  ;;  %v7748_v49 = vpop.f32.mrb[103].mxu1  ;;  %v3188_v63 = vmul.f32 0.5, %v3183_v46 }
0x1119   :  { %v3190_v50 = vmul.f32 %v3189_v22, %v3183_v46  ;;  %v8220_v22 = vld [vmem:[%s9789_s5 + $0x88] sm:$0xff]  }
0x111b   :  { %v3191_v51 = vmul.f32 %v3190_v50, %v3183_v46 }
0x111c   :  { %v9183_v52 = vpop.f32.mrb[104].mxu1 }
0x111d   :  { %v3192_v53 = vadd.f32 %v3191_v51, %v3183_v46  ;;  %v7767_v54 = vpop.f32.mrb[105].mxu1 }
0x111e   :  { %v3431_v55 = vpop.f32.mrb[106].mxu1 }
0x111f   :  { %v3193_v56 = vmul.f32 0.7978846, %v3192_v53  ;;  %v7768_v57 = vpop.f32.mrb[107].mxu1  ;;  %v8221_v53 = vld [vmem:[%s9789_s5 + $0xa0] sm:$0xff]   ;;  %v8222_v55 = vld [vmem:[%s9789_s5 + $0xa8] sm:$0xff]  }
0x1121   :  { %8303 = vtanh.f32 %v3193_v56 }
0x1124   :  { %v3480_v45 = vpop.f32.mrb[108].mxu1 }
0x1125   :  { %v7775_v58 = vpop.f32.mrb[109].mxu1  ;;  %v3481_v17 = vadd.f32 %v6846_v20, %v3480_v45  ;;  %v6845_v20 = vld [vmem:[%s9791_s3] ss:$0 sm:$0xff] }
0x1126   :  { %v3483_v59 = vpop.f32.mrb[110].mxu1 }
0x1127   :  { %v7776_v61 = vpop.f32.mrb[111].mxu1  ;;  %v4095_v26 = vpack.c.bf16 %v3481_v17, %v3481_v17 }
0x112b   :  { %v8304_v62 = vpop.eup %8303 }
0x112c   :  { %v3584_v4 = vpop.f32.mrb[112].mxu1  ;;  %v3195_v38 = vadd.f32 1.0, %v8304_v62 }
0x112d   :  { %v7791_v0 = vpop.f32.mrb[113].mxu1  ;;  %v3585_v34 = vadd.f32 %v6848_v29, %v3584_v4  ;;  %v6881_v4 = vld [vmem:[%s9791_s3 + $0x4] ss:$0 sm:$0xff] }
0x112e   :  { %v3196_v1 = vmul.f32 %v3195_v38, %v3188_v63  ;;  %v3587_v2 = vpop.f32.mrb[114].mxu1 }
0x112f   :  { %v7792_v5 = vpop.f32.mrb[115].mxu1  ;;  %v4097_v40 = vpack.c.bf16 %v3585_v34, %v3585_v34 }
0x1130   :  { %v3197_v6 = vpack.c.bf16 %v3196_v1, %v3196_v1 }
0x1132   :  { %7758 = vmatmul.mubr.msk.bf16.vlgmr.msra.gmra.mrb[100].mxu0 %vm1615_vm4, %v3197_v6 }
0x1133   :  { %7778 = vmatpush3.bf16.msra.mxu0 %v8213_v3  ;;  %7781 = vmatprep.mubr.msk.bf16.mxu0 %vm8354_vm1, %v8353_v8 }
0x1134   :  { %v3732_v60 = vpop.f32.mrb[116].mxu1  ;;  %7779 = vmatprep.subr.bf16.mxu0 %v8353_v8 }
0x1135   :  { %v3733_v10 = vadd.f32 %v6882_v7, %v3732_v60  ;;  %v7807_v11 = vpop.f32.mrb[117].mxu1 }
0x1136   :  { %v3735_v12 = vpop.f32.mrb[118].mxu1 }
0x1137   :  { %v4099_v13 = vpack.c.bf16 %v3733_v10, %v3733_v10  ;;  %7780 = vmatpush3.bf16.msra.mxu0 %v8214_v9  ;;  %v7808_v15 = vpop.f32.mrb[119].mxu1 }
0x1138   :  { %7793 = vmatprep.subr.bf16.mxu0 %v8353_v8  ;;  %v3429_v15 = vadd.f32 %v6845_v20, %v9183_v52  ;;  %v6847_v52 = vld [vmem:[%s9791_s3 + $0x2] ss:$0 sm:$0xff] }
0x1139   :  { %v4152_v18 = vsel %vm834_vm2, %v4099_v13, 0 }
0x113a   :  { %7782 = vmatmul.mubr.msk.bf16.vlgmr.msra.gmra.mrb[104].mxu0 %vm36_vm0, %v9085_v25  ;;  %7864 = vmatpush3.bf16.xpose.msra.mxu1 %v4152_v18 }
0x113b   :  { %7794 = vmatpush3.bf16.msra.mxu0 %v8215_v14  ;;  %7797 = vmatprep.mubr.msk.bf16.mxu0 %vm8354_vm1, %v8353_v8  ;;  %v6883_v14 = vld [vmem:[%s9791_s3 + $0x6] ss:$0 sm:$0xff] }
0x113c   :  { %v3836_v24 = vpop.f32.mrb[120].mxu1  ;;  %7795 = vmatprep.subr.bf16.mxu0 %v8353_v8  ;;  %7875 = vmatprep.subr.bf16.mxu1 %v8353_v8 }
0x113d   :  { %v3837_v27 = vadd.f32 %v6884_v19, %v3836_v24  ;;  %v7823_v28 = vpop.f32.mrb[121].mxu1 }
0x113e   :  { %v3839_v30 = vpop.f32.mrb[122].mxu1 }
0x113f   :  { %v4101_v31 = vpack.c.bf16 %v3837_v27, %v3837_v27  ;;  %7796 = vmatpush3.bf16.msra.mxu0 %v8216_v21  ;;  %v7824_v33 = vpop.f32.mrb[123].mxu1 }
0x1140   :  { %7809 = vmatprep.subr.bf16.mxu0 %v8353_v8 }
0x1141   :  { %v4244_v35 = vsel %vm834_vm2, %v4101_v31, 0  ;;  %7866 = vmatmul.mubr.msk.bf16.vlgmr.msra.gmra.mrb[132].mxu1 %vm834_vm2, %v4095_v26  ;;  %v4094_v31 = vpack.c.bf16 %v3429_v15, %v3429_v15 }
0x1142   :  { %7798 = vmatmul.mubr.msk.bf16.vlgmr.msra.gmra.mrb[108].mxu0 %vm36_vm0, %v9085_v25  ;;  %7876 = vmatpush3.bf16.xpose.msra.mxu1 %v4244_v35 }
0x1143   :  { %7810 = vmatpush3.bf16.msra.mxu0 %v8217_v32  ;;  %7877 = vmatprep.mubr.msk.bf16.mxu1 %vm8354_vm1, %v8353_v8 }
0x1144   :  { %7811 = vmatprep.subr.bf16.mxu0 %v8353_v8  ;;  %7813 = vmatprep.mubr.msk.bf16.mxu0 %vm8354_vm1, %v8353_v8  ;;  %v3984_v39 = vpop.f32.mrb[124].mxu1 }
0x1145   :  { %v3985_v41 = vadd.f32 %v6918_v36, %v3984_v39  ;;  %v7839_v42 = vpop.f32.mrb[125].mxu1  ;;  %7887 = vmatprep.subr.bf16.mxu1 %v8353_v8  ;;  %v6917_v36 = vld [vmem:[%s9791_s3 + $0x8] ss:$0 sm:$0xff] }
0x1146   :  { %v3987_v43 = vpop.f32.mrb[126].mxu1 }
0x1147   :  { %7812 = vmatpush3.bf16.msra.mxu0 %v8218_v37  ;;  %v4349_v46 = vpack.c.bf16 %v3985_v41, %v3985_v41  ;;  %v7840_v47 = vpop.f32.mrb[127].mxu1 }
0x1148   :  { %7825 = vmatprep.subr.bf16.mxu0 %v8353_v8 }
0x1149   :  { %7878 = vmatmul.mubr.msk.bf16.vlgmr.msra.gmra.mrb[136].mxu1 %vm834_vm2, %v4097_v40  ;;  %v4402_v48 = vsel %vm1088_vm3, %v4349_v46, 0 }
0x114a   :  { %7814 = vmatmul.mubr.msk.bf16.vlgmr.msra.gmra.mrb[112].mxu0 %vm36_vm0, %v9085_v25  ;;  %7888 = vmatpush3.bf16.msra.mxu1 %v4402_v48 }
0x114b   :  { %7826 = vmatpush3.bf16.msra.mxu0 %v8219_v44  ;;  %7829 = vmatprep.mubr.msk.bf16.mxu0 %vm8354_vm1, %v8353_v8 }
0x114c   :  { %7827 = vmatprep.subr.bf16.mxu0 %v8353_v8  ;;  %v9255_v49 = vpop.f32.mrb[128].mxu1  ;;  %7889 = vmatprep.mubr.msk.bf16.mxu1 %vm8354_vm1, %v8353_v8 }
0x114d   :  { %v7855_v50 = vpop.f32.mrb[129].mxu1  ;;  %7899 = vmatprep.subr.bf16.mxu1 %v8353_v8 }
0x114e   :  { %v4091_v51 = vpop.f32.mrb[130].mxu1 }
0x114f   :  { %7828 = vmatpush3.bf16.msra.mxu0 %v8220_v22  ;;  %v7856_v54 = vpop.f32.mrb[131].mxu1 }
0x1150   :  { %7841 = vmatprep.subr.bf16.mxu0 %v8353_v8 }
0x1152   :  { %7830 = vmatmul.mubr.msk.bf16.vlgmr.msra.gmra.mrb[116].mxu0 %vm36_vm0, %v9085_v25 }
0x1153   :  { %7842 = vmatpush3.bf16.msra.mxu0 %v8221_v53  ;;  %7845 = vmatprep.mubr.msk.bf16.mxu0 %vm8354_vm1, %v8353_v8 }
0x1154   :  { %7843 = vmatprep.subr.bf16.mxu0 %v8353_v8 }
0x1157   :  { %7844 = vmatpush3.bf16.msra.mxu0 %v8222_v55 }
0x1158   :  { %7857 = vmatprep.subr.bf16.mxu0 %v8353_v8 }
0x115a   :  { %7846 = vmatmul.mubr.msk.bf16.vlgmr.msra.gmra.mrb[120].mxu0 %vm36_vm0, %v9085_v25  ;;  %v9285_v25 = vld [vmem:[%s9792_s1 + $0x1] ss:$0 sm:$0xff] }
0x115b   :  { %7859 = vmatprep.mubr.msk.bf16.mxu0 %vm8354_vm1, %v8353_v8 }
0x1205   :  { %v9277_v56 = vpop.f32.mrb[100].mxu0 }
0x1206   :  { %v7759_v57 = vpop.f32.mrb[101].mxu0 }
0x1207   :  { %v3276_v45 = vpop.f32.mrb[102].mxu0 }
0x1208   :  { %v7760_v58 = vpop.f32.mrb[103].mxu0 }
0x120d   :  { %v3532_v59 = vpop.f32.mrb[104].mxu0 }
0x120e   :  { %v7783_v61 = vpop.f32.mrb[105].mxu0  ;;  %v3533_v37 = vadd.f32 %v6847_v52, %v3532_v59 }
0x120f   :  { %v3535_v62 = vpop.f32.mrb[106].mxu0 }
0x1210   :  { %v7784_v63 = vpop.f32.mrb[107].mxu0  ;;  %v4096_v43 = vpack.c.bf16 %v3533_v37, %v3533_v37  ;;  %v4541_v37 = vld [vmem:[%s9793_s6 + $0x4] sm:$0xf] }
0x1214   :  { %v4188_v38 = vpop.f32.mrb[132].mxu1 }
0x1215   :  { %v4287_v0 = vmul.f32 0.35355338, %v4188_v38  ;;  %v3680_v1 = vpop.f32.mrb[108].mxu0  ;;  %v7867_v2 = vpop.f32.mrb[133].mxu1 }
0x1216   :  { %v3681_v3 = vadd.f32 %v6881_v4, %v3680_v1  ;;  %v7799_v5 = vpop.f32.mrb[109].mxu0  ;;  %v4191_v6 = vpop.f32.mrb[134].mxu1 }
0x1217   :  { %v3683_v7 = vpop.f32.mrb[110].mxu0  ;;  %v4297_v9 = vadd.f32 %v9285_v25, %v4287_v0  ;;  %v7868_v60 = vpop.f32.mrb[135].mxu1 }
0x1218   :  { %v4098_v10 = vpack.c.bf16 %v3681_v3, %v3681_v3  ;;  %v7800_v11 = vpop.f32.mrb[111].mxu0 }
0x1219   :  { %v4303_v12 = vsel %vm834_vm2, %v4297_v9, -inf }
0x121a   :  { %v4106_v13 = vsel %vm834_vm2, %v4098_v10, 0  ;;  %4304 = vmax.xlane.f32.xlu1 %v4303_v12 }
0x121b   :  { %7858 = vmatpush3.bf16.xpose.msra.mxu0 %v4106_v13  ;;  %v6920_v13 = vld [vmem:[%s9791_s3 + $0xb] ss:$0 sm:$0xff] }
0x121c   :  { %v4280_v17 = vpop.f32.mrb[136].mxu1  ;;  %7869 = vmatprep.subr.bf16.mxu0 %v8353_v8 }
0x121d   :  { %v4289_v18 = vmul.f32 0.35355338, %v4280_v17  ;;  %v3784_v19 = vpop.f32.mrb[112].mxu0  ;;  %v7879_v21 = vpop.f32.mrb[137].mxu1 }
0x121e   :  { %v3785_v24 = vadd.f32 %v6883_v14, %v3784_v19  ;;  %v7815_v26 = vpop.f32.mrb[113].mxu0  ;;  %v4283_v27 = vpop.f32.mrb[138].mxu1  ;;  %v4089_v14 = vadd.f32 %v6920_v13, %v9255_v49 }
0x121f   :  { %v3787_v28 = vpop.f32.mrb[114].mxu0  ;;  %v4299_v29 = vadd.f32 %v9285_v25, %v4289_v18  ;;  %v7880_v30 = vpop.f32.mrb[139].mxu1 }
0x1220   :  { %v4100_v32 = vpack.c.bf16 %v3785_v24, %v3785_v24  ;;  %v7816_v33 = vpop.f32.mrb[115].mxu0  ;;  %v4351_v18 = vpack.c.bf16 %v4089_v14, %v4089_v14 }
0x1221   :  { %v4309_v34 = vsel %vm834_vm2, %v4299_v29, -inf }
0x1222   :  { %v4198_v35 = vsel %vm834_vm2, %v4100_v32, 0  ;;  %7860 = vmatmul.mubr.msk.bf16.vlgmr.msra.gmra.mrb[124].mxu0 %vm834_vm2, %v4094_v31  ;;  %4310 = vmax.xlane.f32.xlu1 %v4309_v34  ;;  %v4494_v24 = vsel %vm1088_vm3, %v4351_v18, 0 }
0x1223   :  { %7870 = vmatpush3.bf16.xpose.msra.mxu0 %v4198_v35  ;;  %7871 = vmatprep.mubr.msk.bf16.mxu0 %vm8354_vm1, %v8353_v8 }
0x1224   :  { %7881 = vmatprep.subr.bf16.mxu0 %v8353_v8 }
0x1225   :  { %v3932_v39 = vpop.f32.mrb[116].mxu0 }
0x1226   :  { %v3933_v40 = vadd.f32 %v6917_v36, %v3932_v39  ;;  %v7831_v41 = vpop.f32.mrb[117].mxu0  ;;  %v4594_v39 = vsel %vm1088_vm3, %v4541_v37, 0 }
0x1227   :  { %v3935_v42 = vpop.f32.mrb[118].mxu0  ;;  %v4543_v41 = vld [vmem:[%s9793_s6 + $0xc] sm:$0xf] }
0x1228   :  { %v4348_v44 = vpack.c.bf16 %v3933_v40, %v3933_v40  ;;  %v7832_v46 = vpop.f32.mrb[119].mxu0 }
0x1229   :  { %v4686_v46 = vsel %vm1088_vm3, %v4543_v41, 0  ;;  %v6946_v41 = vld [vmem:[%s9790_s2 + $0x2] ss:$0 sm:$0xff] }
0x122a   :  { %v4356_v47 = vsel %vm1088_vm3, %v4348_v44, 0  ;;  %7872 = vmatmul.mubr.msk.bf16.vlgmr.msra.gmra.mrb[128].mxu0 %vm834_vm2, %v4096_v43 }
0x122b   :  { %7882 = vmatpush3.bf16.msra.mxu0 %v4356_v47  ;;  %7883 = vmatprep.mubr.msk.bf16.mxu0 %vm8354_vm1, %v8353_v8 }
0x122c   :  { %7893 = vmatprep.subr.bf16.mxu0 %v8353_v8 }
0x122d   :  { %v9316_v48 = vpop.f32.mrb[120].mxu0 }
0x122e   :  { %v7847_v22 = vpop.f32.mrb[121].mxu0 }
0x122f   :  { %v4039_v50 = vpop.f32.mrb[122].mxu0  ;;  %v6919_v22 = vld [vmem:[%s9791_s3 + $0xa] ss:$0 sm:$0xff] }
0x1230   :  { %v7848_v51 = vpop.f32.mrb[123].mxu0 }
0x1231   :  { %v4037_v51 = vadd.f32 %v6919_v22, %v9316_v48 }
0x12a7   :  { %v4305_v53 = vpop.xlane.xlu1 %4304 }
0x12a8   :  { %v4313_v54 = vsub.f32 %v4297_v9, %v4305_v53 }
0x12aa   :  { %v4318_v55 = vmul.f32 1.442695, %v4313_v54 }
0x12ac   :  { %8305 = vpow2.f32 %v4318_v55 }
0x12af   :  { %v4311_v57 = vpop.xlane.xlu1 %4310 }
0x12b0   :  { %v4315_v45 = vsub.f32 %v4299_v29, %v4311_v57 }
0x12b2   :  { %v4322_v58 = vmul.f32 1.442695, %v4315_v45 }
0x12b4   :  { %8307 = vpow2.f32 %v4322_v58  ;;  %v4350_v58 = vpack.c.bf16 %v4037_v51, %v4037_v51 }
0x12b6   :  { %v8306_v59 = vpop.eup %8305 }
0x12b7   :  { %v4327_v61 = vsel %vm834_vm2, %v8306_v59, 0.0 }
0x12b8   :  { %4328 = vadd.xlane.f32.xlu1 %v4327_v61 }
0x12be   :  { %v8308_v62 = vpop.eup %8307 }
0x12bf   :  { %v4333_v63 = vsel %vm834_vm2, %v8308_v62, 0.0 }
0x12c0   :  { %4334 = vadd.xlane.f32.xlu1 %v4333_v63 }
0x12f5   :  { %v4142_v4 = vpop.f32.mrb[124].mxu0 }
0x12f6   :  { %v4286_v38 = vmul.f32 0.35355338, %v4142_v4  ;;  %v7861_v0 = vpop.f32.mrb[125].mxu0  ;;  %v4448_v4 = vsel %vm1088_vm3, %v4350_v58, 0 }
0x12f7   :  { %v4145_v1 = vpop.f32.mrb[126].mxu0 }
0x12f8   :  { %v7862_v2 = vpop.f32.mrb[127].mxu0  ;;  %v4296_v3 = vadd.f32 %v9285_v25, %v4286_v38  ;;  %v4540_v1 = vld [vmem:[%s9793_s6] sm:$0xf] }
0x12f9   :  { %v4548_v2 = vsel %vm1088_vm3, %v4540_v1, 0  ;;  %v8227_v1 = vld [vmem:[%s9795_s8 + $0x10] sm:$0xff]  }
0x12fa   :  { %v4300_v5 = vsel %vm834_vm2, %v4296_v3, -inf }
0x12fb   :  { %4301 = vmax.xlane.f32.xlu0 %v4300_v5 }
0x12fd   :  { %v4234_v6 = vpop.f32.mrb[128].mxu0 }
0x12fe   :  { %v4288_v7 = vmul.f32 0.35355338, %v4234_v6  ;;  %v7873_v9 = vpop.f32.mrb[129].mxu0 }
0x12ff   :  { %v4237_v60 = vpop.f32.mrb[130].mxu0 }
0x1300   :  { %v7874_v10 = vpop.f32.mrb[131].mxu0  ;;  %v4298_v11 = vadd.f32 %v9285_v25, %v4288_v7 }
0x1301   :  { %v4542_v10 = vld [vmem:[%s9793_s6 + $0x8] sm:$0xf] }
0x1302   :  { %v4306_v20 = vsel %vm834_vm2, %v4298_v11, -inf }
0x1303   :  { %4307 = vmax.xlane.f32.xlu0 %v4306_v20 }
0x1345   :  { %v4329_v12 = vpop.xlane.xlu1 %4328 }
0x1346   :  { %8309 = vrcp.f32 %v4329_v12 }
0x134d   :  { %v4335_v15 = vpop.xlane.xlu1 %4334 }
0x134e   :  { %8311 = vrcp.f32 %v4335_v15  ;;  %v4640_v15 = vsel %vm1088_vm3, %v4542_v10, 0 }
0x1350   :  { %v8310_v17 = vpop.eup %8309 }
0x1351   :  { %v4341_v19 = vmul.f32 %v8310_v17, %v8306_v59 }
0x1353   :  { %v4345_v21 = vpack.c.bf16 %v4341_v19, %v4341_v19 }
0x1355   :  { %7890 = vmatmul.mubr.msk.bf16.vlgmr.msra.gmra.mrb[140].mxu1 %vm834_vm2, %v4345_v21 }
0x1356   :  { %7900 = vmatpush3.bf16.msra.mxu1 %v4494_v24  ;;  %7901 = vmatprep.mubr.msk.bf16.mxu1 %vm8354_vm1, %v8353_v8 }
0x1357   :  { %7911 = vmatprep.subr.bf16.mxu1 %v8353_v8 }
0x1358   :  { %v8312_v26 = vpop.eup %8311 }
0x1359   :  { %v4343_v27 = vmul.f32 %v8312_v26, %v8308_v62 }
0x135b   :  { %v4347_v28 = vpack.c.bf16 %v4343_v27, %v4343_v27 }
0x135d   :  { %7902 = vmatmul.mubr.msk.bf16.vlgmr.msra.gmra.mrb[144].mxu1 %vm834_vm2, %v4347_v28 }
0x135e   :  { %7913 = vmatprep.mubr.msk.bf16.mxu1 %vm8354_vm1, %v8353_v8  ;;  %7912 = vmatpush3.bf16.msra.mxu1 %v4594_v39 }
0x135f   :  { %7923 = vmatprep.subr.bf16.mxu1 %v8353_v8 }
0x1388   :  { %v4302_v49 = vpop.xlane.xlu0 %4301 }
0x1389   :  { %v4312_v29 = vsub.f32 %v4296_v3, %v4302_v49 }
0x138b   :  { %v4316_v30 = vmul.f32 1.442695, %v4312_v29 }
0x138d   :  { %8313 = vpow2.f32 %v4316_v30 }
0x1390   :  { %v4308_v31 = vpop.xlane.xlu0 %4307 }
0x1391   :  { %v4314_v32 = vsub.f32 %v4298_v11, %v4308_v31 }
0x1393   :  { %v4320_v33 = vmul.f32 1.442695, %v4314_v32 }
0x1395   :  { %8315 = vpow2.f32 %v4320_v33 }
0x1397   :  { %v8314_v52 = vpop.eup %8313 }
0x1398   :  { %v4324_v34 = vsel %vm834_vm2, %v8314_v52, 0.0 }
0x1399   :  { %4325 = vadd.xlane.f32.xlu0 %v4324_v34 }
0x139f   :  { %v8316_v35 = vpop.eup %8315 }
0x13a0   :  { %v4330_v36 = vsel %vm834_vm2, %v8316_v35, 0.0 }
0x13a1   :  { %4331 = vadd.xlane.f32.xlu0 %v4330_v36 }
0x1426   :  { %v4326_v40 = vpop.xlane.xlu0 %4325 }
0x1427   :  { %8317 = vrcp.f32 %v4326_v40 }
0x1428   :  { %v4438_v42 = vpop.f32.mrb[140].mxu1 }
0x1429   :  { %v4537_v43 = vpack.c.bf16 %v4438_v42, %v4438_v42  ;;  %v7891_v44 = vpop.f32.mrb[141].mxu1 }
0x142a   :  { %v4441_v47 = vpop.f32.mrb[142].mxu1 }
0x142b   :  { %v7892_v50 = vpop.f32.mrb[143].mxu1  ;;  %7914 = vmatmul.mubr.msk.bf16.vlgmr.msra.gmra.mrb[148].mxu1 %vm834_vm2, %v4537_v43 }
0x142c   :  { %7924 = vmatpush3.bf16.msra.mxu1 %v4686_v46  ;;  %7925 = vmatprep.mubr.msk.bf16.mxu1 %vm8354_vm1, %v8353_v8 }
0x142d   :  { %7937 = vmatprep.subr.bf16.mxu1 %v8353_v8 }
0x142e   :  { %v4332_v53 = vpop.xlane.xlu0 %4331 }
0x142f   :  { %8319 = vrcp.f32 %v4332_v53 }
0x1430   :  { %v4530_v54 = vpop.f32.mrb[144].mxu1 }
0x1431   :  { %v8318_v55 = vpop.eup %8317  ;;  %v4539_v57 = vpack.c.bf16 %v4530_v54, %v4530_v54  ;;  %v7903_v45 = vpop.f32.mrb[145].mxu1  ;;  %v8223_v54 = vld [vmem:[%s9794_s7] sm:$0xff]  }
0x1432   :  { %v4340_v59 = vmul.f32 %v8318_v55, %v8314_v52  ;;  %v4533_v61 = vpop.f32.mrb[146].mxu1  ;;  %v8224_v55 = vld [vmem:[%s9794_s7 + $0x8] sm:$0xff]  }
0x1433   :  { %v7904_v62 = vpop.f32.mrb[147].mxu1  ;;  %7926 = vmatmul.mubr.msk.bf16.vlgmr.msra.gmra.mrb[152].mxu1 %vm834_vm2, %v4539_v57 }
0x1434   :  { %v4344_v63 = vpack.c.bf16 %v4340_v59, %v4340_v59  ;;  %7945 = vmatprep.mubr.msk.bf16.mxu1 %vm8354_vm1, %v8353_v8  ;;  %v6947_v59 = vld [vmem:[%s9790_s2 + $0x3] ss:$0 sm:$0xff]  ;;  %v6948_v62 = vld [vmem:[%s9790_s2 + $0x4] ss:$0 sm:$0xff] }
0x1436   :  { %7884 = vmatmul.mubr.msk.bf16.vlgmr.msra.gmra.mrb[132].mxu0 %vm834_vm2, %v4344_v63 }
0x1437   :  { %7894 = vmatpush3.bf16.msra.mxu0 %v4448_v4  ;;  %7895 = vmatprep.mubr.msk.bf16.mxu0 %vm8354_vm1, %v8353_v8 }
0x1438   :  { %7905 = vmatprep.subr.bf16.mxu0 %v8353_v8 }
0x1439   :  { %v8320_v48 = vpop.eup %8319 }
0x143a   :  { %v4342_v38 = vmul.f32 %v8320_v48, %v8316_v35 }
0x143c   :  { %v4346_v0 = vpack.c.bf16 %v4342_v38, %v4342_v38  ;;  %v8225_v38 = vld [vmem:[%s9795_s8] sm:$0xff]  }
0x143d   :  { %7938 = vmatpush3.bf16.msra.mxu1 %v8225_v38  ;;  %v8246_v38 = vld [vmem:[%s9789_s5 + $0x160] sm:$0xff]  }
0x143e   :  { %7896 = vmatmul.mubr.msk.bf16.vlgmr.msra.gmra.mrb[136].mxu0 %vm834_vm2, %v4346_v0  ;;  %v8226_v0 = vld [vmem:[%s9795_s8 + $0x8] sm:$0xff]   ;;  %7939 = vmatprep.subr.bf16.mxu1 %v8353_v8 }
0x143f   :  { %7907 = vmatprep.mubr.msk.bf16.mxu0 %vm8354_vm1, %v8353_v8  ;;  %7906 = vmatpush3.bf16.msra.mxu0 %v4548_v2  ;;  %v8228_v2 = vld [vmem:[%s9795_s8 + $0x18] sm:$0xff]  }
0x1440   :  { %7917 = vmatprep.subr.bf16.mxu0 %v8353_v8 }
0x1441   :  { %7940 = vmatpush3.bf16.msra.mxu1 %v8226_v0  ;;  %v8247_v0 = vld [vmem:[%s9789_s5 + $0x138] sm:$0xff]  }
0x1442   :  { %7941 = vmatprep.subr.bf16.mxu1 %v8353_v8 }
0x1445   :  { %7942 = vmatpush3.bf16.msra.mxu1 %v8227_v1  ;;  %v8248_v1 = vld [vmem:[%s9789_s5 + $0x168] sm:$0xff]  }
0x1446   :  { %7943 = vmatprep.subr.bf16.mxu1 %v8353_v8 }
0x1449   :  { %7944 = vmatpush3.bf16.msra.mxu1 %v8228_v2  ;;  %v8249_v2 = vld [vmem:[%s9789_s5 + $0x150] sm:$0xff]  }
0x144a   :  { %7965 = vmatprep.subr.bf16.mxu1 %v8353_v8 }
0x14fe   :  { %v4630_v3 = vpop.f32.mrb[148].mxu1 }
0x14ff   :  { %v7915_v5 = vpop.f32.mrb[149].mxu1  ;;  %v4729_v49 = vsel %vm36_vm0, %v4630_v3, 0.0  ;;  %v6949_v3 = vld [vmem:[%s9796_s4] ss:$0 sm:$0xff] }
0x1500   :  { %v4633_v6 = vpop.f32.mrb[150].mxu1 }
0x1501   :  { %v7916_v7 = vpop.f32.mrb[151].mxu1 }
0x1506   :  { %v4722_v9 = vpop.f32.mrb[152].mxu1 }
0x1507   :  { %v7927_v60 = vpop.f32.mrb[153].mxu1  ;;  %v4733_v39 = vsel %vm36_vm0, %v4722_v9, 0.0 }
0x1508   :  { %v4725_v11 = vpop.f32.mrb[154].mxu1 }
0x1509   :  { %v4392_v20 = vpop.f32.mrb[132].mxu0  ;;  %v7928_v12 = vpop.f32.mrb[155].mxu1 }
0x150a   :  { %v4536_v13 = vpack.c.bf16 %v4392_v20, %v4392_v20  ;;  %v7885_v14 = vpop.f32.mrb[133].mxu0 }
0x150b   :  { %v4395_v17 = vpop.f32.mrb[134].mxu0 }
0x150c   :  { %v7886_v18 = vpop.f32.mrb[135].mxu0  ;;  %7908 = vmatmul.mubr.msk.bf16.vlgmr.msra.gmra.mrb[140].mxu0 %vm834_vm2, %v4536_v13 }
0x150d   :  { %7918 = vmatpush3.bf16.msra.mxu0 %v4640_v15  ;;  %7919 = vmatprep.mubr.msk.bf16.mxu0 %vm8354_vm1, %v8353_v8 }
0x150e   :  { %7929 = vmatprep.subr.bf16.mxu0 %v8353_v8 }
0x1511   :  { %v4484_v19 = vpop.f32.mrb[136].mxu0 }
0x1512   :  { %v4538_v21 = vpack.c.bf16 %v4484_v19, %v4484_v19  ;;  %v7897_v24 = vpop.f32.mrb[137].mxu0 }
0x1513   :  { %v4487_v26 = vpop.f32.mrb[138].mxu0 }
0x1514   :  { %v7898_v27 = vpop.f32.mrb[139].mxu0  ;;  %7920 = vmatmul.mubr.msk.bf16.vlgmr.msra.gmra.mrb[144].mxu0 %vm834_vm2, %v4538_v21  ;;  %v6953_v21 = vld [vmem:[%s9790_s2 + $0x5] ss:$0 sm:$0xff] }
0x1515   :  { %7933 = vmatprep.mubr.msk.bf16.mxu0 %vm8354_vm1, %v8353_v8  ;;  %7930 = vmatpush3.bf16.msra.mxu0 %v8223_v54 }
0x1516   :  { %7931 = vmatprep.subr.bf16.mxu0 %v8353_v8 }
0x1519   :  { %7932 = vmatpush3.bf16.msra.mxu0 %v8224_v55  ;;  %v8235_v55 = vld [vmem:[%s9789_s5 + $0xd8] sm:$0xff]  }
0x151a   :  { %7949 = vmatprep.subr.bf16.mxu0 %v8353_v8 }
0x15df   :  { %v4584_v28 = vpop.f32.mrb[140].mxu0 }
0x15e0   :  { %v4728_v29 = vsel %vm36_vm0, %v4584_v28, 0.0  ;;  %v7909_v30 = vpop.f32.mrb[141].mxu0 }
0x15e1   :  { %v4730_v31 = vadd.f32 %v4729_v49, %v4728_v29  ;;  %v4587_v32 = vpop.f32.mrb[142].mxu0 }
0x15e2   :  { %v7910_v33 = vpop.f32.mrb[143].mxu0 }
0x15e7   :  { %v4676_v52 = vpop.f32.mrb[144].mxu0 }
0x15e8   :  { %v4731_v34 = vsel %vm36_vm0, %v4676_v52, 0.0  ;;  %v7921_v35 = vpop.f32.mrb[145].mxu0 }
0x15e9   :  { %v4732_v36 = vadd.f32 %v4731_v34, %v4730_v31  ;;  %v4679_v37 = vpop.f32.mrb[146].mxu0  ;;  %v8229_v35 = vld [vmem:[%s9789_s5 + $0xc0] sm:$0xff]  }
0x15ea   :  { %v7922_v40 = vpop.f32.mrb[147].mxu0  ;;  %v8231_v37 = vld [vmem:[%s9789_s5 + $0xc8] sm:$0xff]  }
0x15eb   :  { %v4734_v42 = vadd.f32 %v4733_v39, %v4732_v36  ;;  %v8230_v36 = vld [vmem:[%s9789_s5 + $0xe0] sm:$0xff]   ;;  %v8232_v39 = vld [vmem:[%s9789_s5 + $0xe8] sm:$0xff]  }
0x15ed   :  { %v4740_v43 = vadd.f32 %v6946_v41, %v4734_v42 }
0x15ef   :  { %v4741_v44 = vadd.f32 %v4740_v43, %v9074_v23 }
0x15f1   :  { %v4744_v46 = vsel %vm36_vm0, %v4741_v44, 0.0 }
0x15f2   :  { %4745 = vadd.xlane.f32.xlu0 %v4744_v46 }
0x167f   :  { %v4746_v47 = vpop.xlane.xlu0 %4745 }
0x1680   :  { %v4747_v22 = vmul.f32 0.03125, %v4746_v47  ;;  %v6960_v47 = vld [vmem:[%s9790_s2 + $0x7] ss:$0 sm:$0xff] }
0x1682   :  { %v4748_v50 = vsub.f32 %v4741_v44, %v4747_v22  ;;  %v6959_v44 = vld [vmem:[%s9790_s2 + $0x6] ss:$0 sm:$0xff] }
0x1684   :  { %v4749_v51 = vmul.f32 %v4748_v50, %v4748_v50 }
0x1686   :  { %v4750_v53 = vsel %vm36_vm0, %v4749_v51, 0.0  ;;  %v8233_v51 = vld [vmem:[%s9789_s5 + $0xd0] sm:$0xff]  }
0x1687   :  { %4751 = vadd.xlane.f32.xlu1 %v4750_v53  ;;  %v8234_v53 = vld [vmem:[%s9789_s5 + $0x100] sm:$0xff]  }
0x1714   :  { %v4752_v23 = vpop.xlane.xlu1 %4751 }
0x1715   :  { %v4753_v57 = vmul.f32 0.03125, %v4752_v23  ;;  %v8236_v23 = vld [vmem:[%s9789_s5 + $0x108] sm:$0xff]  }
0x1717   :  { %v4754_v45 = vadd.f32 1e-12, %v4753_v57  ;;  %v8237_v57 = vld [vmem:[%s9789_s5 + $0xf0] sm:$0xff]  }
0x1719   :  { %8321 = vrsqrt.f32 %v4754_v45  ;;  %v8238_v45 = vld [vmem:[%s9789_s5 + $0x120] sm:$0xff]  }
0x1723   :  { %v8322_v58 = vpop.eup %8321 }
0x1724   :  { %v4756_v61 = vmul.f32 %v8322_v58, %v4748_v50  ;;  %v8239_v58 = vld [vmem:[%s9789_s5 + $0xf8] sm:$0xff]  }
0x1726   :  { %v4761_v63 = vmul.f32 %v6947_v59, %v4756_v61  ;;  %v8240_v59 = vld [vmem:[%s9789_s5 + $0x128] sm:$0xff]   ;;  %v8241_v61 = vld [vmem:[%s9789_s5 + $0x110] sm:$0xff]  }
0x1728   :  { %v4766_v4 = vadd.f32 %v6948_v62, %v4761_v63  ;;  %v8242_v62 = vld [vmem:[%s9789_s5 + $0x140] sm:$0xff]   ;;  %v8243_v63 = vld [vmem:[%s9789_s5 + $0x118] sm:$0xff]  }
0x172a   :  { %v4767_v48 = vpack.c.bf16 %v4766_v4, %v4766_v4 }
0x172c   :  { %7934 = vmatmul.mubr.msk.bf16.vlgmr.msra.gmra.mrb[148].mxu0 %vm36_vm0, %v4767_v48  ;;  %v8245_v48 = vld [vmem:[%s9789_s5 + $0x130] sm:$0xff]  }
0x172d   :  { %7953 = vmatprep.mubr.msk.bf16.mxu0 %vm8354_vm1, %v8353_v8  ;;  %7950 = vmatpush3.bf16.msra.mxu0 %v8229_v35 }
0x172e   :  { %7951 = vmatprep.subr.bf16.mxu0 %v8353_v8 }
0x1731   :  { %7952 = vmatpush3.bf16.msra.mxu0 %v8231_v37 }
0x1732   :  { %7957 = vmatprep.subr.bf16.mxu0 %v8353_v8 }
0x17ff   :  { %v4828_v5 = vpop.f32.mrb[148].mxu0 }
0x1800   :  { %v4829_v6 = vadd.f32 %v6949_v3, %v4828_v5  ;;  %v7935_v7 = vpop.f32.mrb[149].mxu0  ;;  %v8250_v3 = vld [vmem:[%s9789_s5 + $0x158] sm:$0xff]   ;;  %v8251_v5 = vld [vmem:[%s9789_s5 + $0x170] sm:$0xff]  }
0x1801   :  { %v4831_v9 = vpop.f32.mrb[150].mxu0 }
0x1802   :  { %v4835_v60 = vmul.f32 0.044715, %v4829_v6  ;;  %v7936_v10 = vpop.f32.mrb[151].mxu0  ;;  %v4834_v15 = vmul.f32 0.5, %v4829_v6 }
0x1804   :  { %v4836_v11 = vmul.f32 %v4835_v60, %v4829_v6 }
0x1806   :  { %v4837_v20 = vmul.f32 %v4836_v11, %v4829_v6 }
0x1808   :  { %v4838_v12 = vadd.f32 %v4837_v20, %v4829_v6  ;;  %v8252_v6 = vld [vmem:[%s9789_s5 + $0x178] sm:$0xff]  }
0x180a   :  { %v4839_v13 = vmul.f32 0.7978846, %v4838_v12 }
0x180c   :  { %8323 = vtanh.f32 %v4839_v13 }
0x1816   :  { %v8324_v14 = vpop.eup %8323 }
0x1817   :  { %v4841_v17 = vadd.f32 1.0, %v8324_v14  ;;  %v7017_v14 = vld [vmem:[%s9791_s3 + $0x10] ss:$0 sm:$0xff] }
0x1819   :  { %v4842_v18 = vmul.f32 %v4841_v17, %v4834_v15 }
0x181b   :  { %v4843_v19 = vpack.c.bf16 %v4842_v18, %v4842_v18 }
0x181d   :  { %7946 = vmatmul.mubr.msk.bf16.vlgmr.msra.gmra.mrb[156].mxu1 %vm1615_vm4, %v4843_v19 }
0x181e   :  { %7969 = vmatprep.mubr.msk.bf16.mxu1 %vm8354_vm1, %v8353_v8  ;;  %7966 = vmatpush3.bf16.msra.mxu1 %v8230_v36 }
0x181f   :  { %7967 = vmatprep.subr.bf16.mxu1 %v8353_v8 }
0x1822   :  { %7968 = vmatpush3.bf16.msra.mxu1 %v8232_v39 }
0x1823   :  { %7981 = vmatprep.subr.bf16.mxu1 %v8353_v8 }
0x18f0   :  { %v4918_v24 = vpop.f32.mrb[156].mxu1 }
0x18f1   :  { %v4919_v26 = vadd.f32 %v6953_v21, %v4918_v24  ;;  %v7947_v27 = vpop.f32.mrb[157].mxu1 }
0x18f2   :  { %v4921_v28 = vpop.f32.mrb[158].mxu1 }
0x18f3   :  { %v7948_v49 = vpop.f32.mrb[159].mxu1  ;;  %v4924_v29 = vadd.f32 %v4919_v26, %v4766_v4  ;;  %v8244_v4 = vld [vmem:[%s9789_s5 + $0x148] sm:$0xff]  }
0x18f5   :  { %v4927_v30 = vsel %vm36_vm0, %v4924_v29, 0.0 }
0x18f6   :  { %4928 = vadd.xlane.f32.xlu0 %v4927_v30 }
0x1983   :  { %v4929_v31 = vpop.xlane.xlu0 %4928 }
0x1984   :  { %v4930_v32 = vmul.f32 0.03125, %v4929_v31  ;;  %v7019_v31 = vld [vmem:[%s9791_s3 + $0x12] ss:$0 sm:$0xff] }
0x1986   :  { %v4931_v33 = vsub.f32 %v4924_v29, %v4930_v32  ;;  %v6981_v29 = vld [vmem:[%s9791_s3 + $0xc] ss:$0 sm:$0xff] }
0x1988   :  { %v4932_v52 = vmul.f32 %v4931_v33, %v4931_v33 }
0x198a   :  { %v4933_v34 = vsel %vm36_vm0, %v4932_v52, 0.0 }
0x198b   :  { %4934 = vadd.xlane.f32.xlu1 %v4933_v34 }
0x1a18   :  { %v4935_v40 = vpop.xlane.xlu1 %4934 }
0x1a19   :  { %v4936_v41 = vmul.f32 0.03125, %v4935_v40 }
0x1a1b   :  { %v4937_v42 = vadd.f32 1e-12, %v4936_v41 }
0x1a1d   :  { %8325 = vrsqrt.f32 %v4937_v42 }
0x1a27   :  { %v8326_v43 = vpop.eup %8325 }
0x1a28   :  { %v4939_v46 = vmul.f32 %v8326_v43, %v4931_v33 }
0x1a2a   :  { %v4944_v22 = vmul.f32 %v6959_v44, %v4939_v46  ;;  %v6983_v44 = vld [vmem:[%s9791_s3 + $0xe] ss:$0 sm:$0xff] }
0x1a2c   :  { %v9458_v50 = vadd.f32 %v6960_v47, %v4944_v22  ;;  %v7018_v47 = vld [vmem:[%s9791_s3 + $0x11] ss:$0 sm:$0xff]  ;;  %v7053_v22 = vld [vmem:[%s9791_s3 + $0x14] ss:$0 sm:$0xff] }
0x1a2e   :  { %v9468_v54 = vpack.c.bf16 %v9458_v50, %v9458_v50 }
0x1a30   :  { %7954 = vmatmul.mubr.msk.bf16.vlgmr.msra.gmra.mrb[152].mxu0 %vm36_vm0, %v9468_v54  ;;  %7970 = vmatmul.mubr.msk.bf16.vlgmr.msra.gmra.mrb[160].mxu1 %vm36_vm0, %v9468_v54 }
0x1a31   :  { %7958 = vmatpush3.bf16.msra.mxu0 %v8233_v51  ;;  %7982 = vmatpush3.bf16.msra.mxu1 %v8234_v53 }
0x1a32   :  { %7959 = vmatprep.subr.bf16.mxu0 %v8353_v8  ;;  %7983 = vmatprep.subr.bf16.mxu1 %v8353_v8 }
0x1a33   :  { %7961 = vmatprep.mubr.msk.bf16.mxu0 %vm8354_vm1, %v8353_v8  ;;  %7985 = vmatprep.mubr.msk.bf16.mxu1 %vm8354_vm1, %v8353_v8 }
0x1a35   :  { %7960 = vmatpush3.bf16.msra.mxu0 %v8235_v55  ;;  %7984 = vmatpush3.bf16.msra.mxu1 %v8236_v23 }
0x1a36   :  { %7973 = vmatprep.subr.bf16.mxu0 %v8353_v8  ;;  %7997 = vmatprep.subr.bf16.mxu1 %v8353_v8 }
0x1a38   :  { %7962 = vmatmul.mubr.msk.bf16.vlgmr.msra.gmra.mrb[156].mxu0 %vm36_vm0, %v9468_v54  ;;  %7986 = vmatmul.mubr.msk.bf16.vlgmr.msra.gmra.mrb[164].mxu1 %vm36_vm0, %v9468_v54 }
0x1a39   :  { %7974 = vmatpush3.bf16.msra.mxu0 %v8237_v57  ;;  %7998 = vmatpush3.bf16.msra.mxu1 %v8238_v45 }
0x1a3a   :  { %7975 = vmatprep.subr.bf16.mxu0 %v8353_v8  ;;  %7999 = vmatprep.subr.bf16.mxu1 %v8353_v8 }
0x1a3b   :  { %7977 = vmatprep.mubr.msk.bf16.mxu0 %vm8354_vm1, %v8353_v8  ;;  %8001 = vmatprep.mubr.msk.bf16.mxu1 %vm8354_vm1, %v8353_v8 }
0x1a3d   :  { %7976 = vmatpush3.bf16.msra.mxu0 %v8239_v58  ;;  %8000 = vmatpush3.bf16.msra.mxu1 %v8240_v59 }
0x1a3e   :  { %7989 = vmatprep.subr.bf16.mxu0 %v8353_v8  ;;  %8013 = vmatprep.subr.bf16.mxu1 %v8353_v8 }
0x1a40   :  { %7978 = vmatmul.mubr.msk.bf16.vlgmr.msra.gmra.mrb[160].mxu0 %vm36_vm0, %v9468_v54  ;;  %8002 = vmatmul.mubr.msk.bf16.vlgmr.msra.gmra.mrb[168].mxu1 %vm36_vm0, %v9468_v54 }
0x1a41   :  { %7990 = vmatpush3.bf16.msra.mxu0 %v8241_v61  ;;  %8014 = vmatpush3.bf16.msra.mxu1 %v8242_v62 }
0x1a42   :  { %7991 = vmatprep.subr.bf16.mxu0 %v8353_v8  ;;  %8015 = vmatprep.subr.bf16.mxu1 %v8353_v8 }
0x1a43   :  { %7993 = vmatprep.mubr.msk.bf16.mxu0 %vm8354_vm1, %v8353_v8  ;;  %8017 = vmatprep.mubr.msk.bf16.mxu1 %vm8354_vm1, %v8353_v8 }
0x1a45   :  { %7992 = vmatpush3.bf16.msra.mxu0 %v8243_v63  ;;  %8016 = vmatpush3.bf16.msra.mxu1 %v8244_v4 }
0x1a46   :  { %8005 = vmatprep.subr.bf16.mxu0 %v8353_v8  ;;  %8029 = vmatprep.subr.bf16.mxu1 %v8353_v8 }
0x1a48   :  { %7994 = vmatmul.mubr.msk.bf16.vlgmr.msra.gmra.mrb[164].mxu0 %vm36_vm0, %v9468_v54  ;;  %8018 = vmatmul.mubr.msk.bf16.vlgmr.msra.gmra.mrb[172].mxu1 %vm36_vm0, %v9468_v54 }
0x1a49   :  { %8006 = vmatpush3.bf16.msra.mxu0 %v8245_v48  ;;  %8030 = vmatpush3.bf16.msra.mxu1 %v8246_v38  ;;  %v6982_v38 = vld [vmem:[%s9791_s3 + $0xd] ss:$0 sm:$0xff] }
0x1a4a   :  { %8007 = vmatprep.subr.bf16.mxu0 %v8353_v8  ;;  %8031 = vmatprep.subr.bf16.mxu1 %v8353_v8 }
0x1a4b   :  { %8009 = vmatprep.mubr.msk.bf16.mxu0 %vm8354_vm1, %v8353_v8  ;;  %8033 = vmatprep.mubr.msk.bf16.mxu1 %vm8354_vm1, %v8353_v8 }
0x1a4d   :  { %8008 = vmatpush3.bf16.msra.mxu0 %v8247_v0  ;;  %8032 = vmatpush3.bf16.msra.mxu1 %v8248_v1 }
0x1a4e   :  { %8021 = vmatprep.subr.bf16.mxu0 %v8353_v8  ;;  %8045 = vmatprep.subr.bf16.mxu1 %v8353_v8 }
0x1a50   :  { %8010 = vmatmul.mubr.msk.bf16.vlgmr.msra.gmra.mrb[168].mxu0 %vm36_vm0, %v9468_v54  ;;  %8034 = vmatmul.mubr.msk.bf16.vlgmr.msra.gmra.mrb[176].mxu1 %vm36_vm0, %v9468_v54 }
0x1a51   :  { %8022 = vmatpush3.bf16.msra.mxu0 %v8249_v2  ;;  %8025 = vmatprep.mubr.msk.bf16.mxu0 %vm8354_vm1, %v8353_v8  ;;  %v7020_v2 = vld [vmem:[%s9791_s3 + $0x13] ss:$0 sm:$0xff] }
0x1a52   :  { %8023 = vmatprep.subr.bf16.mxu0 %v8353_v8  ;;  %8047 = vmatprep.mubr.msk.bf16.mxu1 %vm8354_vm1, %v8353_v8 }
0x1a55   :  { %8024 = vmatpush3.bf16.msra.mxu0 %v8250_v3 }
0x1a56   :  { %8037 = vmatprep.subr.bf16.mxu0 %v8353_v8 }
0x1a58   :  { %8026 = vmatmul.mubr.msk.bf16.vlgmr.msra.gmra.mrb[172].mxu0 %vm36_vm0, %v9468_v54 }
0x1a59   :  { %8038 = vmatpush3.bf16.msra.mxu0 %v8251_v5  ;;  %8041 = vmatprep.mubr.msk.bf16.mxu0 %vm8354_vm1, %v8353_v8 }
0x1a5a   :  { %8039 = vmatprep.subr.bf16.mxu0 %v8353_v8 }
0x1a5d   :  { %8040 = vmatpush3.bf16.msra.mxu0 %v8252_v6 }
0x1a5e   :  { %8051 = vmatprep.subr.bf16.mxu0 %v8353_v8 }
0x1a60   :  { %8042 = vmatmul.mubr.msk.bf16.vlgmr.msra.gmra.mrb[176].mxu0 %vm36_vm0, %v9468_v54 }
0x1a61   :  { %8053 = vmatprep.mubr.msk.bf16.mxu0 %vm8354_vm1, %v8353_v8 }
0x1b03   :  { %v5044_v7 = vpop.f32.mrb[152].mxu0  ;;  %v5148_v9 = vpop.f32.mrb[160].mxu1 }
0x1b04   :  { %v7955_v60 = vpop.f32.mrb[153].mxu0  ;;  %v7971_v10 = vpop.f32.mrb[161].mxu1  ;;  %v5045_v32 = vadd.f32 %v6981_v29, %v5044_v7  ;;  %v5149_v51 = vadd.f32 %v6983_v44, %v5148_v9 }
0x1b05   :  { %v5047_v11 = vpop.f32.mrb[154].mxu0  ;;  %v5151_v20 = vpop.f32.mrb[162].mxu1 }
0x1b06   :  { %v7956_v12 = vpop.f32.mrb[155].mxu0  ;;  %v7972_v13 = vpop.f32.mrb[163].mxu1  ;;  %v5710_v40 = vpack.c.bf16 %v5045_v32, %v5045_v32  ;;  %v5712_v61 = vpack.c.bf16 %v5149_v51, %v5149_v51 }
0x1b0b   :  { %v5096_v15 = vpop.f32.mrb[156].mxu0  ;;  %v5296_v17 = vpop.f32.mrb[164].mxu1 }
0x1b0c   :  { %v5297_v18 = vadd.f32 %v7017_v14, %v5296_v17  ;;  %v7963_v19 = vpop.f32.mrb[157].mxu0  ;;  %v7987_v21 = vpop.f32.mrb[165].mxu1  ;;  %v5097_v3 = vadd.f32 %v6982_v38, %v5096_v15  ;;  %v6984_v15 = vld [vmem:[%s9791_s3 + $0xf] ss:$0 sm:$0xff] }
0x1b0d   :  { %v5099_v24 = vpop.f32.mrb[158].mxu0  ;;  %v5299_v26 = vpop.f32.mrb[166].mxu1 }
0x1b0e   :  { %v5714_v27 = vpack.c.bf16 %v5297_v18, %v5297_v18  ;;  %v7964_v28 = vpop.f32.mrb[159].mxu0  ;;  %v7988_v49 = vpop.f32.mrb[167].mxu1  ;;  %v5711_v20 = vpack.c.bf16 %v5097_v3, %v5097_v3  ;;  %v7054_v18 = vld [vmem:[%s9791_s3 + $0x15] ss:$0 sm:$0xff] }
0x1b10   :  { %v5722_v30 = vsel %vm834_vm2, %v5714_v27, 0 }
0x1b11   :  { %8046 = vmatpush3.bf16.xpose.msra.mxu1 %v5722_v30 }
0x1b12   :  { %8057 = vmatprep.subr.bf16.mxu1 %v8353_v8 }
0x1b13   :  { %v5200_v33 = vpop.f32.mrb[160].mxu0  ;;  %v5400_v52 = vpop.f32.mrb[168].mxu1 }
0x1b14   :  { %v5401_v34 = vadd.f32 %v7019_v31, %v5400_v52  ;;  %v7979_v35 = vpop.f32.mrb[161].mxu0  ;;  %v8003_v36 = vpop.f32.mrb[169].mxu1  ;;  %v5201_v19 = vadd.f32 %v6984_v15, %v5200_v33 }
0x1b15   :  { %v5203_v37 = vpop.f32.mrb[162].mxu0  ;;  %v5403_v39 = vpop.f32.mrb[170].mxu1 }
0x1b16   :  { %v5716_v41 = vpack.c.bf16 %v5401_v34, %v5401_v34  ;;  %v7980_v42 = vpop.f32.mrb[163].mxu0  ;;  %v8004_v43 = vpop.f32.mrb[171].mxu1  ;;  %v5713_v28 = vpack.c.bf16 %v5201_v19, %v5201_v19 }
0x1b18   :  { %v5814_v46 = vsel %vm834_vm2, %v5716_v41, 0  ;;  %8048 = vmatmul.mubr.msk.bf16.vlgmr.msra.gmra.mrb[180].mxu1 %vm834_vm2, %v5710_v40 }
0x1b19   :  { %8058 = vmatpush3.bf16.xpose.msra.mxu1 %v5814_v46  ;;  %8059 = vmatprep.mubr.msk.bf16.mxu1 %vm8354_vm1, %v8353_v8 }
0x1b1a   :  { %8069 = vmatprep.subr.bf16.mxu1 %v8353_v8 }
0x1b1b   :  { %v5348_v53 = vpop.f32.mrb[164].mxu0  ;;  %v5548_v54 = vpop.f32.mrb[172].mxu1 }
0x1b1c   :  { %v5349_v55 = vadd.f32 %v7018_v47, %v5348_v53  ;;  %v5549_v23 = vadd.f32 %v7053_v22, %v5548_v54  ;;  %v7995_v57 = vpop.f32.mrb[165].mxu0  ;;  %v8019_v45 = vpop.f32.mrb[173].mxu1 }
0x1b1d   :  { %v5351_v58 = vpop.f32.mrb[166].mxu0  ;;  %v5551_v59 = vpop.f32.mrb[174].mxu1  ;;  %v8352_v45 = vld [vmem:[%s9792_s1 + $0x1] ss:$0 sm:$0xff] }
0x1b1e   :  { %v5715_v62 = vpack.c.bf16 %v5349_v55, %v5349_v55  ;;  %v5958_v63 = vpack.c.bf16 %v5549_v23, %v5549_v23  ;;  %v7996_v4 = vpop.f32.mrb[167].mxu0  ;;  %v8020_v48 = vpop.f32.mrb[175].mxu1 }
0x1b20   :  { %v5768_v0 = vsel %vm834_vm2, %v5715_v62, 0  ;;  %v5966_v1 = vsel %vm1088_vm3, %v5958_v63, 0  ;;  %8060 = vmatmul.mubr.msk.bf16.vlgmr.msra.gmra.mrb[184].mxu1 %vm834_vm2, %v5712_v61 }
0x1b21   :  { %8052 = vmatpush3.bf16.xpose.msra.mxu0 %v5768_v0  ;;  %8070 = vmatpush3.bf16.msra.mxu1 %v5966_v1 }
0x1b22   :  { %8063 = vmatprep.subr.bf16.mxu0 %v8353_v8  ;;  %8071 = vmatprep.mubr.msk.bf16.mxu1 %vm8354_vm1, %v8353_v8 }
0x1b23   :  { %v5452_v5 = vpop.f32.mrb[168].mxu0  ;;  %v9629_v6 = vpop.f32.mrb[176].mxu1  ;;  %8081 = vmatprep.subr.bf16.mxu1 %v8353_v8 }
0x1b24   :  { %v5453_v7 = vadd.f32 %v7020_v2, %v5452_v5  ;;  %v8011_v9 = vpop.f32.mrb[169].mxu0  ;;  %v8035_v60 = vpop.f32.mrb[177].mxu1 }
0x1b25   :  { %v5455_v10 = vpop.f32.mrb[170].mxu0  ;;  %v5655_v11 = vpop.f32.mrb[178].mxu1 }
0x1b26   :  { %v5717_v12 = vpack.c.bf16 %v5453_v7, %v5453_v7  ;;  %v8012_v13 = vpop.f32.mrb[171].mxu0  ;;  %v8036_v14 = vpop.f32.mrb[179].mxu1 }
0x1b28   :  { %v5860_v17 = vsel %vm834_vm2, %v5717_v12, 0  ;;  %8054 = vmatmul.mubr.msk.bf16.vlgmr.msra.gmra.mrb[180].mxu0 %vm834_vm2, %v5711_v20 }
0x1b29   :  { %8064 = vmatpush3.bf16.xpose.msra.mxu0 %v5860_v17  ;;  %8065 = vmatprep.mubr.msk.bf16.mxu0 %vm8354_vm1, %v8353_v8 }
0x1b2a   :  { %8075 = vmatprep.subr.bf16.mxu0 %v8353_v8 }
0x1b2b   :  { %v5600_v21 = vpop.f32.mrb[172].mxu0 }
0x1b2c   :  { %v5601_v24 = vadd.f32 %v7054_v18, %v5600_v21  ;;  %v8027_v26 = vpop.f32.mrb[173].mxu0 }
0x1b2d   :  { %v5603_v27 = vpop.f32.mrb[174].mxu0 }
0x1b2e   :  { %v5959_v49 = vpack.c.bf16 %v5601_v24, %v5601_v24  ;;  %v8028_v29 = vpop.f32.mrb[175].mxu0  ;;  %v7055_v27 = vld [vmem:[%s9791_s3 + $0x16] ss:$0 sm:$0xff] }
0x1b30   :  { %v6012_v30 = vsel %vm1088_vm3, %v5959_v49, 0  ;;  %8066 = vmatmul.mubr.msk.bf16.vlgmr.msra.gmra.mrb[184].mxu0 %vm834_vm2, %v5713_v28  ;;  %v5653_v28 = vadd.f32 %v7055_v27, %v9629_v6 }
0x1b31   :  { %8076 = vmatpush3.bf16.msra.mxu0 %v6012_v30  ;;  %8077 = vmatprep.mubr.msk.bf16.mxu0 %vm8354_vm1, %v8353_v8 }
0x1b32   :  { %8087 = vmatprep.subr.bf16.mxu0 %v8353_v8  ;;  %v5960_v30 = vpack.c.bf16 %v5653_v28, %v5653_v28 }
0x1b33   :  { %v9648_v31 = vpop.f32.mrb[176].mxu0 }
0x1b34   :  { %v8043_v32 = vpop.f32.mrb[177].mxu0 }
0x1b35   :  { %v5707_v33 = vpop.f32.mrb[178].mxu0 }
0x1b36   :  { %v8044_v52 = vpop.f32.mrb[179].mxu0 }
0x1b37   :  { %v6058_v52 = vsel %vm1088_vm3, %v5960_v30, 0 }
0x1beb   :  { %v5758_v34 = vpop.f32.mrb[180].mxu1 }
0x1bec   :  { %v5902_v35 = vmul.f32 0.35355338, %v5758_v34  ;;  %v8049_v36 = vpop.f32.mrb[181].mxu1 }
0x1bed   :  { %v5761_v37 = vpop.f32.mrb[182].mxu1  ;;  %v7056_v36 = vld [vmem:[%s9791_s3 + $0x17] ss:$0 sm:$0xff] }
0x1bee   :  { %v8050_v39 = vpop.f32.mrb[183].mxu1  ;;  %v5906_v40 = vadd.f32 %v9285_v25, %v5902_v35 }
0x1bef   :  { %v5705_v39 = vadd.f32 %v7056_v36, %v9648_v31 }
0x1bf0   :  { %v5910_v41 = vsel %vm834_vm2, %v5906_v40, -inf }
0x1bf1   :  { %5911 = vmax.xlane.f32.xlu0 %v5910_v41 }
0x1bf3   :  { %v5850_v42 = vpop.f32.mrb[184].mxu1 }
0x1bf4   :  { %v5904_v43 = vmul.f32 0.35355338, %v5850_v42  ;;  %v8061_v44 = vpop.f32.mrb[185].mxu1  ;;  %v5961_v42 = vpack.c.bf16 %v5705_v39, %v5705_v39 }
0x1bf5   :  { %v5853_v46 = vpop.f32.mrb[186].mxu1 }
0x1bf6   :  { %v8062_v47 = vpop.f32.mrb[187].mxu1  ;;  %v5908_v22 = vadd.f32 %v9285_v25, %v5904_v43  ;;  %v6104_v46 = vsel %vm1088_vm3, %v5961_v42, 0 }
0x1bf8   :  { %v5916_v51 = vsel %vm834_vm2, %v5908_v22, -inf }
0x1bf9   :  { %5917 = vmax.xlane.f32.xlu0 %v5916_v51  ;;  %v7077_v51 = vld [vmem:[%s9793_s6 + $0x10] sm:$0xf] }
0x1bfb   :  { %v5804_v53 = vpop.f32.mrb[180].mxu0 }
0x1bfc   :  { %v5903_v54 = vmul.f32 0.35355338, %v5804_v53  ;;  %v8055_v55 = vpop.f32.mrb[181].mxu0  ;;  %v6158_v53 = vsel %vm1088_vm3, %v7077_v51, 0 }
0x1bfd   :  { %v5807_v23 = vpop.f32.mrb[182].mxu0 }
0x1bfe   :  { %v8056_v57 = vpop.f32.mrb[183].mxu0  ;;  %v5907_v58 = vadd.f32 %v8352_v45, %v5903_v54  ;;  %v7078_v54 = vld [vmem:[%s9793_s6 + $0x14] sm:$0xf]  ;;  %v7079_v23 = vld [vmem:[%s9793_s6 + $0x18] sm:$0xf] }
0x1bff   :  { %v6204_v55 = vsel %vm1088_vm3, %v7078_v54, 0 }
0x1c00   :  { %v5913_v59 = vsel %vm834_vm2, %v5907_v58, -inf }
0x1c01   :  { %5914 = vmax.xlane.f32.xlu1 %v5913_v59  ;;  %v6250_v59 = vsel %vm1088_vm3, %v7079_v23, 0  ;;  %v8254_v23 = vld [vmem:[%s9794_s7 + $0x18] sm:$0xff]  }
0x1c03   :  { %v5896_v61 = vpop.f32.mrb[184].mxu0 }
0x1c04   :  { %v5905_v62 = vmul.f32 0.35355338, %v5896_v61  ;;  %v8067_v63 = vpop.f32.mrb[185].mxu0 }
0x1c05   :  { %v5899_v25 = vpop.f32.mrb[186].mxu0 }
0x1c06   :  { %v8068_v4 = vpop.f32.mrb[187].mxu0  ;;  %v5909_v48 = vadd.f32 %v8352_v45, %v5905_v62 }
0x1c08   :  { %v5919_v38 = vsel %vm834_vm2, %v5909_v48, -inf }
0x1c09   :  { %5920 = vmax.xlane.f32.xlu1 %v5919_v38 }
0x1c7e   :  { %v5912_v0 = vpop.xlane.xlu0 %5911 }
0x1c7f   :  { %v5922_v1 = vsub.f32 %v5906_v40, %v5912_v0  ;;  %v7080_v0 = vld [vmem:[%s9793_s6 + $0x1c] sm:$0xf] }
0x1c81   :  { %v5926_v2 = vmul.f32 1.442695, %v5922_v1 }
0x1c83   :  { %8327 = vpow2.f32 %v5926_v2 }
0x1c86   :  { %v5918_v3 = vpop.xlane.xlu0 %5917 }
0x1c87   :  { %v5924_v5 = vsub.f32 %v5908_v22, %v5918_v3 }
0x1c89   :  { %v5930_v7 = vmul.f32 1.442695, %v5924_v5  ;;  %v6296_v5 = vsel %vm1088_vm3, %v7080_v0, 0 }
0x1c8b   :  { %8329 = vpow2.f32 %v5930_v7 }
0x1c8d   :  { %v8328_v9 = vpop.eup %8327 }
0x1c8e   :  { %v5915_v60 = vpop.xlane.xlu1 %5914  ;;  %v5934_v10 = vsel %vm834_vm2, %v8328_v9, 0.0 }
0x1c8f   :  { %v5923_v11 = vsub.f32 %v5907_v58, %v5915_v60  ;;  %5935 = vadd.xlane.f32.xlu0 %v5934_v10 }
0x1c91   :  { %v5928_v20 = vmul.f32 1.442695, %v5923_v11 }
0x1c93   :  { %8331 = vpow2.f32 %v5928_v20 }
0x1c95   :  { %v8330_v12 = vpop.eup %8329 }
0x1c96   :  { %v5921_v13 = vpop.xlane.xlu1 %5920  ;;  %v5940_v14 = vsel %vm834_vm2, %v8330_v12, 0.0 }
0x1c97   :  { %v5925_v15 = vsub.f32 %v5909_v48, %v5921_v13  ;;  %5941 = vadd.xlane.f32.xlu0 %v5940_v14 }
0x1c99   :  { %v5932_v17 = vmul.f32 1.442695, %v5925_v15 }
0x1c9b   :  { %8333 = vpow2.f32 %v5932_v17 }
0x1c9d   :  { %v8332_v18 = vpop.eup %8331 }
0x1c9e   :  { %v5937_v19 = vsel %vm834_vm2, %v8332_v18, 0.0 }
0x1c9f   :  { %5938 = vadd.xlane.f32.xlu1 %v5937_v19 }
0x1ca5   :  { %v8334_v21 = vpop.eup %8333 }
0x1ca6   :  { %v5943_v24 = vsel %vm834_vm2, %v8334_v21, 0.0 }
0x1ca7   :  { %5944 = vadd.xlane.f32.xlu1 %v5943_v24 }
0x1d1c   :  { %v5936_v26 = vpop.xlane.xlu0 %5935 }
0x1d1d   :  { %8335 = vrcp.f32 %v5936_v26 }
0x1d24   :  { %v5942_v49 = vpop.xlane.xlu0 %5941 }
0x1d25   :  { %8337 = vrcp.f32 %v5942_v49 }
0x1d27   :  { %v8336_v29 = vpop.eup %8335 }
0x1d28   :  { %v5950_v32 = vmul.f32 %v8336_v29, %v8328_v9 }
0x1d2a   :  { %v5954_v33 = vpack.c.bf16 %v5950_v32, %v5950_v32 }
0x1d2c   :  { %v5939_v34 = vpop.xlane.xlu1 %5938  ;;  %8072 = vmatmul.mubr.msk.bf16.vlgmr.msra.gmra.mrb[188].mxu1 %vm834_vm2, %v5954_v33 }
0x1d2d   :  { %8339 = vrcp.f32 %v5939_v34  ;;  %8082 = vmatpush3.bf16.msra.mxu1 %v6058_v52  ;;  %8083 = vmatprep.mubr.msk.bf16.mxu1 %vm8354_vm1, %v8353_v8 }
0x1d2e   :  { %8093 = vmatprep.subr.bf16.mxu1 %v8353_v8 }
0x1d2f   :  { %v8338_v35 = vpop.eup %8337 }
0x1d30   :  { %v5952_v6 = vmul.f32 %v8338_v35, %v8330_v12 }
0x1d32   :  { %v5956_v37 = vpack.c.bf16 %v5952_v6, %v5952_v6  ;;  %v7085_v6 = vld [vmem:[%s9790_s2 + $0x8] ss:$0 sm:$0xff] }
0x1d34   :  { %v5945_v40 = vpop.xlane.xlu1 %5944  ;;  %8084 = vmatmul.mubr.msk.bf16.vlgmr.msra.gmra.mrb[192].mxu1 %vm834_vm2, %v5956_v37 }
0x1d35   :  { %8341 = vrcp.f32 %v5945_v40  ;;  %8095 = vmatprep.mubr.msk.bf16.mxu1 %vm8354_vm1, %v8353_v8  ;;  %8094 = vmatpush3.bf16.msra.mxu1 %v6158_v53 }
0x1d36   :  { %8105 = vmatprep.subr.bf16.mxu1 %v8353_v8 }
0x1d37   :  { %v8340_v41 = vpop.eup %8339 }
0x1d38   :  { %v5951_v43 = vmul.f32 %v8340_v41, %v8332_v18 }
0x1d3a   :  { %v5955_v44 = vpack.c.bf16 %v5951_v43, %v5951_v43 }
0x1d3c   :  { %8078 = vmatmul.mubr.msk.bf16.vlgmr.msra.gmra.mrb[188].mxu0 %vm834_vm2, %v5955_v44  ;;  %v6833_v44 = vld [vmem:[%s9790_s2 + $0xb] ss:$0 sm:$0xff] }
0x1d3d   :  { %8088 = vmatpush3.bf16.msra.mxu0 %v6104_v46  ;;  %8089 = vmatprep.mubr.msk.bf16.mxu0 %vm8354_vm1, %v8353_v8 }
0x1d3e   :  { %8099 = vmatprep.subr.bf16.mxu0 %v8353_v8 }
0x1d3f   :  { %v8342_v31 = vpop.eup %8341 }
0x1d40   :  { %v5953_v47 = vmul.f32 %v8342_v31, %v8334_v21 }
0x1d42   :  { %v5957_v22 = vpack.c.bf16 %v5953_v47, %v5953_v47  ;;  %v3274_v47 = vadd.f32 %v6833_v44, %v9277_v56 }
0x1d44   :  { %8090 = vmatmul.mubr.msk.bf16.vlgmr.msra.gmra.mrb[192].mxu0 %vm834_vm2, %v5957_v22  ;;  %v3279_v54 = vadd.f32 %v3274_v47, %v9064_v16 }
0x1d45   :  { %8101 = vmatprep.mubr.msk.bf16.mxu0 %vm8354_vm1, %v8353_v8  ;;  %8100 = vmatpush3.bf16.msra.mxu0 %v6204_v55  ;;  %v8253_v55 = vld [vmem:[%s9794_s7 + $0x10] sm:$0xff]  }
0x1d46   :  { %8111 = vmatprep.subr.bf16.mxu0 %v8353_v8 }
0x1dff   :  { %v6002_v57 = vpop.f32.mrb[188].mxu1 }
0x1e00   :  { %v6146_v45 = vpack.c.bf16 %v6002_v57, %v6002_v57  ;;  %v8073_v58 = vpop.f32.mrb[189].mxu1 }
0x1e01   :  { %v6005_v61 = vpop.f32.mrb[190].mxu1 }
0x1e02   :  { %v8074_v62 = vpop.f32.mrb[191].mxu1  ;;  %8096 = vmatmul.mubr.msk.bf16.vlgmr.msra.gmra.mrb[196].mxu1 %vm834_vm2, %v6146_v45 }
0x1e03   :  { %8106 = vmatpush3.bf16.msra.mxu1 %v6250_v59  ;;  %8107 = vmatprep.mubr.msk.bf16.mxu1 %vm8354_vm1, %v8353_v8 }
0x1e04   :  { %8117 = vmatprep.subr.bf16.mxu1 %v8353_v8 }
0x1e07   :  { %v6094_v63 = vpop.f32.mrb[192].mxu1 }
0x1e08   :  { %v6148_v25 = vpack.c.bf16 %v6094_v63, %v6094_v63  ;;  %v8085_v4 = vpop.f32.mrb[193].mxu1 }
0x1e09   :  { %v6097_v48 = vpop.f32.mrb[194].mxu1 }
0x1e0a   :  { %v8086_v38 = vpop.f32.mrb[195].mxu1  ;;  %8108 = vmatmul.mubr.msk.bf16.vlgmr.msra.gmra.mrb[200].mxu1 %vm834_vm2, %v6148_v25  ;;  %v7086_v25 = vld [vmem:[%s9790_s2 + $0x9] ss:$0 sm:$0xff]  ;;  %v7087_v48 = vld [vmem:[%s9790_s2 + $0xa] ss:$0 sm:$0xff] }
0x1e0b   :  { %8121 = vmatprep.mubr.msk.bf16.mxu1 %vm8354_vm1, %v8353_v8  ;;  %8118 = vmatpush3.bf16.msra.mxu1 %v8253_v55 }
0x1e0c   :  { %8119 = vmatprep.subr.bf16.mxu1 %v8353_v8 }
0x1e0f   :  { %v6048_v1 = vpop.f32.mrb[188].mxu0  ;;  %8120 = vmatpush3.bf16.msra.mxu1 %v8254_v23 }
0x1e10   :  { %v6147_v2 = vpack.c.bf16 %v6048_v1, %v6048_v1  ;;  %v8079_v3 = vpop.f32.mrb[189].mxu0 }
0x1e11   :  { %v6051_v7 = vpop.f32.mrb[190].mxu0  ;;  %v8256_v3 = vld [vmem:[%s9795_s8 + $0x28] sm:$0xff]  }
0x1e12   :  { %v8080_v9 = vpop.f32.mrb[191].mxu0  ;;  %8102 = vmatmul.mubr.msk.bf16.vlgmr.msra.gmra.mrb[196].mxu0 %vm834_vm2, %v6147_v2  ;;  %v8255_v2 = vld [vmem:[%s9795_s8 + $0x20] sm:$0xff]   ;;  %v8258_v7 = vld [vmem:[%s9795_s8 + $0x38] sm:$0xff]  }
0x1e13   :  { %8112 = vmatpush3.bf16.msra.mxu0 %v6296_v5  ;;  %8113 = vmatprep.mubr.msk.bf16.mxu0 %vm8354_vm1, %v8353_v8  ;;  %v8257_v5 = vld [vmem:[%s9795_s8 + $0x30] sm:$0xff]   ;;  %v7093_v9 = vld [vmem:[%s9796_s4 + $0x1] ss:$0 sm:$0xff] }
0x1e14   :  { %8125 = vmatprep.subr.bf16.mxu0 %v8353_v8 }
0x1e17   :  { %v6140_v60 = vpop.f32.mrb[192].mxu0 }
0x1e18   :  { %v6149_v10 = vpack.c.bf16 %v6140_v60, %v6140_v60  ;;  %v8091_v11 = vpop.f32.mrb[193].mxu0 }
0x1e19   :  { %v6143_v20 = vpop.f32.mrb[194].mxu0 }
0x1e1a   :  { %v8092_v12 = vpop.f32.mrb[195].mxu0  ;;  %8114 = vmatmul.mubr.msk.bf16.vlgmr.msra.gmra.mrb[200].mxu0 %vm834_vm2, %v6149_v10 }
0x1e1b   :  { %8133 = vmatprep.mubr.msk.bf16.mxu0 %vm8354_vm1, %v8353_v8  ;;  %8126 = vmatpush3.bf16.msra.mxu0 %v8255_v2 }
0x1e1c   :  { %8127 = vmatprep.subr.bf16.mxu0 %v8353_v8 }
0x1e1f   :  { %8128 = vmatpush3.bf16.msra.mxu0 %v8256_v3 }
0x1e20   :  { %8129 = vmatprep.subr.bf16.mxu0 %v8353_v8 }
0x1e23   :  { %8130 = vmatpush3.bf16.msra.mxu0 %v8257_v5 }
0x1e24   :  { %8131 = vmatprep.subr.bf16.mxu0 %v8353_v8 }
0x1e27   :  { %8132 = vmatpush3.bf16.msra.mxu0 %v8258_v7 }
0x1ed5   :  { %v6194_v13 = vpop.f32.mrb[196].mxu1 }
0x1ed6   :  { %v8097_v14 = vpop.f32.mrb[197].mxu1  ;;  %v6338_v27 = vsel %vm36_vm0, %v6194_v13, 0.0 }
0x1ed7   :  { %v6197_v15 = vpop.f32.mrb[198].mxu1 }
0x1ed8   :  { %v8098_v17 = vpop.f32.mrb[199].mxu1 }
0x1edd   :  { %v6286_v18 = vpop.f32.mrb[200].mxu1 }
0x1ede   :  { %v8109_v19 = vpop.f32.mrb[201].mxu1  ;;  %v6341_v32 = vsel %vm36_vm0, %v6286_v18, 0.0 }
0x1edf   :  { %v6289_v21 = vpop.f32.mrb[202].mxu1 }
0x1ee0   :  { %v8110_v24 = vpop.f32.mrb[203].mxu1 }
0x1ee5   :  { %v6240_v26 = vpop.f32.mrb[196].mxu0 }
0x1ee6   :  { %v6339_v28 = vsel %vm36_vm0, %v6240_v26, 0.0  ;;  %v8103_v49 = vpop.f32.mrb[197].mxu0 }
0x1ee7   :  { %v6340_v29 = vadd.f32 %v6339_v28, %v6338_v27  ;;  %v6243_v30 = vpop.f32.mrb[198].mxu0  ;;  %v7105_v27 = vld [vmem:[%s9790_s2 + $0xb] ss:$0 sm:$0xff] }
0x1ee8   :  { %v8104_v33 = vpop.f32.mrb[199].mxu0 }
0x1ee9   :  { %v6342_v52 = vadd.f32 %v6341_v32, %v6340_v29 }
0x1eed   :  { %v6332_v34 = vpop.f32.mrb[200].mxu0 }
0x1eee   :  { %v6343_v35 = vsel %vm36_vm0, %v6332_v34, 0.0  ;;  %v8115_v36 = vpop.f32.mrb[201].mxu0 }
0x1eef   :  { %v6344_v37 = vadd.f32 %v6343_v35, %v6342_v52  ;;  %v6335_v39 = vpop.f32.mrb[202].mxu0 }
0x1ef0   :  { %v8116_v40 = vpop.f32.mrb[203].mxu0 }
0x1ef1   :  { %v6350_v41 = vadd.f32 %v7085_v6, %v6344_v37 }
0x1ef3   :  { %v6351_v42 = vadd.f32 %v6350_v41, %v9458_v50  ;;  %v3282_v50 = vsel %vm36_vm0, %v3279_v54, 0.0 }
0x1ef5   :  { %v6354_v43 = vsel %vm36_vm0, %v6351_v42, 0.0 }
0x1ef6   :  { %6355 = vadd.xlane.f32.xlu0 %v6354_v43 }
0x1f83   :  { %v6356_v46 = vpop.xlane.xlu0 %6355 }
0x1f84   :  { %v6357_v31 = vmul.f32 0.03125, %v6356_v46 }
0x1f86   :  { %v6358_v22 = vsub.f32 %v6351_v42, %v6357_v31 }
0x1f88   :  { %v6359_v51 = vmul.f32 %v6358_v22, %v6358_v22 }
0x1f8a   :  { %v6360_v53 = vsel %vm36_vm0, %v6359_v51, 0.0 }
0x1f8b   :  { %6361 = vadd.xlane.f32.xlu1 %v6360_v53 }
0x1f8f   :  { %3283 = vadd.xlane.f32.xlu1 %v3282_v50  ;;  %v6840_v50 = vld [vmem:[%s9790_s2 + $0xd] ss:$0 sm:$0xff] }
0x2018   :  { %v6362_v56 = vpop.xlane.xlu1 %6361 }
0x2019   :  { %v6363_v57 = vmul.f32 0.03125, %v6362_v56 }
0x201b   :  { %v6364_v45 = vadd.f32 1e-12, %v6363_v57 }
0x201c   :  { %v3284_v16 = vpop.xlane.xlu1 %3283 }
0x201d   :  { %8343 = vrsqrt.f32 %v6364_v45  ;;  %v3285_v58 = vmul.f32 0.03125, %v3284_v16 }
0x201f   :  { %v9742_v59 = vsub.f32 %v3279_v54, %v3285_v58 }
0x2021   :  { %v3287_v61 = vmul.f32 %v9742_v59, %v9742_v59 }
0x2023   :  { %v3288_v62 = vsel %vm36_vm0, %v3287_v61, 0.0 }
0x2024   :  { %3289 = vadd.xlane.f32.xlu1 %v3288_v62 }
0x2027   :  { %v8344_v63 = vpop.eup %8343 }
0x2028   :  { %v6366_v4 = vmul.f32 %v8344_v63, %v6358_v22  ;;  %v6839_v22 = vld [vmem:[%s9790_s2 + $0xc] ss:$0 sm:$0xff] }
0x202a   :  { %v6371_v38 = vmul.f32 %v7086_v25, %v6366_v4 }
0x202c   :  { %v6376_v0 = vadd.f32 %v7087_v48, %v6371_v38 }
0x202e   :  { %v6377_v1 = vpack.c.bf16 %v6376_v0, %v6376_v0 }
0x2030   :  { %8122 = vmatmul.mubr.msk.bf16.vlgmr.msra.gmra.mrb[204].mxu1 %vm36_vm0, %v6377_v1 }
0x20b1   :  { %v3290_v39 = vpop.xlane.xlu1 %3289 }
0x20b2   :  { %v3291_v40 = vmul.f32 0.03125, %v3290_v39 }
0x20b4   :  { %v3292_v41 = vadd.f32 1e-12, %v3291_v40 }
0x2103   :  { %v6438_v60 = vpop.f32.mrb[204].mxu1 }
0x2104   :  { %v6439_v10 = vadd.f32 %v7093_v9, %v6438_v60  ;;  %v8123_v11 = vpop.f32.mrb[205].mxu1 }
0x2105   :  { %v6441_v20 = vpop.f32.mrb[206].mxu1 }
0x2106   :  { %v6445_v12 = vmul.f32 0.044715, %v6439_v10  ;;  %v8124_v13 = vpop.f32.mrb[207].mxu1  ;;  %v6444_v21 = vmul.f32 0.5, %v6439_v10 }
0x2108   :  { %v6446_v14 = vmul.f32 %v6445_v12, %v6439_v10 }
0x210a   :  { %v6447_v15 = vmul.f32 %v6446_v14, %v6439_v10 }
0x210c   :  { %v6448_v17 = vadd.f32 %v6447_v15, %v6439_v10 }
0x210e   :  { %v6449_v18 = vmul.f32 0.7978846, %v6448_v17 }
0x2110   :  { %8345 = vtanh.f32 %v6449_v18 }
0x2111   :  { %8347 = vrsqrt.f32 %v3292_v41 }
0x211a   :  { %v8346_v19 = vpop.eup %8345 }
0x211b   :  { %v6451_v24 = vadd.f32 1.0, %v8346_v19  ;;  %v8348_v46 = vpop.eup %8347 }
0x211c   :  { %v3294_v31 = vmul.f32 %v8348_v46, %v9742_v59 }
0x211d   :  { %v6452_v8 = vmul.f32 %v6451_v24, %v6444_v21 }
0x211e   :  { %v3299_v53 = vmul.f32 %v6839_v22, %v3294_v31 }
0x211f   :  { %v6453_v26 = vpack.c.bf16 %v6452_v8, %v6452_v8 }
0x2120   :  { %v3304_v23 = vadd.f32 %v6840_v50, %v3299_v53 }
0x2121   :  { %8134 = vmatmul.mubr.msk.bf16.vlgmr.msra.gmra.mrb[204].mxu0 %vm1615_vm4, %v6453_v26 }
0x21f4   :  { %v6528_v28 = vpop.f32.mrb[204].mxu0 }
0x21f5   :  { %v6529_v49 = vadd.f32 %v7105_v27, %v6528_v28  ;;  %v8135_v29 = vpop.f32.mrb[205].mxu0 }
0x21f6   :  { %v6531_v30 = vpop.f32.mrb[206].mxu0 }
0x21f7   :  { %v8136_v32 = vpop.f32.mrb[207].mxu0  ;;  %v6534_v33 = vadd.f32 %v6529_v49, %v6376_v0 }
0x21f9   :  { %v6537_v52 = vsel %vm36_vm0, %v6534_v33, 0.0 }
0x21fa   :  { %6538 = vadd.xlane.f32.xlu0 %v6537_v52 }
0x2287   :  { %v6539_v34 = vpop.xlane.xlu0 %6538 }
0x2288   :  { %v6540_v35 = vmul.f32 0.03125, %v6539_v34 }
0x228a   :  { %v6541_v6 = vsub.f32 %v6534_v33, %v6540_v35 }
0x228c   :  { %v6542_v36 = vmul.f32 %v6541_v6, %v6541_v6 }
0x228e   :  { %v6543_v37 = vsel %vm36_vm0, %v6542_v36, 0.0 }
0x228f   :  { %6544 = vadd.xlane.f32.xlu0 %v6543_v37 }
0x231c   :  { %v6545_v42 = vpop.xlane.xlu0 %6544 }
0x231d   :  { %v6546_v43 = vmul.f32 0.03125, %v6545_v42 }
0x231f   :  { %v6547_v44 = vadd.f32 1e-12, %v6546_v43 }
0x2321   :  { %8349 = vrsqrt.f32 %v6547_v44 }
0x232b   :  { %v8350_v47 = vpop.eup %8349 }
0x232c   :  { %v6549_v51 = vmul.f32 %v8350_v47, %v6541_v6 }
0x232e   :  { %v6554_v54 = vmul.f32 %v6839_v22, %v6549_v51 }
0x2330   :  { %v6559_v55 = vadd.f32 %v6840_v50, %v6554_v54 }
0x2332   :  { %v6561_v56 = vrot.slane %v6559_v55, 7 }
0x2334   :  { %v6564_v57 = vsel %vm6563_vm5, %v3304_v23, %v6561_v56 }
0x2335   :  { %6566 = vst.msk [vmem:[%s9797_s9] sm:$0x3] %vm6565_vm6, %v6564_v57 }

</bundles_post_ra>
